<compile_context>
chip_gen: v7x
topology: tpu7x:2x2x1
jax: 0.10.0
libtpu: 0.0.40
codegen_flags: <defaults>
</compile_context>

<pallas_src>
import jax
import jax.numpy as jnp
from jax.experimental import pallas as pl
from jax.experimental.pallas import tpu as pltpu

REAL_MIN = 1e-10      # real_min in the PyTorch module
REAL_MAX = 10.0       # real_max in the PyTorch module

# cfg.TEXT.DIMENSION_THETA{1,2,3}  (must equal the repmat dims 256/128/64)
T1, T2, T3 = 256, 128, 64
EPS_W = T1 + T2 + T3            # 448
OUT_W = 3 * (T1 + T2 + T3)      # 1344  (single lane-dense output slab)

# column offsets inside the output slab: [t1|sh1|sc1|t2|sh2|sc2|t3|sh3|sc3]
_O_T1, _O_S1, _O_C1 = 0, T1, 2 * T1
_O_T2 = 3 * T1
_O_S2 = _O_T2 + T2
_O_C2 = _O_S2 + T2
_O_T3 = _O_C2 + T2
_O_S3 = _O_T3 + T3
_O_C3 = _O_S3 + T3


# ----------------------------------------------------------------------------
# Pallas kernel: entire MLP_ENCODER forward for one batch tile
# ----------------------------------------------------------------------------
def _mlp_encoder_kernel(
    eps_ref, flat_ref,
    h1w, h1b, s1w, s1b, c1w, c1b,
    h2w, h2b, s2w, s2b, c2w, c2b,
    h3w, h3b, s3w, s3b, c3w, c3b,
    out_ref,
):
    bm = flat_ref.shape[0]

    def linear(x, w_ref, b_ref):
        # bf16 operands on the MXU, f32 accumulation, f32 epilogue.
        return jnp.dot(x.astype(jnp.bfloat16), w_ref[...],
                       preferred_element_type=jnp.float32) + b_ref[...]

    def softplus(x):                      # torch.log(1 + torch.exp(x))
        return jnp.log(1.0 + jnp.exp(x))

    def weibull_head(h, sw_ref, sb_ref, cw_ref, cb_ref, eps_k, kdim):
        # shape net: Linear(Din, 1) + repmat(kdim)  -- f32 lane reduction
        raw = jnp.sum(h * sw_ref[...], axis=-1, keepdims=True) + sb_ref[...]
        shp_col = jnp.minimum(jnp.maximum(softplus(raw), REAL_MIN), REAL_MAX)
        inv_col = 1.0 / shp_col                     # one divide per row
        shp = jnp.broadcast_to(shp_col, (bm, kdim))
        # scale net: Linear(Din, kdim)
        scl = jnp.maximum(softplus(linear(h, cw_ref, cb_ref)), REAL_MIN)
        # reparameterize: theta = scale * (-log_max(1 - eps)) ** (1 / shape)
        x = -jnp.log(jnp.maximum(1.0 - eps_k, REAL_MIN))
        theta = scl * jnp.power(x, inv_col)
        return theta, shp, scl

    eps = eps_ref[...]
    e1 = eps[:, :T1]
    e2 = eps[:, T1:T1 + T2]
    e3 = eps[:, T1 + T2:T1 + T2 + T3]

    # ---- stage 1: 2048 -> 512 -------------------------------------------------
    h1 = jnp.tanh(linear(flat_ref[...], h1w, h1b))
    t1, sh1, sc1 = weibull_head(h1, s1w, s1b, c1w, c1b, e1, T1)

    # ---- stage 2: 512 -> 256 --------------------------------------------------
    h2 = jnp.tanh(linear(h1, h2w, h2b))
    t2, sh2, sc2 = weibull_head(h2, s2w, s2b, c2w, c2b, e2, T2)

    # ---- stage 3: 256 -> 128 --------------------------------------------------
    h3 = jnp.tanh(linear(h2, h3w, h3b))
    t3, sh3, sc3 = weibull_head(h3, s3w, s3b, c3w, c3b, e3, T3)

    # ---- single lane-dense output slab (one HBM writeback per batch tile) -----
    out_ref[:, _O_T1:_O_T1 + T1] = t1
    out_ref[:, _O_S1:_O_S1 + T1] = sh1
    out_ref[:, _O_C1:_O_C1 + T1] = sc1
    out_ref[:, _O_T2:_O_T2 + T2] = t2
    out_ref[:, _O_S2:_O_S2 + T2] = sh2
    out_ref[:, _O_C2:_O_C2 + T2] = sc2
    out_ref[:, _O_T3:_O_T3 + T3] = t3
    out_ref[:, _O_S3:_O_S3 + T3] = sh3
    out_ref[:, _O_C3:_O_C3 + T3] = sc3


# ----------------------------------------------------------------------------
# Wrapper
# ----------------------------------------------------------------------------
@jax.jit
def mlp_encoder_forward(flat, params, eps):
    """flat: (B, 2048) f32; eps: (B, 448) f32 uniform[0,1).
    Returns the 9 tensors of MLP_ENCODER.forward."""
    B = flat.shape[0]
    BM = min(128, B)                      # batch tile (sublane multiple)
    if B % BM != 0 or BM % 8 != 0:
        raise ValueError("batch size must be a multiple of 8")

    ordered = (
        params["h1_w"], params["h1_b"], params["s1_w"], params["s1_b"],
        params["c1_w"], params["c1_b"],
        params["h2_w"], params["h2_b"], params["s2_w"], params["s2_b"],
        params["c2_w"], params["c2_b"],
        params["h3_w"], params["h3_b"], params["s3_w"], params["s3_b"],
        params["c3_w"], params["c3_b"],
    )

    def batched(width):
        return pl.BlockSpec((BM, width), lambda i: (i, 0))

    def resident(arr):                    # constant index_map -> VMEM-resident
        return pl.BlockSpec(arr.shape, lambda i: (0, 0))

    out = pl.pallas_call(
        _mlp_encoder_kernel,
        out_shape=jax.ShapeDtypeStruct((B, OUT_W), jnp.float32),
        grid=(B // BM,),
        in_specs=[batched(EPS_W), batched(2048)] + [resident(a) for a in ordered],
        out_specs=batched(OUT_W),
        compiler_params=pltpu.CompilerParams(
            dimension_semantics=("parallel",)),
    )(eps, flat, *ordered)

    return (
        out[:, _O_T1:_O_T1 + T1], out[:, _O_S1:_O_S1 + T1], out[:, _O_C1:_O_C1 + T1],
        out[:, _O_T2:_O_T2 + T2], out[:, _O_S2:_O_S2 + T2], out[:, _O_C2:_O_C2 + T2],
        out[:, _O_T3:_O_T3 + T3], out[:, _O_S3:_O_S3 + T3], out[:, _O_C3:_O_C3 + T3],
    )


# ----------------------------------------------------------------------------
# Parameter init (deterministic, synthetic).  Matmul weights are stored bf16 in
# (in, out) layout; shape-net weights stay f32 as (1, in) rows; biases f32 (1, out).
# Real torch weights would need a transpose (and shape-net weights a reshape).
# ----------------------------------------------------------------------------
def init_params(key):
    def linear_p(k, din, dout, w_dtype=jnp.float32):
        kw, kb = jax.random.split(k)
        bound = 1.0 / (din ** 0.5)
        w = jax.random.uniform(kw, (din, dout), jnp.float32, -bound, bound)
        b = jax.random.uniform(kb, (1, dout), jnp.float32, -bound, bound)
        return w.astype(w_dtype), b

    bf16 = jnp.bfloat16
    keys = jax.random.split(key, 9)
    p = {}
    p["h1_w"], p["h1_b"] = linear_p(keys[0], 2048, 512, bf16)   # h_mlp_1
    sw, sb = linear_p(keys[1], 512, 1)                          # shape_net_mlp_1
    p["s1_w"], p["s1_b"] = sw.reshape(1, 512), sb
    p["c1_w"], p["c1_b"] = linear_p(keys[2], 512, T1, bf16)     # scale_net_mlp_1
    p["h2_w"], p["h2_b"] = linear_p(keys[3], 512, 256, bf16)    # h_mlp_2
    sw, sb = linear_p(keys[4], 256, 1)                          # shape_net_mlp_2
    p["s2_w"], p["s2_b"] = sw.reshape(1, 256), sb
    p["c2_w"], p["c2_b"] = linear_p(keys[5], 256, T2, bf16)     # scale_net_mlp_2
    p["h3_w"], p["h3_b"] = linear_p(keys[6], 256, 128, bf16)    # h_mlp_3
    sw, sb = linear_p(keys[7], 128, 1)                          # shape_net_mlp_3
    p["s3_w"], p["s3_b"] = sw.reshape(1, 128), sb
    p["c3_w"], p["c3_b"] = linear_p(keys[8], 128, T3, bf16)     # scale_net_mlp_3
    return p


# ----------------------------------------------------------------------------
# Pure-JAX reference (same bf16-operand / f32-accumulate matmuls, same eps)
# ----------------------------------------------------------------------------
def _reference_forward(flat, p, eps):
    def lin(x, w, b):
        return jnp.dot(x.astype(jnp.bfloat16), w,
                       preferred_element_type=jnp.float32) + b

    def softplus(x):
        return jnp.log(1.0 + jnp.exp(x))

    def head(h, sw, sb, cw, cb, eps_k, kdim):
        raw = jnp.sum(h * sw, axis=-1, keepdims=True) + sb
        shp_col = jnp.clip(softplus(raw), REAL_MIN, REAL_MAX)
        shp = jnp.broadcast_to(shp_col, (h.shape[0], kdim))
        scl = jnp.maximum(softplus(lin(h, cw, cb)), REAL_MIN)
        x = -jnp.log(jnp.maximum(1.0 - eps_k, REAL_MIN))
        theta = scl * jnp.power(x, 1.0 / shp_col)
        return theta, shp, scl

    h1 = jnp.tanh(lin(flat, p["h1_w"], p["h1_b"]))
    t1, sh1, sc1 = head(h1, p["s1_w"], p["s1_b"], p["c1_w"], p["c1_b"],
                        eps[:, :T1], T1)
    h2 = jnp.tanh(lin(h1, p["h2_w"], p["h2_b"]))
    t2, sh2, sc2 = head(h2, p["s2_w"], p["s2_b"], p["c2_w"], p["c2_b"],
                        eps[:, T1:T1 + T2], T2)
    h3 = jnp.tanh(lin(h2, p["h3_w"], p["h3_b"]))
    t3, sh3, sc3 = head(h3, p["s3_w"], p["s3_b"], p["c3_w"], p["c3_b"],
                        eps[:, T1 + T2:T1 + T2 + T3], T3)
    return (t1, sh1, sc1, t2, sh2, sc2, t3, sh3, sc3)


if __name__ == "__main__":
    key = jax.random.PRNGKey(0)
    k_param, k_flat, k_eps = jax.random.split(key, 3)
    params = init_params(k_param)

    B = 8
    flat = jax.random.normal(k_flat, (B, 2048), jnp.float32)
    # eps ~ U[0,1), same role as torch.FloatTensor(B, K).uniform_()
    eps = jax.random.uniform(k_eps, (B, EPS_W), jnp.float32)

    outs = jax.block_until_ready(mlp_encoder_forward(flat, params, eps))
    (theta1, shape1, scale1,
     theta2, shape2, scale2,
     theta3, shape3, scale3) = outs

    # shape checks
    assert theta1.shape == (B, T1) and shape1.shape == (B, T1) and scale1.shape == (B, T1)
    assert theta2.shape == (B, T2) and shape2.shape == (B, T2) and scale2.shape == (B, T2)
    assert theta3.shape == (B, T3) and shape3.shape == (B, T3) and scale3.shape == (B, T3)

    # all 9 outputs vs pure-JAX reference (same eps, same bf16 matmul precision)
    ref = _reference_forward(flat, params, eps)
    for got, want in zip(outs, ref):
        assert bool(jnp.allclose(got, want, rtol=2e-2, atol=2e-2)), "mismatch vs reference"

    # sanity: finite, non-negative thetas; clamps respected
    for th in (theta1, theta2, theta3):
        assert bool(jnp.all(jnp.isfinite(th))) and bool(jnp.all(th >= 0.0))
    for sh in (shape1, shape2, shape3):
        assert bool(jnp.all(sh >= REAL_MIN)) and bool(jnp.all(sh <= REAL_MAX))
    for sc in (scale1, scale2, scale3):
        assert bool(jnp.all(sc >= REAL_MIN))

    print("KERNEL_OK")
</pallas_src>

<mosaic_0001>
module attributes {stable_mosaic.version = 11 : i64} {
  func.func @_mlp_encoder_kernel(%arg0: i32, %arg1: memref<8x448xf32, #tpu.memory_space<vmem>>, %arg2: memref<8x2048xf32, #tpu.memory_space<vmem>>, %arg3: memref<2048x512xbf16, #tpu.memory_space<vmem>>, %arg4: memref<1x512xf32, #tpu.memory_space<vmem>>, %arg5: memref<1x512xf32, #tpu.memory_space<vmem>>, %arg6: memref<1x1xf32, #tpu.memory_space<vmem>>, %arg7: memref<512x256xbf16, #tpu.memory_space<vmem>>, %arg8: memref<1x256xf32, #tpu.memory_space<vmem>>, %arg9: memref<512x256xbf16, #tpu.memory_space<vmem>>, %arg10: memref<1x256xf32, #tpu.memory_space<vmem>>, %arg11: memref<1x256xf32, #tpu.memory_space<vmem>>, %arg12: memref<1x1xf32, #tpu.memory_space<vmem>>, %arg13: memref<256x128xbf16, #tpu.memory_space<vmem>>, %arg14: memref<1x128xf32, #tpu.memory_space<vmem>>, %arg15: memref<256x128xbf16, #tpu.memory_space<vmem>>, %arg16: memref<1x128xf32, #tpu.memory_space<vmem>>, %arg17: memref<1x128xf32, #tpu.memory_space<vmem>>, %arg18: memref<1x1xf32, #tpu.memory_space<vmem>>, %arg19: memref<128x64xbf16, #tpu.memory_space<vmem>>, %arg20: memref<1x64xf32, #tpu.memory_space<vmem>>, %arg21: memref<8x1344xf32, #tpu.memory_space<vmem>>) attributes {dimension_semantics = [#tpu.dimension_semantics<parallel>], iteration_bounds = array<i64: 1>, scalar_prefetch = 0 : i64, scratch_operands = 0 : i64, tpu.core_type = #tpu.core_type<tc>, window_params = [{transform_indices = @transform_0, window_bounds = array<i64: 8, 448>}, {transform_indices = @transform_1, window_bounds = array<i64: 8, 2048>}, {pipeline_mode = #tpu.pipeline_mode<synchronous>, transform_indices = @transform_2, window_bounds = array<i64: 2048, 512>}, {pipeline_mode = #tpu.pipeline_mode<synchronous>, transform_indices = @transform_3, window_bounds = array<i64: 1, 512>}, {pipeline_mode = #tpu.pipeline_mode<synchronous>, transform_indices = @transform_4, window_bounds = array<i64: 1, 512>}, {pipeline_mode = #tpu.pipeline_mode<synchronous>, transform_indices = @transform_5, window_bounds = array<i64: 1, 1>}, {pipeline_mode = #tpu.pipeline_mode<synchronous>, transform_indices = @transform_6, window_bounds = array<i64: 512, 256>}, {pipeline_mode = #tpu.pipeline_mode<synchronous>, transform_indices = @transform_7, window_bounds = array<i64: 1, 256>}, {pipeline_mode = #tpu.pipeline_mode<synchronous>, transform_indices = @transform_8, window_bounds = array<i64: 512, 256>}, {pipeline_mode = #tpu.pipeline_mode<synchronous>, transform_indices = @transform_9, window_bounds = array<i64: 1, 256>}, {pipeline_mode = #tpu.pipeline_mode<synchronous>, transform_indices = @transform_10, window_bounds = array<i64: 1, 256>}, {pipeline_mode = #tpu.pipeline_mode<synchronous>, transform_indices = @transform_11, window_bounds = array<i64: 1, 1>}, {pipeline_mode = #tpu.pipeline_mode<synchronous>, transform_indices = @transform_12, window_bounds = array<i64: 256, 128>}, {pipeline_mode = #tpu.pipeline_mode<synchronous>, transform_indices = @transform_13, window_bounds = array<i64: 1, 128>}, {pipeline_mode = #tpu.pipeline_mode<synchronous>, transform_indices = @transform_14, window_bounds = array<i64: 256, 128>}, {pipeline_mode = #tpu.pipeline_mode<synchronous>, transform_indices = @transform_15, window_bounds = array<i64: 1, 128>}, {pipeline_mode = #tpu.pipeline_mode<synchronous>, transform_indices = @transform_16, window_bounds = array<i64: 1, 128>}, {pipeline_mode = #tpu.pipeline_mode<synchronous>, transform_indices = @transform_17, window_bounds = array<i64: 1, 1>}, {pipeline_mode = #tpu.pipeline_mode<synchronous>, transform_indices = @transform_18, window_bounds = array<i64: 128, 64>}, {pipeline_mode = #tpu.pipeline_mode<synchronous>, transform_indices = @transform_19, window_bounds = array<i64: 1, 64>}, {transform_indices = @transform_20, window_bounds = array<i64: 8, 1344>}]} {
    %c0 = arith.constant 0 : index
    %c0_0 = arith.constant 0 : index
    %0 = vector.load %arg1[%c0, %c0_0] : memref<8x448xf32, #tpu.memory_space<vmem>>, vector<8x448xf32>
    %1 = vector.extract_strided_slice %0 {offsets = [0, 0], sizes = [8, 256], strides = [1, 1]} : vector<8x448xf32> to vector<8x256xf32>
    %2 = vector.extract_strided_slice %0 {offsets = [0, 256], sizes = [8, 128], strides = [1, 1]} : vector<8x448xf32> to vector<8x128xf32>
    %3 = vector.extract_strided_slice %0 {offsets = [0, 384], sizes = [8, 64], strides = [1, 1]} : vector<8x448xf32> to vector<8x64xf32>
    %c0_1 = arith.constant 0 : index
    %c0_2 = arith.constant 0 : index
    %4 = vector.load %arg2[%c0_1, %c0_2] : memref<8x2048xf32, #tpu.memory_space<vmem>>, vector<8x2048xf32>
    %5 = arith.truncf %4 : vector<8x2048xf32> to vector<8x2048xbf16>
    %c0_3 = arith.constant 0 : index
    %c0_4 = arith.constant 0 : index
    %6 = vector.load %arg3[%c0_3, %c0_4] : memref<2048x512xbf16, #tpu.memory_space<vmem>>, vector<2048x512xbf16>
    %cst = arith.constant dense<0.000000e+00> : vector<8x512xf32>
    %7 = tpu.matmul %5, %6, %cst {dimension_numbers = #tpu.dot_dimension_numbers<[1], [0], [0], [1], [0, 0, 1, 1], [], []>} : vector<8x2048xbf16>, vector<2048x512xbf16>, vector<8x512xf32> -> vector<8x512xf32>
    %c0_5 = arith.constant 0 : index
    %c0_6 = arith.constant 0 : index
    %8 = vector.load %arg4[%c0_5, %c0_6] : memref<1x512xf32, #tpu.memory_space<vmem>>, vector<1x512xf32>
    %9 = vector.broadcast %8 : vector<1x512xf32> to vector<8x512xf32>
    %10 = arith.addf %7, %9 : vector<8x512xf32>
    %11 = math.tanh %10 : vector<8x512xf32>
    %c0_7 = arith.constant 0 : index
    %c0_8 = arith.constant 0 : index
    %12 = vector.load %arg5[%c0_7, %c0_8] : memref<1x512xf32, #tpu.memory_space<vmem>>, vector<1x512xf32>
    %13 = vector.broadcast %12 : vector<1x512xf32> to vector<8x512xf32>
    %14 = arith.mulf %11, %13 : vector<8x512xf32>
    %cst_9 = arith.constant dense<0.000000e+00> : vector<8xf32>
    %15 = vector.multi_reduction <add>, %14, %cst_9 [1] : vector<8x512xf32> to vector<8xf32>
    %16 = vector.shape_cast %15 : vector<8xf32> to vector<8x1xf32>
    %c0_10 = arith.constant 0 : index
    %c0_11 = arith.constant 0 : index
    %17 = vector.load %arg6[%c0_10, %c0_11] : memref<1x1xf32, #tpu.memory_space<vmem>>, vector<1x1xf32>
    %18 = vector.broadcast %17 : vector<1x1xf32> to vector<8x1xf32>
    %19 = arith.addf %16, %18 : vector<8x1xf32>
    %20 = math.exp %19 : vector<8x1xf32>
    %cst_12 = arith.constant 1.000000e+00 : f32
    %21 = vector.broadcast %cst_12 : f32 to vector<8x1xf32>
    %22 = arith.addf %21, %20 : vector<8x1xf32>
    %23 = math.log %22 : vector<8x1xf32>
    %cst_13 = arith.constant 1.000000e-10 : f32
    %24 = vector.broadcast %cst_13 : f32 to vector<8x1xf32>
    %25 = arith.maximumf %23, %24 : vector<8x1xf32>
    %cst_14 = arith.constant 1.000000e+01 : f32
    %26 = vector.broadcast %cst_14 : f32 to vector<8x1xf32>
    %27 = arith.minimumf %25, %26 : vector<8x1xf32>
    %cst_15 = arith.constant 1.000000e+00 : f32
    %28 = vector.broadcast %cst_15 : f32 to vector<8x1xf32>
    %29 = arith.divf %28, %27 : vector<8x1xf32>
    %30 = vector.shape_cast %27 : vector<8x1xf32> to vector<8x1xf32>
    %31 = vector.broadcast %30 : vector<8x1xf32> to vector<8x256xf32>
    %32 = arith.truncf %11 : vector<8x512xf32> to vector<8x512xbf16>
    %c0_16 = arith.constant 0 : index
    %c0_17 = arith.constant 0 : index
    %33 = vector.load %arg7[%c0_16, %c0_17] : memref<512x256xbf16, #tpu.memory_space<vmem>>, vector<512x256xbf16>
    %cst_18 = arith.constant dense<0.000000e+00> : vector<8x256xf32>
    %34 = tpu.matmul %32, %33, %cst_18 {dimension_numbers = #tpu.dot_dimension_numbers<[1], [0], [0], [1], [0, 0, 1, 1], [], []>} : vector<8x512xbf16>, vector<512x256xbf16>, vector<8x256xf32> -> vector<8x256xf32>
    %c0_19 = arith.constant 0 : index
    %c0_20 = arith.constant 0 : index
    %35 = vector.load %arg8[%c0_19, %c0_20] : memref<1x256xf32, #tpu.memory_space<vmem>>, vector<1x256xf32>
    %36 = vector.broadcast %35 : vector<1x256xf32> to vector<8x256xf32>
    %37 = arith.addf %34, %36 : vector<8x256xf32>
    %38 = math.exp %37 : vector<8x256xf32>
    %cst_21 = arith.constant 1.000000e+00 : f32
    %39 = vector.broadcast %cst_21 : f32 to vector<8x256xf32>
    %40 = arith.addf %39, %38 : vector<8x256xf32>
    %41 = math.log %40 : vector<8x256xf32>
    %cst_22 = arith.constant 1.000000e-10 : f32
    %42 = vector.broadcast %cst_22 : f32 to vector<8x256xf32>
    %43 = arith.maximumf %41, %42 : vector<8x256xf32>
    %cst_23 = arith.constant 1.000000e+00 : f32
    %44 = vector.broadcast %cst_23 : f32 to vector<8x256xf32>
    %45 = arith.subf %44, %1 : vector<8x256xf32>
    %cst_24 = arith.constant 1.000000e-10 : f32
    %46 = vector.broadcast %cst_24 : f32 to vector<8x256xf32>
    %47 = arith.maximumf %45, %46 : vector<8x256xf32>
    %48 = math.log %47 : vector<8x256xf32>
    %cst_25 = arith.constant 0.000000e+00 : f32
    %49 = vector.broadcast %cst_25 : f32 to vector<8x256xf32>
    %50 = arith.subf %49, %48 : vector<8x256xf32>
    %51 = vector.broadcast %29 : vector<8x1xf32> to vector<8x256xf32>
    %52 = math.powf %50, %51 : vector<8x256xf32>
    %53 = arith.mulf %43, %52 : vector<8x256xf32>
    %54 = arith.truncf %11 : vector<8x512xf32> to vector<8x512xbf16>
    %c0_26 = arith.constant 0 : index
    %c0_27 = arith.constant 0 : index
    %55 = vector.load %arg9[%c0_26, %c0_27] : memref<512x256xbf16, #tpu.memory_space<vmem>>, vector<512x256xbf16>
    %cst_28 = arith.constant dense<0.000000e+00> : vector<8x256xf32>
    %56 = tpu.matmul %54, %55, %cst_28 {dimension_numbers = #tpu.dot_dimension_numbers<[1], [0], [0], [1], [0, 0, 1, 1], [], []>} : vector<8x512xbf16>, vector<512x256xbf16>, vector<8x256xf32> -> vector<8x256xf32>
    %c0_29 = arith.constant 0 : index
    %c0_30 = arith.constant 0 : index
    %57 = vector.load %arg10[%c0_29, %c0_30] : memref<1x256xf32, #tpu.memory_space<vmem>>, vector<1x256xf32>
    %58 = vector.broadcast %57 : vector<1x256xf32> to vector<8x256xf32>
    %59 = arith.addf %56, %58 : vector<8x256xf32>
    %60 = math.tanh %59 : vector<8x256xf32>
    %c0_31 = arith.constant 0 : index
    %c0_32 = arith.constant 0 : index
    %61 = vector.load %arg11[%c0_31, %c0_32] : memref<1x256xf32, #tpu.memory_space<vmem>>, vector<1x256xf32>
    %62 = vector.broadcast %61 : vector<1x256xf32> to vector<8x256xf32>
    %63 = arith.mulf %60, %62 : vector<8x256xf32>
    %cst_33 = arith.constant dense<0.000000e+00> : vector<8xf32>
    %64 = vector.multi_reduction <add>, %63, %cst_33 [1] : vector<8x256xf32> to vector<8xf32>
    %65 = vector.shape_cast %64 : vector<8xf32> to vector<8x1xf32>
    %c0_34 = arith.constant 0 : index
    %c0_35 = arith.constant 0 : index
    %66 = vector.load %arg12[%c0_34, %c0_35] : memref<1x1xf32, #tpu.memory_space<vmem>>, vector<1x1xf32>
    %67 = vector.broadcast %66 : vector<1x1xf32> to vector<8x1xf32>
    %68 = arith.addf %65, %67 : vector<8x1xf32>
    %69 = math.exp %68 : vector<8x1xf32>
    %cst_36 = arith.constant 1.000000e+00 : f32
    %70 = vector.broadcast %cst_36 : f32 to vector<8x1xf32>
    %71 = arith.addf %70, %69 : vector<8x1xf32>
    %72 = math.log %71 : vector<8x1xf32>
    %cst_37 = arith.constant 1.000000e-10 : f32
    %73 = vector.broadcast %cst_37 : f32 to vector<8x1xf32>
    %74 = arith.maximumf %72, %73 : vector<8x1xf32>
    %cst_38 = arith.constant 1.000000e+01 : f32
    %75 = vector.broadcast %cst_38 : f32 to vector<8x1xf32>
    %76 = arith.minimumf %74, %75 : vector<8x1xf32>
    %cst_39 = arith.constant 1.000000e+00 : f32
    %77 = vector.broadcast %cst_39 : f32 to vector<8x1xf32>
    %78 = arith.divf %77, %76 : vector<8x1xf32>
    %79 = vector.shape_cast %76 : vector<8x1xf32> to vector<8x1xf32>
    %80 = vector.broadcast %79 : vector<8x1xf32> to vector<8x128xf32>
    %81 = arith.truncf %60 : vector<8x256xf32> to vector<8x256xbf16>
    %c0_40 = arith.constant 0 : index
    %c0_41 = arith.constant 0 : index
    %82 = vector.load %arg13[%c0_40, %c0_41] : memref<256x128xbf16, #tpu.memory_space<vmem>>, vector<256x128xbf16>
    %cst_42 = arith.constant dense<0.000000e+00> : vector<8x128xf32>
    %83 = tpu.matmul %81, %82, %cst_42 {dimension_numbers = #tpu.dot_dimension_numbers<[1], [0], [0], [1], [0, 0, 1, 1], [], []>} : vector<8x256xbf16>, vector<256x128xbf16>, vector<8x128xf32> -> vector<8x128xf32>
    %c0_43 = arith.constant 0 : index
    %c0_44 = arith.constant 0 : index
    %84 = vector.load %arg14[%c0_43, %c0_44] : memref<1x128xf32, #tpu.memory_space<vmem>>, vector<1x128xf32>
    %85 = vector.broadcast %84 : vector<1x128xf32> to vector<8x128xf32>
    %86 = arith.addf %83, %85 : vector<8x128xf32>
    %87 = math.exp %86 : vector<8x128xf32>
    %cst_45 = arith.constant 1.000000e+00 : f32
    %88 = vector.broadcast %cst_45 : f32 to vector<8x128xf32>
    %89 = arith.addf %88, %87 : vector<8x128xf32>
    %90 = math.log %89 : vector<8x128xf32>
    %cst_46 = arith.constant 1.000000e-10 : f32
    %91 = vector.broadcast %cst_46 : f32 to vector<8x128xf32>
    %92 = arith.maximumf %90, %91 : vector<8x128xf32>
    %cst_47 = arith.constant 1.000000e+00 : f32
    %93 = vector.broadcast %cst_47 : f32 to vector<8x128xf32>
    %94 = arith.subf %93, %2 : vector<8x128xf32>
    %cst_48 = arith.constant 1.000000e-10 : f32
    %95 = vector.broadcast %cst_48 : f32 to vector<8x128xf32>
    %96 = arith.maximumf %94, %95 : vector<8x128xf32>
    %97 = math.log %96 : vector<8x128xf32>
    %cst_49 = arith.constant 0.000000e+00 : f32
    %98 = vector.broadcast %cst_49 : f32 to vector<8x128xf32>
    %99 = arith.subf %98, %97 : vector<8x128xf32>
    %100 = vector.broadcast %78 : vector<8x1xf32> to vector<8x128xf32>
    %101 = math.powf %99, %100 : vector<8x128xf32>
    %102 = arith.mulf %92, %101 : vector<8x128xf32>
    %103 = arith.truncf %60 : vector<8x256xf32> to vector<8x256xbf16>
    %c0_50 = arith.constant 0 : index
    %c0_51 = arith.constant 0 : index
    %104 = vector.load %arg15[%c0_50, %c0_51] : memref<256x128xbf16, #tpu.memory_space<vmem>>, vector<256x128xbf16>
    %cst_52 = arith.constant dense<0.000000e+00> : vector<8x128xf32>
    %105 = tpu.matmul %103, %104, %cst_52 {dimension_numbers = #tpu.dot_dimension_numbers<[1], [0], [0], [1], [0, 0, 1, 1], [], []>} : vector<8x256xbf16>, vector<256x128xbf16>, vector<8x128xf32> -> vector<8x128xf32>
    %c0_53 = arith.constant 0 : index
    %c0_54 = arith.constant 0 : index
    %106 = vector.load %arg16[%c0_53, %c0_54] : memref<1x128xf32, #tpu.memory_space<vmem>>, vector<1x128xf32>
    %107 = vector.broadcast %106 : vector<1x128xf32> to vector<8x128xf32>
    %108 = arith.addf %105, %107 : vector<8x128xf32>
    %109 = math.tanh %108 : vector<8x128xf32>
    %c0_55 = arith.constant 0 : index
    %c0_56 = arith.constant 0 : index
    %110 = vector.load %arg17[%c0_55, %c0_56] : memref<1x128xf32, #tpu.memory_space<vmem>>, vector<1x128xf32>
    %111 = vector.broadcast %110 : vector<1x128xf32> to vector<8x128xf32>
    %112 = arith.mulf %109, %111 : vector<8x128xf32>
    %cst_57 = arith.constant dense<0.000000e+00> : vector<8xf32>
    %113 = vector.multi_reduction <add>, %112, %cst_57 [1] : vector<8x128xf32> to vector<8xf32>
    %114 = vector.shape_cast %113 : vector<8xf32> to vector<8x1xf32>
    %c0_58 = arith.constant 0 : index
    %c0_59 = arith.constant 0 : index
    %115 = vector.load %arg18[%c0_58, %c0_59] : memref<1x1xf32, #tpu.memory_space<vmem>>, vector<1x1xf32>
    %116 = vector.broadcast %115 : vector<1x1xf32> to vector<8x1xf32>
    %117 = arith.addf %114, %116 : vector<8x1xf32>
    %118 = math.exp %117 : vector<8x1xf32>
    %cst_60 = arith.constant 1.000000e+00 : f32
    %119 = vector.broadcast %cst_60 : f32 to vector<8x1xf32>
    %120 = arith.addf %119, %118 : vector<8x1xf32>
    %121 = math.log %120 : vector<8x1xf32>
    %cst_61 = arith.constant 1.000000e-10 : f32
    %122 = vector.broadcast %cst_61 : f32 to vector<8x1xf32>
    %123 = arith.maximumf %121, %122 : vector<8x1xf32>
    %cst_62 = arith.constant 1.000000e+01 : f32
    %124 = vector.broadcast %cst_62 : f32 to vector<8x1xf32>
    %125 = arith.minimumf %123, %124 : vector<8x1xf32>
    %cst_63 = arith.constant 1.000000e+00 : f32
    %126 = vector.broadcast %cst_63 : f32 to vector<8x1xf32>
    %127 = arith.divf %126, %125 : vector<8x1xf32>
    %128 = vector.shape_cast %125 : vector<8x1xf32> to vector<8x1xf32>
    %129 = vector.broadcast %128 : vector<8x1xf32> to vector<8x64xf32>
    %130 = arith.truncf %109 : vector<8x128xf32> to vector<8x128xbf16>
    %c0_64 = arith.constant 0 : index
    %c0_65 = arith.constant 0 : index
    %131 = vector.load %arg19[%c0_64, %c0_65] : memref<128x64xbf16, #tpu.memory_space<vmem>>, vector<128x64xbf16>
    %cst_66 = arith.constant dense<0.000000e+00> : vector<8x64xf32>
    %132 = tpu.matmul %130, %131, %cst_66 {dimension_numbers = #tpu.dot_dimension_numbers<[1], [0], [0], [1], [0, 0, 1, 1], [], []>} : vector<8x128xbf16>, vector<128x64xbf16>, vector<8x64xf32> -> vector<8x64xf32>
    %c0_67 = arith.constant 0 : index
    %c0_68 = arith.constant 0 : index
    %133 = vector.load %arg20[%c0_67, %c0_68] : memref<1x64xf32, #tpu.memory_space<vmem>>, vector<1x64xf32>
    %134 = vector.broadcast %133 : vector<1x64xf32> to vector<8x64xf32>
    %135 = arith.addf %132, %134 : vector<8x64xf32>
    %136 = math.exp %135 : vector<8x64xf32>
    %cst_69 = arith.constant 1.000000e+00 : f32
    %137 = vector.broadcast %cst_69 : f32 to vector<8x64xf32>
    %138 = arith.addf %137, %136 : vector<8x64xf32>
    %139 = math.log %138 : vector<8x64xf32>
    %cst_70 = arith.constant 1.000000e-10 : f32
    %140 = vector.broadcast %cst_70 : f32 to vector<8x64xf32>
    %141 = arith.maximumf %139, %140 : vector<8x64xf32>
    %cst_71 = arith.constant 1.000000e+00 : f32
    %142 = vector.broadcast %cst_71 : f32 to vector<8x64xf32>
    %143 = arith.subf %142, %3 : vector<8x64xf32>
    %cst_72 = arith.constant 1.000000e-10 : f32
    %144 = vector.broadcast %cst_72 : f32 to vector<8x64xf32>
    %145 = arith.maximumf %143, %144 : vector<8x64xf32>
    %146 = math.log %145 : vector<8x64xf32>
    %cst_73 = arith.constant 0.000000e+00 : f32
    %147 = vector.broadcast %cst_73 : f32 to vector<8x64xf32>
    %148 = arith.subf %147, %146 : vector<8x64xf32>
    %149 = vector.broadcast %127 : vector<8x1xf32> to vector<8x64xf32>
    %150 = math.powf %148, %149 : vector<8x64xf32>
    %151 = arith.mulf %141, %150 : vector<8x64xf32>
    %c0_74 = arith.constant 0 : index
    %c0_75 = arith.constant 0 : index
    %152 = vector.load %arg21[%c0_74, %c0_75] : memref<8x1344xf32, #tpu.memory_space<vmem>>, vector<8x256xf32>
    tpu.vector_store %arg21[%c0_74, %c0_75], %53 {strides = array<i32>} : memref<8x1344xf32, #tpu.memory_space<vmem>>, vector<8x256xf32>,
    %c0_76 = arith.constant 0 : index
    %c256 = arith.constant 256 : index
    %153 = vector.load %arg21[%c0_76, %c256] : memref<8x1344xf32, #tpu.memory_space<vmem>>, vector<8x256xf32>
    tpu.vector_store %arg21[%c0_76, %c256], %31 {strides = array<i32>} : memref<8x1344xf32, #tpu.memory_space<vmem>>, vector<8x256xf32>,
    %c0_77 = arith.constant 0 : index
    %c512 = arith.constant 512 : index
    %154 = vector.load %arg21[%c0_77, %c512] : memref<8x1344xf32, #tpu.memory_space<vmem>>, vector<8x256xf32>
    tpu.vector_store %arg21[%c0_77, %c512], %43 {strides = array<i32>} : memref<8x1344xf32, #tpu.memory_space<vmem>>, vector<8x256xf32>,
    %c0_78 = arith.constant 0 : index
    %c768 = arith.constant 768 : index
    %155 = vector.load %arg21[%c0_78, %c768] : memref<8x1344xf32, #tpu.memory_space<vmem>>, vector<8x128xf32>
    tpu.vector_store %arg21[%c0_78, %c768], %102 {strides = array<i32>} : memref<8x1344xf32, #tpu.memory_space<vmem>>, vector<8x128xf32>,
    %c0_79 = arith.constant 0 : index
    %c896 = arith.constant 896 : index
    %156 = vector.load %arg21[%c0_79, %c896] : memref<8x1344xf32, #tpu.memory_space<vmem>>, vector<8x128xf32>
    tpu.vector_store %arg21[%c0_79, %c896], %80 {strides = array<i32>} : memref<8x1344xf32, #tpu.memory_space<vmem>>, vector<8x128xf32>,
    %c0_80 = arith.constant 0 : index
    %c1024 = arith.constant 1024 : index
    %157 = vector.load %arg21[%c0_80, %c1024] : memref<8x1344xf32, #tpu.memory_space<vmem>>, vector<8x128xf32>
    tpu.vector_store %arg21[%c0_80, %c1024], %92 {strides = array<i32>} : memref<8x1344xf32, #tpu.memory_space<vmem>>, vector<8x128xf32>,
    %c0_81 = arith.constant 0 : index
    %c1152 = arith.constant 1152 : index
    %158 = vector.load %arg21[%c0_81, %c1152] : memref<8x1344xf32, #tpu.memory_space<vmem>>, vector<8x64xf32>
    tpu.vector_store %arg21[%c0_81, %c1152], %151 {strides = array<i32>} : memref<8x1344xf32, #tpu.memory_space<vmem>>, vector<8x64xf32>,
    %c0_82 = arith.constant 0 : index
    %c1216 = arith.constant 1216 : index
    %159 = vector.load %arg21[%c0_82, %c1216] : memref<8x1344xf32, #tpu.memory_space<vmem>>, vector<8x64xf32>
    tpu.vector_store %arg21[%c0_82, %c1216], %129 {strides = array<i32>} : memref<8x1344xf32, #tpu.memory_space<vmem>>, vector<8x64xf32>,
    %c0_83 = arith.constant 0 : index
    %c1280 = arith.constant 1280 : index
    %160 = vector.load %arg21[%c0_83, %c1280] : memref<8x1344xf32, #tpu.memory_space<vmem>>, vector<8x64xf32>
    tpu.vector_store %arg21[%c0_83, %c1280], %141 {strides = array<i32>} : memref<8x1344xf32, #tpu.memory_space<vmem>>, vector<8x64xf32>,
    return
  }
  func.func @transform_0(%arg0: i32) -> (i32, i32) {
    %c0_i32 = arith.constant 0 : i32
    %c0_i32_0 = arith.constant 0 : i32
    return %arg0, %c0_i32 : i32, i32
  }
  func.func @transform_1(%arg0: i32) -> (i32, i32) {
    %c0_i32 = arith.constant 0 : i32
    %c0_i32_0 = arith.constant 0 : i32
    return %arg0, %c0_i32 : i32, i32
  }
  func.func @transform_2(%arg0: i32) -> (i32, i32) {
    %c0_i32 = arith.constant 0 : i32
    %c0_i32_0 = arith.constant 0 : i32
    %c0_i32_1 = arith.constant 0 : i32
    return %c0_i32, %c0_i32_0 : i32, i32
  }
  func.func @transform_3(%arg0: i32) -> (i32, i32) {
    %c0_i32 = arith.constant 0 : i32
    %c0_i32_0 = arith.constant 0 : i32
    %c0_i32_1 = arith.constant 0 : i32
    return %c0_i32, %c0_i32_0 : i32, i32
  }
  func.func @transform_4(%arg0: i32) -> (i32, i32) {
    %c0_i32 = arith.constant 0 : i32
    %c0_i32_0 = arith.constant 0 : i32
    %c0_i32_1 = arith.constant 0 : i32
    return %c0_i32, %c0_i32_0 : i32, i32
  }
  func.func @transform_5(%arg0: i32) -> (i32, i32) {
    %c0_i32 = arith.constant 0 : i32
    %c0_i32_0 = arith.constant 0 : i32
    %c0_i32_1 = arith.constant 0 : i32
    return %c0_i32, %c0_i32_0 : i32, i32
  }
  func.func @transform_6(%arg0: i32) -> (i32, i32) {
    %c0_i32 = arith.constant 0 : i32
    %c0_i32_0 = arith.constant 0 : i32
    %c0_i32_1 = arith.constant 0 : i32
    return %c0_i32, %c0_i32_0 : i32, i32
  }
  func.func @transform_7(%arg0: i32) -> (i32, i32) {
    %c0_i32 = arith.constant 0 : i32
    %c0_i32_0 = arith.constant 0 : i32
    %c0_i32_1 = arith.constant 0 : i32
    return %c0_i32, %c0_i32_0 : i32, i32
  }
  func.func @transform_8(%arg0: i32) -> (i32, i32) {
    %c0_i32 = arith.constant 0 : i32
    %c0_i32_0 = arith.constant 0 : i32
    %c0_i32_1 = arith.constant 0 : i32
    return %c0_i32, %c0_i32_0 : i32, i32
  }
  func.func @transform_9(%arg0: i32) -> (i32, i32) {
    %c0_i32 = arith.constant 0 : i32
    %c0_i32_0 = arith.constant 0 : i32
    %c0_i32_1 = arith.constant 0 : i32
    return %c0_i32, %c0_i32_0 : i32, i32
  }
  func.func @transform_10(%arg0: i32) -> (i32, i32) {
    %c0_i32 = arith.constant 0 : i32
    %c0_i32_0 = arith.constant 0 : i32
    %c0_i32_1 = arith.constant 0 : i32
    return %c0_i32, %c0_i32_0 : i32, i32
  }
  func.func @transform_11(%arg0: i32) -> (i32, i32) {
    %c0_i32 = arith.constant 0 : i32
    %c0_i32_0 = arith.constant 0 : i32
    %c0_i32_1 = arith.constant 0 : i32
    return %c0_i32, %c0_i32_0 : i32, i32
  }
  func.func @transform_12(%arg0: i32) -> (i32, i32) {
    %c0_i32 = arith.constant 0 : i32
    %c0_i32_0 = arith.constant 0 : i32
    %c0_i32_1 = arith.constant 0 : i32
    return %c0_i32, %c0_i32_0 : i32, i32
  }
  func.func @transform_13(%arg0: i32) -> (i32, i32) {
    %c0_i32 = arith.constant 0 : i32
    %c0_i32_0 = arith.constant 0 : i32
    %c0_i32_1 = arith.constant 0 : i32
    return %c0_i32, %c0_i32_0 : i32, i32
  }
  func.func @transform_14(%arg0: i32) -> (i32, i32) {
    %c0_i32 = arith.constant 0 : i32
    %c0_i32_0 = arith.constant 0 : i32
    %c0_i32_1 = arith.constant 0 : i32
    return %c0_i32, %c0_i32_0 : i32, i32
  }
  func.func @transform_15(%arg0: i32) -> (i32, i32) {
    %c0_i32 = arith.constant 0 : i32
    %c0_i32_0 = arith.constant 0 : i32
    %c0_i32_1 = arith.constant 0 : i32
    return %c0_i32, %c0_i32_0 : i32, i32
  }
  func.func @transform_16(%arg0: i32) -> (i32, i32) {
    %c0_i32 = arith.constant 0 : i32
    %c0_i32_0 = arith.constant 0 : i32
    %c0_i32_1 = arith.constant 0 : i32
    return %c0_i32, %c0_i32_0 : i32, i32
  }
  func.func @transform_17(%arg0: i32) -> (i32, i32) {
    %c0_i32 = arith.constant 0 : i32
    %c0_i32_0 = arith.constant 0 : i32
    %c0_i32_1 = arith.constant 0 : i32
    return %c0_i32, %c0_i32_0 : i32, i32
  }
  func.func @transform_18(%arg0: i32) -> (i32, i32) {
    %c0_i32 = arith.constant 0 : i32
    %c0_i32_0 = arith.constant 0 : i32
    %c0_i32_1 = arith.constant 0 : i32
    return %c0_i32, %c0_i32_0 : i32, i32
  }
  func.func @transform_19(%arg0: i32) -> (i32, i32) {
    %c0_i32 = arith.constant 0 : i32
    %c0_i32_0 = arith.constant 0 : i32
    %c0_i32_1 = arith.constant 0 : i32
    return %c0_i32, %c0_i32_0 : i32, i32
  }
  func.func @transform_20(%arg0: i32) -> (i32, i32) {
    %c0_i32 = arith.constant 0 : i32
    %c0_i32_0 = arith.constant 0 : i32
    return %arg0, %c0_i32 : i32, i32
  }
}

</mosaic_0001>

<bundles_post_ra>
// kernel: mlp_encoder_forward.1
= control target key start
LH: loop header
LB: loop body
LE: loop exit
PB: predicated region body
PF: predicated region fallthrough
CT: control target
= control target key end

     0   :  { %s9068_s0 = inlined_call_operand.hbm [shape: f32[8,448], index: 0, kind: input, shape index: {}]   ;;  %s9069_s1 = inlined_call_operand.hbm [shape: f32[8,2048], index: 1, kind: input, shape index: {}]   ;;  %s9070_s2 = inlined_call_operand.hbm [shape: bf16[2048,512], index: 2, kind: input, shape index: {}]   ;;  %s9071_s3 = inlined_call_operand.hbm [shape: f32[1,512], index: 3, kind: input, shape index: {}]   ;;  %s9072_s4 = inlined_call_operand.hbm [shape: f32[1,512], index: 4, kind: input, shape index: {}]   ;;  %s9073_s5 = inlined_call_operand.<no memory space> [shape: f32[1,1], index: 5, kind: input, shape index: {}]   ;;  %s9074_s6 = inlined_call_operand.hbm [shape: bf16[512,256], index: 6, kind: input, shape index: {}]   ;;  %s9075_s7 = inlined_call_operand.hbm [shape: f32[1,256], index: 7, kind: input, shape index: {}]   ;;  %s9076_s8 = inlined_call_operand.hbm [shape: bf16[512,256], index: 8, kind: input, shape index: {}]   ;;  %s9077_s9 = inlined_call_operand.hbm [shape: f32[1,256], index: 9, kind: input, shape index: {}]   ;;  %s9078_s10 = inlined_call_operand.hbm [shape: f32[1,256], index: 10, kind: input, shape index: {}]   ;;  %s9079_s12 = inlined_call_operand.hbm [shape: bf16[256,128], index: 12, kind: input, shape index: {}]   ;;  %s9080_s13 = inlined_call_operand.hbm [shape: f32[1,128], index: 13, kind: input, shape index: {}]   ;;  %s9081_s14 = inlined_call_operand.hbm [shape: bf16[256,128], index: 14, kind: input, shape index: {}]   ;;  %s9082_s15 = inlined_call_operand.hbm [shape: f32[1,128], index: 15, kind: input, shape index: {}]   ;;  %s9083_s16 = inlined_call_operand.hbm [shape: f32[1,128], index: 16, kind: input, shape index: {}]   ;;  %s9084_s18 = inlined_call_operand.vmem [shape: bf16[128,64], index: 18, kind: input, shape index: {}]   ;;  %s9085_s19 = inlined_call_operand.hbm [shape: f32[1,64], index: 19, kind: input, shape index: {}]   ;;  %s9086_s20 = inlined_call_operand.vmem [shape: f32[8,1344], index: 20, kind: output, shape index: {}]   ;;  %s9087_s11 = inlined_call_operand.<no memory space> [shape: f32[1,1], index: 11, kind: input, shape index: {}]   ;;  %s9088_s17 = inlined_call_operand.<no memory space> [shape: f32[1,1], index: 17, kind: input, shape index: {}]  }
   0x1   :  { %9105 = sst [smem:[#allocation39_spill]] %s9068_s0  ;;  %v25_v0 = vstv %s9073_s5  ;;  %v27_v1 = vstv %s9087_s11  ;;  %v29_v2 = vstv %s9088_s17 }
   0x2   :  { %9106 = sst [smem:[#allocation40_spill]] %s9069_s1  ;;  %26 = vst [vmem:[#allocation2] sm:$0x1] %v25_v0  ;;  %28 = vst [vmem:[#allocation3] sm:$0x1] %v27_v1 }
   0x3   :  { %9107 = sst [smem:[#allocation41_spill]] %s9070_s2  ;;  %30 = vst [vmem:[#allocation4] sm:$0x1] %v29_v2 }
   0x4   :  { %9108 = sst [smem:[#allocation42_spill]] %s9071_s3 }
   0x5   :  { %9109 = sst [smem:[#allocation43_spill]] %s9072_s4 }
   0x6   :  { %31 = vsyncpa [#allocation6], 0 }
   0x7   :  { %32 = vsyncpa [#allocation8], 0 }
   0x8   :  { %33 = vsyncpa [#allocation11], 0 }
   0x9   :  { %34 = vsyncpa [#allocation14], 0 }
   0xa   :  { %35 = vsyncpa [#allocation17], 0 }
   0xb   :  { %36 = vsyncpa [#allocation20], 0 }
   0xc   :  { %37 = vsyncpa [#allocation23], 0 }
   0xd   :  { %38 = vsyncpa [#allocation26], 0 }
   0xe   :  { %39 = vsyncpa [#allocation29], 0  ;;  %s8212_s5 = smov [#allocation7]   ;;  %s8213_s26 = smov [#allocation10]  }
   0xf   :  { %s56_s3 = sshll.u32 %s8212_s5, 4  ;;  %s78_s11 = sshll.u32 %s8213_s26, 4  ;;  %s57_s3 = int_to_ptr.vmem [resolvable:$true] %s56_s3  ;;  %s79_s11 = int_to_ptr.vmem [resolvable:$true] %s78_s11 }
  0x10   :  { %s9110_s28 = sld [smem:[#allocation40_spill]] }
  0x16   :  { %s7842_s4 = scalar_lea.hbm %s9110_s28, 2048 }
  0x17   :  { %p7843_p0 = scmp.ne.s32.totalorder %s9110_s28, %s7842_s4  ;;  %p7846_p1 = scmp.lt.u32.totalorder %s7842_s4, %s9110_s28 }
  0x19   :  { %p7848_p2 = pnand %p7846_p1, %p7843_p0 }
  0x1b   :  { %7851 = shalt.err (!%p7848_p2)
}
  0x1c   :  { %s7852_s1 = scalar_lea.vmem %s57_s3, 2048  ;;  %p7857_p4 = scmp.lt.s32.totalorder %s57_s3, %s57_s3 }
  0x1d   :  { %p7853_p3 = scmp.ne.s32.totalorder %s57_s3, %s7852_s1  ;;  %p7858_p5 = scmp.lt.s32.totalorder %s7852_s1, %s7852_s1 }
  0x1f   :  { %p7859_p6 = por %p7858_p5, %p7857_p4 }
  0x21   :  { %p7860_p7 = pnand %p7859_p6, %p7853_p3 }
  0x23   :  { %7863 = shalt.err (!%p7860_p7)
}
  0x24   :  { %59 = dma.hbm_to_vmem [thread:$0]  %s9110_s28, 2048, %s57_s3, [#allocation8]  }
  0x25   :  { %s9111_s25 = sld [smem:[#allocation42_spill]] }
  0x2b   :  { %s7864_s5 = scalar_lea.hbm %s9111_s25, 64 }
  0x2c   :  { %p7865_p8 = scmp.ne.s32.totalorder %s9111_s25, %s7864_s5  ;;  %p7868_p9 = scmp.lt.u32.totalorder %s7864_s5, %s9111_s25 }
  0x2e   :  { %p7870_p10 = pnand %p7868_p9, %p7865_p8 }
  0x30   :  { %7873 = shalt.err (!%p7870_p10)
}
  0x31   :  { %s7874_s29 = scalar_lea.vmem %s79_s11, 64  ;;  %p7879_p12 = scmp.lt.s32.totalorder %s79_s11, %s79_s11 }
  0x32   :  { %p7875_p11 = scmp.ne.s32.totalorder %s79_s11, %s7874_s29  ;;  %p7880_p13 = scmp.lt.s32.totalorder %s7874_s29, %s7874_s29 }
  0x34   :  { %p7881_p0 = por %p7880_p13, %p7879_p12 }
  0x36   :  { %p7882_p1 = pnand %p7881_p0, %p7875_p11 }
  0x38   :  { %7885 = shalt.err (!%p7882_p1)
}
  0x39   :  { %81 = dma.hbm_to_vmem [thread:$0]  %s9111_s25, 64, %s79_s11, [#allocation11]  }
  0x3a   :  { %s8214_s30 = smov [#allocation13]   ;;  %s7886_s22 = scalar_lea.hbm %s9074_s6, 8192 }
  0x3b   :  { %s99_s0 = sshll.u32 %s8214_s30, 4  ;;  %p7887_p2 = scmp.ne.s32.totalorder %s9074_s6, %s7886_s22  ;;  %s100_s0 = int_to_ptr.vmem [resolvable:$true] %s99_s0 }
  0x3c   :  { %p7890_p3 = scmp.lt.u32.totalorder %s7886_s22, %s9074_s6 }
  0x3e   :  { %p7892_p4 = pnand %p7890_p3, %p7887_p2 }
  0x40   :  { %7895 = shalt.err (!%p7892_p4)
}
  0x41   :  { %s7896_s26 = scalar_lea.vmem %s100_s0, 8192  ;;  %p7901_p6 = scmp.lt.s32.totalorder %s100_s0, %s100_s0 }
  0x42   :  { %p7897_p5 = scmp.ne.s32.totalorder %s100_s0, %s7896_s26  ;;  %p7902_p7 = scmp.lt.s32.totalorder %s7896_s26, %s7896_s26 }
  0x44   :  { %p7903_p8 = por %p7902_p7, %p7901_p6 }
  0x46   :  { %p7904_p9 = pnand %p7903_p8, %p7897_p5 }
  0x48   :  { %7907 = shalt.err (!%p7904_p9)
}
  0x49   :  { %s8215_s11 = smov 128   ;;  %s8216_s25 = smov 8  }
  0x4a   :  { %105 = dma.hbm_to_vmem [thread:$0]  %s9074_s6, 8192, %s100_s0, [#allocation14], %s8215_s11, %s8215_s11, %s8216_s25  }
  0x4b   :  { %s8217_s4 = smov [#allocation16]   ;;  %s8218_s3 = smov [#allocation19]  }
  0x4c   :  { %s121_s29 = sshll.u32 %s8217_s4, 4  ;;  %s144_s28 = sshll.u32 %s8218_s3, 4  ;;  %s122_s29 = int_to_ptr.vmem [resolvable:$true] %s121_s29  ;;  %s145_s28 = int_to_ptr.vmem [resolvable:$true] %s144_s28 }
  0x4d   :  { %s7908_s1 = scalar_lea.hbm %s9076_s8, 8192 }
  0x4e   :  { %p7909_p10 = scmp.ne.s32.totalorder %s9076_s8, %s7908_s1  ;;  %p7912_p11 = scmp.lt.u32.totalorder %s7908_s1, %s9076_s8 }
  0x50   :  { %p7914_p12 = pnand %p7912_p11, %p7909_p10 }
  0x52   :  { %7917 = shalt.err (!%p7914_p12)
}
  0x53   :  { %s7918_s6 = scalar_lea.vmem %s122_s29, 8192  ;;  %p7923_p0 = scmp.lt.s32.totalorder %s122_s29, %s122_s29 }
  0x54   :  { %p7919_p13 = scmp.ne.s32.totalorder %s122_s29, %s7918_s6  ;;  %p7924_p1 = scmp.lt.s32.totalorder %s7918_s6, %s7918_s6 }
  0x56   :  { %p7925_p2 = por %p7924_p1, %p7923_p0 }
  0x58   :  { %p7926_p3 = pnand %p7925_p2, %p7919_p13 }
  0x5a   :  { %7929 = shalt.err (!%p7926_p3)
}
  0x5b   :  { %127 = dma.hbm_to_vmem [thread:$0]  %s9076_s8, 8192, %s122_s29, [#allocation17], %s8215_s11, %s8215_s11, %s8216_s25  }
  0x5c   :  { %s7930_s17 = scalar_lea.hbm %s9078_s10, 32 }
  0x5d   :  { %p7931_p4 = scmp.ne.s32.totalorder %s9078_s10, %s7930_s17  ;;  %p7934_p5 = scmp.lt.u32.totalorder %s7930_s17, %s9078_s10 }
  0x5f   :  { %p7936_p6 = pnand %p7934_p5, %p7931_p4 }
  0x61   :  { %7939 = shalt.err (!%p7936_p6)
}
  0x62   :  { %s7940_s1 = scalar_lea.vmem %s145_s28, 32  ;;  %p7945_p8 = scmp.lt.s32.totalorder %s145_s28, %s145_s28 }
  0x63   :  { %p7941_p7 = scmp.ne.s32.totalorder %s145_s28, %s7940_s1  ;;  %p7946_p9 = scmp.lt.s32.totalorder %s7940_s1, %s7940_s1 }
  0x65   :  { %p7947_p10 = por %p7946_p9, %p7945_p8 }
  0x67   :  { %p7948_p11 = pnand %p7947_p10, %p7941_p7 }
  0x69   :  { %7951 = shalt.err (!%p7948_p11)
}
  0x6a   :  { %147 = dma.hbm_to_vmem [thread:$0]  %s9078_s10, 32, %s145_s28, [#allocation20]  }
  0x6b   :  { %s8219_s25 = smov [#allocation22]   ;;  %s8220_s22 = smov [#allocation25]  }
  0x6c   :  { %s168_s29 = sshll.u32 %s8219_s25, 4  ;;  %s190_s23 = sshll.u32 %s8220_s22, 4  ;;  %s169_s29 = int_to_ptr.vmem [resolvable:$true] %s168_s29  ;;  %s191_s23 = int_to_ptr.vmem [resolvable:$true] %s190_s23 }
  0x6d   :  { %s7952_s6 = scalar_lea.hbm %s9080_s13, 16 }
  0x6e   :  { %p7953_p12 = scmp.ne.s32.totalorder %s9080_s13, %s7952_s6  ;;  %p7956_p13 = scmp.lt.u32.totalorder %s7952_s6, %s9080_s13 }
  0x70   :  { %p7958_p0 = pnand %p7956_p13, %p7953_p12 }
  0x72   :  { %7961 = shalt.err (!%p7958_p0)
}
  0x73   :  { %s7962_s10 = scalar_lea.vmem %s169_s29, 16  ;;  %s7966_s28 = scalar_lea.vmem %s169_s29, 32 }
  0x74   :  { %p7963_p1 = scmp.ne.s32.totalorder %s169_s29, %s7962_s10  ;;  %p7967_p2 = scmp.lt.s32.totalorder %s169_s29, %s169_s29 }
  0x75   :  { %p7968_p3 = scmp.lt.s32.totalorder %s7966_s28, %s7962_s10 }
  0x77   :  { %p7969_p4 = por %p7968_p3, %p7967_p2 }
  0x79   :  { %p7970_p5 = pnand %p7969_p4, %p7963_p1 }
  0x7b   :  { %7973 = shalt.err (!%p7970_p5)
}
  0x7c   :  { %171 = dma.hbm_to_vmem [thread:$0]  %s9080_s13, 16, %s169_s29, [#allocation23]  }
  0x7d   :  { %s7974_s21 = scalar_lea.hbm %s9082_s15, 16 }
  0x7e   :  { %p7975_p6 = scmp.ne.s32.totalorder %s9082_s15, %s7974_s21  ;;  %p7978_p7 = scmp.lt.u32.totalorder %s7974_s21, %s9082_s15 }
  0x80   :  { %p7980_p8 = pnand %p7978_p7, %p7975_p6 }
  0x82   :  { %7983 = shalt.err (!%p7980_p8)
}
  0x83   :  { %s7984_s22 = scalar_lea.vmem %s191_s23, 16  ;;  %s7988_s24 = scalar_lea.vmem %s191_s23, 32 }
  0x84   :  { %p7985_p9 = scmp.ne.s32.totalorder %s191_s23, %s7984_s22  ;;  %p7989_p10 = scmp.lt.s32.totalorder %s191_s23, %s191_s23 }
  0x85   :  { %p7990_p11 = scmp.lt.s32.totalorder %s7988_s24, %s7984_s22 }
  0x87   :  { %p7991_p12 = por %p7990_p11, %p7989_p10 }
  0x89   :  { %p7992_p13 = pnand %p7991_p12, %p7985_p9 }
  0x8b   :  { %7995 = shalt.err (!%p7992_p13)
}
  0x8c   :  { %193 = dma.hbm_to_vmem [thread:$0]  %s9082_s15, 16, %s191_s23, [#allocation26]  }
  0x8d   :  { %s8221_s2 = smov [#allocation5]   ;;  %s8222_s0 = smov [#allocation9]  }
  0x8e   :  { %s46_s6 = sshll.u32 %s8221_s2, 4  ;;  %s65_s5 = sshll.u32 %s8222_s0, 4  ;;  %s47_s6 = int_to_ptr.vmem [resolvable:$true] %s46_s6  ;;  %s66_s5 = int_to_ptr.vmem [resolvable:$true] %s65_s5 }
  0x8f   :  { %s9112_s10 = sld [smem:[#allocation39_spill]] }
  0x95   :  { %s7996_s28 = scalar_lea.hbm %s9112_s10, 512 }
  0x96   :  { %p7997_p0 = scmp.ne.s32.totalorder %s9112_s10, %s7996_s28  ;;  %p8000_p1 = scmp.lt.u32.totalorder %s7996_s28, %s9112_s10 }
  0x98   :  { %p8002_p2 = pnand %p8000_p1, %p7997_p0 }
  0x9a   :  { %8005 = shalt.err (!%p8002_p2)
}
  0x9b   :  { %s8006_s15 = scalar_lea.vmem %s47_s6, 512  ;;  %p8011_p4 = scmp.lt.s32.totalorder %s47_s6, %s47_s6 }
  0x9c   :  { %p8007_p3 = scmp.ne.s32.totalorder %s47_s6, %s8006_s15  ;;  %p8012_p5 = scmp.lt.s32.totalorder %s8006_s15, %s8006_s15 }
  0x9e   :  { %p8013_p6 = por %p8012_p5, %p8011_p4 }
  0xa0   :  { %p8014_p7 = pnand %p8013_p6, %p8007_p3 }
  0xa2   :  { %8017 = shalt.err (!%p8014_p7)
}
  0xa3   :  { %49 = dma.hbm_to_vmem [thread:$0]  %s9112_s10, 512, %s47_s6, [#allocation6]  }
  0xa4   :  { %s9113_s11 = sld [smem:[#allocation41_spill]] }
  0xaa   :  { %s8018_s25 = scalar_lea.hbm %s9113_s11, 65536 }
  0xab   :  { %p8019_p8 = scmp.ne.s32.totalorder %s9113_s11, %s8018_s25  ;;  %p8022_p9 = scmp.lt.u32.totalorder %s8018_s25, %s9113_s11 }
  0xad   :  { %p8024_p10 = pnand %p8022_p9, %p8019_p8 }
  0xaf   :  { %8027 = shalt.err (!%p8024_p10)
}
  0xb0   :  { %s8028_s2 = scalar_lea.vmem %s66_s5, 65536  ;;  %p8033_p12 = scmp.lt.s32.totalorder %s66_s5, %s66_s5 }
  0xb1   :  { %p8029_p11 = scmp.ne.s32.totalorder %s66_s5, %s8028_s2  ;;  %p8034_p13 = scmp.lt.s32.totalorder %s8028_s2, %s8028_s2 }
  0xb3   :  { %p8035_p0 = por %p8034_p13, %p8033_p12 }
  0xb5   :  { %p8036_p1 = pnand %p8035_p0, %p8029_p11 }
  0xb7   :  { %8039 = shalt.err (!%p8036_p1)
}
  0xb8   :  { %s8223_s6 = smov 256   ;;  %s8224_s0 = smov 16  }
  0xb9   :  { %71 = dma.hbm_to_vmem [thread:$0]  %s9113_s11, 65536, %s66_s5, [#allocation8], %s8223_s6, %s8223_s6, %s8224_s0  }
  0xba   :  { %s8225_s10 = smov [#allocation12]   ;;  %s8226_s17 = smov [#allocation15]  }
  0xbb   :  { %s88_s28 = sshll.u32 %s8225_s10, 4  ;;  %s112_s4 = sshll.u32 %s8226_s17, 4  ;;  %s89_s28 = int_to_ptr.vmem [resolvable:$true] %s88_s28  ;;  %s113_s4 = int_to_ptr.vmem [resolvable:$true] %s112_s4 }
  0xbc   :  { %s9114_s15 = sld [smem:[#allocation43_spill]] }
  0xc2   :  { %s8040_s23 = scalar_lea.hbm %s9114_s15, 64 }
  0xc3   :  { %p8041_p2 = scmp.ne.s32.totalorder %s9114_s15, %s8040_s23  ;;  %p8044_p3 = scmp.lt.u32.totalorder %s8040_s23, %s9114_s15 }
  0xc5   :  { %p8046_p4 = pnand %p8044_p3, %p8041_p2 }
  0xc7   :  { %8049 = shalt.err (!%p8046_p4)
}
  0xc8   :  { %s8050_s5 = scalar_lea.vmem %s89_s28, 64  ;;  %p8055_p6 = scmp.lt.s32.totalorder %s89_s28, %s89_s28 }
  0xc9   :  { %p8051_p5 = scmp.ne.s32.totalorder %s89_s28, %s8050_s5  ;;  %p8056_p7 = scmp.lt.s32.totalorder %s8050_s5, %s8050_s5 }
  0xcb   :  { %p8057_p8 = por %p8056_p7, %p8055_p6 }
  0xcd   :  { %p8058_p9 = pnand %p8057_p8, %p8051_p5 }
  0xcf   :  { %8061 = shalt.err (!%p8058_p9)
}
  0xd0   :  { %91 = dma.hbm_to_vmem [thread:$0]  %s9114_s15, 64, %s89_s28, [#allocation11]  }
  0xd1   :  { %s8062_s29 = scalar_lea.hbm %s9075_s7, 32 }
  0xd2   :  { %p8063_p10 = scmp.ne.s32.totalorder %s9075_s7, %s8062_s29  ;;  %p8066_p11 = scmp.lt.u32.totalorder %s8062_s29, %s9075_s7 }
  0xd4   :  { %p8068_p12 = pnand %p8066_p11, %p8063_p10 }
  0xd6   :  { %8071 = shalt.err (!%p8068_p12)
}
  0xd7   :  { %s8072_s27 = scalar_lea.vmem %s113_s4, 32  ;;  %p8077_p0 = scmp.lt.s32.totalorder %s113_s4, %s113_s4 }
  0xd8   :  { %p8073_p13 = scmp.ne.s32.totalorder %s113_s4, %s8072_s27  ;;  %p8078_p1 = scmp.lt.s32.totalorder %s8072_s27, %s8072_s27 }
  0xda   :  { %p8079_p2 = por %p8078_p1, %p8077_p0 }
  0xdc   :  { %p8080_p3 = pnand %p8079_p2, %p8073_p13 }
  0xde   :  { %8083 = shalt.err (!%p8080_p3)
}
  0xdf   :  { %115 = dma.hbm_to_vmem [thread:$0]  %s9075_s7, 32, %s113_s4, [#allocation14]  }
  0xe0   :  { %s8227_s17 = smov [#allocation18]   ;;  %s8228_s30 = smov [#allocation21]  }
  0xe1   :  { %s134_s3 = sshll.u32 %s8227_s17, 4  ;;  %s155_s15 = sshll.u32 %s8228_s30, 4  ;;  %s135_s3 = int_to_ptr.vmem [resolvable:$true] %s134_s3  ;;  %s156_s15 = int_to_ptr.vmem [resolvable:$true] %s155_s15 }
  0xe2   :  { %s8084_s1 = scalar_lea.hbm %s9077_s9, 32 }
  0xe3   :  { %p8085_p4 = scmp.ne.s32.totalorder %s9077_s9, %s8084_s1  ;;  %p8088_p5 = scmp.lt.u32.totalorder %s8084_s1, %s9077_s9 }
  0xe5   :  { %p8090_p6 = pnand %p8088_p5, %p8085_p4 }
  0xe7   :  { %8093 = shalt.err (!%p8090_p6)
}
  0xe8   :  { %s8094_s7 = scalar_lea.vmem %s135_s3, 32  ;;  %p8099_p8 = scmp.lt.s32.totalorder %s135_s3, %s135_s3 }
  0xe9   :  { %p8095_p7 = scmp.ne.s32.totalorder %s135_s3, %s8094_s7  ;;  %p8100_p9 = scmp.lt.s32.totalorder %s8094_s7, %s8094_s7 }
  0xeb   :  { %p8101_p10 = por %p8100_p9, %p8099_p8 }
  0xed   :  { %p8102_p11 = pnand %p8101_p10, %p8095_p7 }
  0xef   :  { %8105 = shalt.err (!%p8102_p11)
}
  0xf0   :  { %137 = dma.hbm_to_vmem [thread:$0]  %s9077_s9, 32, %s135_s3, [#allocation17]  }
  0xf1   :  { %s8106_s29 = scalar_lea.hbm %s9079_s12, 2048 }
  0xf2   :  { %p8107_p12 = scmp.ne.s32.totalorder %s9079_s12, %s8106_s29  ;;  %p8110_p13 = scmp.lt.u32.totalorder %s8106_s29, %s9079_s12 }
  0xf4   :  { %p8112_p0 = pnand %p8110_p13, %p8107_p12 }
  0xf6   :  { %8115 = shalt.err (!%p8112_p0)
}
  0xf7   :  { %s8116_s27 = scalar_lea.vmem %s156_s15, 2048  ;;  %p8121_p2 = scmp.lt.s32.totalorder %s156_s15, %s156_s15 }
  0xf8   :  { %p8117_p1 = scmp.ne.s32.totalorder %s156_s15, %s8116_s27  ;;  %p8122_p3 = scmp.lt.s32.totalorder %s8116_s27, %s8116_s27 }
  0xfa   :  { %p8123_p4 = por %p8122_p3, %p8121_p2 }
  0xfc   :  { %p8124_p5 = pnand %p8123_p4, %p8117_p1 }
  0xfe   :  { %8127 = shalt.err (!%p8124_p5)
}
  0xff   :  { %s8229_s9 = smov 64   ;;  %s8230_s10 = smov 4  }
 0x100   :  { %161 = dma.hbm_to_vmem [thread:$0]  %s9079_s12, 2048, %s156_s15, [#allocation20], %s8229_s9, %s8229_s9, %s8230_s10  }
 0x101   :  { %s8231_s3 = smov [#allocation24]   ;;  %s8232_s23 = smov [#allocation27]  }
 0x102   :  { %s177_s30 = sshll.u32 %s8231_s3, 4  ;;  %s200_s21 = sshll.u32 %s8232_s23, 4  ;;  %s178_s30 = int_to_ptr.vmem [resolvable:$true] %s177_s30  ;;  %s201_s21 = int_to_ptr.vmem [resolvable:$true] %s200_s21 }
 0x103   :  { %s8128_s25 = scalar_lea.hbm %s9081_s14, 2048 }
 0x104   :  { %p8129_p6 = scmp.ne.s32.totalorder %s9081_s14, %s8128_s25  ;;  %p8132_p7 = scmp.lt.u32.totalorder %s8128_s25, %s9081_s14 }
 0x106   :  { %p8134_p8 = pnand %p8132_p7, %p8129_p6 }
 0x108   :  { %8137 = shalt.err (!%p8134_p8)
}
 0x109   :  { %s8138_s12 = scalar_lea.vmem %s178_s30, 2048  ;;  %p8143_p10 = scmp.lt.s32.totalorder %s178_s30, %s178_s30 }
 0x10a   :  { %p8139_p9 = scmp.ne.s32.totalorder %s178_s30, %s8138_s12  ;;  %p8144_p11 = scmp.lt.s32.totalorder %s8138_s12, %s8138_s12 }
 0x10c   :  { %p8145_p12 = por %p8144_p11, %p8143_p10 }
 0x10e   :  { %p8146_p13 = pnand %p8145_p12, %p8139_p9 }
 0x110   :  { %8149 = shalt.err (!%p8146_p13)
}
 0x111   :  { %183 = dma.hbm_to_vmem [thread:$0]  %s9081_s14, 2048, %s178_s30, [#allocation23], %s8229_s9, %s8229_s9, %s8230_s10  }
 0x112   :  { %s8150_s29 = scalar_lea.hbm %s9083_s16, 16 }
 0x113   :  { %p8151_p0 = scmp.ne.s32.totalorder %s9083_s16, %s8150_s29  ;;  %p8154_p1 = scmp.lt.u32.totalorder %s8150_s29, %s9083_s16 }
 0x115   :  { %p8156_p2 = pnand %p8154_p1, %p8151_p0 }
 0x117   :  { %8159 = shalt.err (!%p8156_p2)
}
 0x118   :  { %s8160_s27 = scalar_lea.vmem %s201_s21, 16  ;;  %s8164_s28 = scalar_lea.vmem %s201_s21, 32 }
 0x119   :  { %p8161_p3 = scmp.ne.s32.totalorder %s201_s21, %s8160_s27  ;;  %p8165_p4 = scmp.lt.s32.totalorder %s201_s21, %s201_s21 }
 0x11a   :  { %p8166_p5 = scmp.lt.s32.totalorder %s8164_s28, %s8160_s27 }
 0x11c   :  { %p8167_p6 = por %p8166_p5, %p8165_p4 }
 0x11e   :  { %p8168_p7 = pnand %p8167_p6, %p8161_p3 }
 0x120   :  { %8171 = shalt.err (!%p8168_p7)
}
 0x121   :  { %203 = dma.hbm_to_vmem [thread:$0]  %s9083_s16, 16, %s201_s21, [#allocation26]  }
 0x122   :  { %s8233_s10 = smov [#allocation28]   ;;  %s8172_s23 = scalar_lea.hbm %s9085_s19, 16 }
 0x123   :  { %s214_s17 = sshll.u32 %s8233_s10, 4  ;;  %p8173_p8 = scmp.ne.s32.totalorder %s9085_s19, %s8172_s23  ;;  %s215_s17 = int_to_ptr.vmem [resolvable:$true] %s214_s17 }
 0x124   :  { %p8176_p9 = scmp.lt.u32.totalorder %s8172_s23, %s9085_s19 }
 0x126   :  { %p8178_p10 = pnand %p8176_p9, %p8173_p8 }
 0x128   :  { %8181 = shalt.err (!%p8178_p10)
}
 0x129   :  { %s8182_s11 = scalar_lea.vmem %s215_s17, 16  ;;  %s8186_s16 = scalar_lea.vmem %s215_s17, 32 }
 0x12a   :  { %p8183_p11 = scmp.ne.s32.totalorder %s215_s17, %s8182_s11  ;;  %p8187_p12 = scmp.lt.s32.totalorder %s215_s17, %s215_s17 }
 0x12b   :  { %p8188_p13 = scmp.lt.s32.totalorder %s8186_s16, %s8182_s11 }
 0x12d   :  { %p8189_p0 = por %p8188_p13, %p8187_p12 }
 0x12f   :  { %p8190_p1 = pnand %p8189_p0, %p8183_p11 }
 0x131   :  { %8193 = shalt.err (!%p8190_p1)
}
 0x132   :  { %217 = dma.hbm_to_vmem [thread:$0]  %s9085_s19, 16, %s215_s17, [#allocation29]  }
 0x133   :  { %8194 = dma.done.wait [#allocation6], 512  }
 0x134   :  { %8195 = vsyncadd [#allocation6], 4294966784 }
 0x135   :  { %8196 = dma.done.wait [#allocation8], 67584  }
 0x136   :  { %8197 = vsyncadd [#allocation8], 4294899712 }
 0x137   :  { %8198 = dma.done.wait [#allocation11], 128  }
 0x138   :  { %8199 = vsyncadd [#allocation11], 4294967168 }
 0x139   :  { %8200 = dma.done.wait [#allocation14], 8224  }
 0x13a   :  { %8201 = vsyncadd [#allocation14], 4294959072 }
 0x13b   :  { %8202 = dma.done.wait [#allocation17], 8224  }
 0x13c   :  { %8203 = vsyncadd [#allocation17], 4294959072 }
 0x13d   :  { %8204 = dma.done.wait [#allocation20], 2080  }
 0x13e   :  { %8205 = vsyncadd [#allocation20], 4294965216 }
 0x13f   :  { %8206 = dma.done.wait [#allocation23], 2064  }
 0x140   :  { %8207 = vsyncadd [#allocation23], 4294965232 }
 0x141   :  { %8208 = dma.done.wait [#allocation26], 32  }
 0x142   :  { %8209 = vsyncadd [#allocation26], 4294967264 }
 0x143   :  { %8210 = dma.done.wait [#allocation29], 16  }
 0x144   :  { %8211 = vsyncadd [#allocation29], 4294967280  ;;  %v6770_v3 = vld [vmem:[#allocation9 + $0x4] ss:$16 sps:$4 sm:$0xff]   ;;  %v6772_v4 = vld [vmem:[#allocation9 + $0xc] ss:$16 sps:$4 sm:$0xff]  }
 0x145   :  { %3397 = vmatprep.subr.bf16.mxu0 %v6770_v3  ;;  %v6774_v5 = vld [vmem:[#allocation9] ss:$16 sps:$4 sm:$0xff]   ;;  %v6775_v6 = vld [vmem:[#allocation9 + $0x8] ss:$16 sps:$4 sm:$0xff]   ;;  %3725 = vmatprep.subr.bf16.mxu1 %v6772_v4  ;;  %v6776_v7 = vld [vmem:[#allocation9 + $0x24] ss:$16 sps:$4 sm:$0xff]  }
 0x146   :  { %3398 = vmatpush1.bf16.msra.mxu0 %v6774_v5  ;;  %3726 = vmatpush1.bf16.msra.mxu1 %v6775_v6  ;;  %v6778_v8 = vld [vmem:[#allocation9 + $0x2c] ss:$16 sps:$4 sm:$0xff]   ;;  %v6780_v9 = vld [vmem:[#allocation9 + $0x20] ss:$16 sps:$4 sm:$0xff]   ;;  %v6781_v10 = vld [vmem:[#allocation9 + $0x28] ss:$16 sps:$4 sm:$0xff]  }
 0x147   :  { %3399 = vmatprep.subr.bf16.mxu0 %v6776_v7  ;;  %3727 = vmatprep.subr.bf16.mxu1 %v6778_v8  ;;  %v6782_v11 = vld [vmem:[#allocation9 + $0x44] ss:$16 sps:$4 sm:$0xff]   ;;  %v6784_v12 = vld [vmem:[#allocation9 + $0x4c] ss:$16 sps:$4 sm:$0xff]   ;;  %v6786_v13 = vld [vmem:[#allocation9 + $0x40] ss:$16 sps:$4 sm:$0xff]  }
 0x148   :  { %v6787_v14 = vld [vmem:[#allocation9 + $0x48] ss:$16 sps:$4 sm:$0xff]   ;;  %v6788_v15 = vld [vmem:[#allocation9 + $0x64] ss:$16 sps:$4 sm:$0xff]   ;;  %v6790_v16 = vld [vmem:[#allocation9 + $0x6c] ss:$16 sps:$4 sm:$0xff]  }
 0x149   :  { %v6792_v17 = vld [vmem:[#allocation9 + $0x60] ss:$16 sps:$4 sm:$0xff]   ;;  %v6793_v18 = vld [vmem:[#allocation9 + $0x68] ss:$16 sps:$4 sm:$0xff]   ;;  %v6794_v19 = vld [vmem:[#allocation9 + $0x84] ss:$16 sps:$4 sm:$0xff]  }
 0x14a   :  { %3400 = vmatpush1.bf16.msra.mxu0 %v6780_v9  ;;  %3728 = vmatpush1.bf16.msra.mxu1 %v6781_v10  ;;  %v6796_v20 = vld [vmem:[#allocation9 + $0x8c] ss:$16 sps:$4 sm:$0xff]   ;;  %v6798_v21 = vld [vmem:[#allocation9 + $0x80] ss:$16 sps:$4 sm:$0xff]   ;;  %v6799_v22 = vld [vmem:[#allocation9 + $0x88] ss:$16 sps:$4 sm:$0xff]  }
 0x14b   :  { %3401 = vmatprep.subr.bf16.mxu0 %v6782_v11  ;;  %3729 = vmatprep.subr.bf16.mxu1 %v6784_v12  ;;  %v6800_v23 = vld [vmem:[#allocation9 + $0xa4] ss:$16 sps:$4 sm:$0xff]   ;;  %v6802_v24 = vld [vmem:[#allocation9 + $0xac] ss:$16 sps:$4 sm:$0xff]   ;;  %v6804_v25 = vld [vmem:[#allocation9 + $0xa0] ss:$16 sps:$4 sm:$0xff]  }
 0x14c   :  { %v6805_v26 = vld [vmem:[#allocation9 + $0xa8] ss:$16 sps:$4 sm:$0xff]   ;;  %v6806_v27 = vld [vmem:[#allocation9 + $0xc4] ss:$16 sps:$4 sm:$0xff]   ;;  %v6808_v28 = vld [vmem:[#allocation9 + $0xcc] ss:$16 sps:$4 sm:$0xff]  }
 0x14d   :  { %v6810_v29 = vld [vmem:[#allocation9 + $0xc0] ss:$16 sps:$4 sm:$0xff]   ;;  %v6811_v30 = vld [vmem:[#allocation9 + $0xc8] ss:$16 sps:$4 sm:$0xff]   ;;  %v6812_v31 = vld [vmem:[#allocation9 + $0xe4] ss:$16 sps:$4 sm:$0xff]  }
 0x14e   :  { %3402 = vmatpush1.bf16.msra.mxu0 %v6786_v13  ;;  %3730 = vmatpush1.bf16.msra.mxu1 %v6787_v14  ;;  %v6814_v32 = vld [vmem:[#allocation9 + $0xec] ss:$16 sps:$4 sm:$0xff]   ;;  %v6816_v33 = vld [vmem:[#allocation9 + $0xe0] ss:$16 sps:$4 sm:$0xff]   ;;  %v6817_v34 = vld [vmem:[#allocation9 + $0xe8] ss:$16 sps:$4 sm:$0xff]  }
 0x14f   :  { %3403 = vmatprep.subr.bf16.mxu0 %v6788_v15  ;;  %3731 = vmatprep.subr.bf16.mxu1 %v6790_v16  ;;  %v6818_v35 = vld [vmem:[#allocation9 + $0x104] ss:$16 sps:$4 sm:$0xff]   ;;  %v6820_v36 = vld [vmem:[#allocation9 + $0x10c] ss:$16 sps:$4 sm:$0xff]   ;;  %v6822_v37 = vld [vmem:[#allocation9 + $0x100] ss:$16 sps:$4 sm:$0xff]  }
 0x150   :  { %v6823_v38 = vld [vmem:[#allocation9 + $0x108] ss:$16 sps:$4 sm:$0xff]   ;;  %v6824_v39 = vld [vmem:[#allocation9 + $0x124] ss:$16 sps:$4 sm:$0xff]   ;;  %v6826_v40 = vld [vmem:[#allocation9 + $0x12c] ss:$16 sps:$4 sm:$0xff]  }
 0x151   :  { %v6828_v41 = vld [vmem:[#allocation9 + $0x120] ss:$16 sps:$4 sm:$0xff]   ;;  %v6829_v42 = vld [vmem:[#allocation9 + $0x128] ss:$16 sps:$4 sm:$0xff]   ;;  %v6830_v43 = vld [vmem:[#allocation9 + $0x144] ss:$16 sps:$4 sm:$0xff]  }
 0x152   :  { %3404 = vmatpush1.bf16.msra.mxu0 %v6792_v17  ;;  %3732 = vmatpush1.bf16.msra.mxu1 %v6793_v18  ;;  %v6832_v44 = vld [vmem:[#allocation9 + $0x14c] ss:$16 sps:$4 sm:$0xff]   ;;  %v6834_v45 = vld [vmem:[#allocation9 + $0x140] ss:$16 sps:$4 sm:$0xff]   ;;  %v6835_v46 = vld [vmem:[#allocation9 + $0x148] ss:$16 sps:$4 sm:$0xff]  }
 0x153   :  { %3405 = vmatprep.subr.bf16.mxu0 %v6794_v19  ;;  %3733 = vmatprep.subr.bf16.mxu1 %v6796_v20  ;;  %v6836_v47 = vld [vmem:[#allocation9 + $0x164] ss:$16 sps:$4 sm:$0xff]   ;;  %v6838_v48 = vld [vmem:[#allocation9 + $0x16c] ss:$16 sps:$4 sm:$0xff]   ;;  %v6840_v50 = vld [vmem:[#allocation9 + $0x160] ss:$16 sps:$4 sm:$0xff]  }
 0x154   :  { %v272_v49 = vld [vmem:[#allocation7 + $0x8] sm:$0xff]  ;;  %v6842_v53 = vld [vmem:[#allocation9 + $0x184] ss:$16 sps:$4 sm:$0xff]   ;;  %v6846_v55 = vld [vmem:[#allocation9 + $0x180] ss:$16 sps:$4 sm:$0xff]   ;;  %vm8235_vm0 = vmmov 0  }
 0x155   :  { %v288_v51 = vpack.c.bf16 %v272_v49, %v272_v49  ;;  %v6841_v52 = vld [vmem:[#allocation9 + $0x168] ss:$16 sps:$4 sm:$0xff]   ;;  %v6844_v54 = vld [vmem:[#allocation9 + $0x18c] ss:$16 sps:$4 sm:$0xff]   ;;  %v6848_v57 = vld [vmem:[#allocation9 + $0x1a4] ss:$16 sps:$4 sm:$0xff]  }
 0x156   :  { %3406 = vmatpush1.bf16.msra.mxu0 %v6798_v21  ;;  %3734 = vmatpush1.bf16.msra.mxu1 %v6799_v22  ;;  %v6847_v56 = vld [vmem:[#allocation9 + $0x188] ss:$16 sps:$4 sm:$0xff]   ;;  %v6850_v58 = vld [vmem:[#allocation9 + $0x1ac] ss:$16 sps:$4 sm:$0xff]   ;;  %v6852_v59 = vld [vmem:[#allocation9 + $0x1a0] ss:$16 sps:$4 sm:$0xff]  }
 0x157   :  { %3407 = vmatprep.subr.bf16.mxu0 %v6800_v23  ;;  %3735 = vmatprep.subr.bf16.mxu1 %v6802_v24  ;;  %v6853_v60 = vld [vmem:[#allocation9 + $0x1a8] ss:$16 sps:$4 sm:$0xff]   ;;  %v6854_v61 = vld [vmem:[#allocation9 + $0x1c4] ss:$16 sps:$4 sm:$0xff]   ;;  %v6856_v62 = vld [vmem:[#allocation9 + $0x1cc] ss:$16 sps:$4 sm:$0xff]  }
 0x158   :  { %3429 = vmatprep.mubr.bf16.mxu0 %v288_v51  ;;  %3757 = vmatprep.mubr.bf16.mxu1 %v288_v51  ;;  %v6858_v63 = vld [vmem:[#allocation9 + $0x1c0] ss:$16 sps:$4 sm:$0xff]   ;;  %v6859_v0 = vld [vmem:[#allocation9 + $0x1c8] ss:$16 sps:$4 sm:$0xff]   ;;  %v6860_v1 = vld [vmem:[#allocation9 + $0x1e4] ss:$16 sps:$4 sm:$0xff]  }
 0x159   :  { %v6862_v2 = vld [vmem:[#allocation9 + $0x1ec] ss:$16 sps:$4 sm:$0xff]   ;;  %v6864_v3 = vld [vmem:[#allocation9 + $0x1e0] ss:$16 sps:$4 sm:$0xff]   ;;  %v6865_v4 = vld [vmem:[#allocation9 + $0x1e8] ss:$16 sps:$4 sm:$0xff]  }
 0x15a   :  { %3408 = vmatpush1.bf16.msra.mxu0 %v6804_v25  ;;  %3736 = vmatpush1.bf16.msra.mxu1 %v6805_v26  ;;  %v271_v5 = vld [vmem:[#allocation7] sm:$0xff]  ;;  %v6871_v7 = vld [vmem:[#allocation9 + $0x20c] ss:$16 sps:$4 sm:$0xff]   ;;  %v6869_v10 = vld [vmem:[#allocation9 + $0x208] ss:$16 sps:$4 sm:$0xff]   ;;  %vm9094_vm1 = vcmask 523264  }
 0x15b   :  { %3409 = vmatprep.subr.bf16.mxu0 %v6806_v27  ;;  %3737 = vmatprep.subr.bf16.mxu1 %v6808_v28  ;;  %v6868_v6 = vld [vmem:[#allocation9 + $0x204] ss:$16 sps:$4 sm:$0xff]   ;;  %v287_v8 = vpack.c.bf16 %v271_v5, %v271_v5  ;;  %v6866_v9 = vld [vmem:[#allocation9 + $0x200] ss:$16 sps:$4 sm:$0xff]   ;;  %v6877_v12 = vld [vmem:[#allocation9 + $0x22c] ss:$16 sps:$4 sm:$0xff]  }
 0x15c   :  { %v6874_v11 = vld [vmem:[#allocation9 + $0x224] ss:$16 sps:$4 sm:$0xff]   ;;  %v6872_v13 = vld [vmem:[#allocation9 + $0x220] ss:$16 sps:$4 sm:$0xff]   ;;  %v6875_v14 = vld [vmem:[#allocation9 + $0x228] ss:$16 sps:$4 sm:$0xff]  }
 0x15d   :  { %v6880_v15 = vld [vmem:[#allocation9 + $0x244] ss:$16 sps:$4 sm:$0xff]   ;;  %v6883_v16 = vld [vmem:[#allocation9 + $0x24c] ss:$16 sps:$4 sm:$0xff]   ;;  %v6878_v17 = vld [vmem:[#allocation9 + $0x240] ss:$16 sps:$4 sm:$0xff]  }
 0x15e   :  { %3410 = vmatpush1.bf16.msra.mxu0 %v6810_v29  ;;  %3738 = vmatpush1.bf16.msra.mxu1 %v6811_v30  ;;  %v6881_v18 = vld [vmem:[#allocation9 + $0x248] ss:$16 sps:$4 sm:$0xff]   ;;  %v6886_v19 = vld [vmem:[#allocation9 + $0x264] ss:$16 sps:$4 sm:$0xff]   ;;  %v6889_v20 = vld [vmem:[#allocation9 + $0x26c] ss:$16 sps:$4 sm:$0xff]  }
 0x15f   :  { %3411 = vmatprep.subr.bf16.mxu0 %v6812_v31  ;;  %3739 = vmatprep.subr.bf16.mxu1 %v6814_v32  ;;  %v6884_v21 = vld [vmem:[#allocation9 + $0x260] ss:$16 sps:$4 sm:$0xff]   ;;  %v6887_v22 = vld [vmem:[#allocation9 + $0x268] ss:$16 sps:$4 sm:$0xff]   ;;  %v6892_v23 = vld [vmem:[#allocation9 + $0x284] ss:$16 sps:$4 sm:$0xff]  }
 0x160   :  { %v6895_v24 = vld [vmem:[#allocation9 + $0x28c] ss:$16 sps:$4 sm:$0xff]   ;;  %v6890_v25 = vld [vmem:[#allocation9 + $0x280] ss:$16 sps:$4 sm:$0xff]   ;;  %v6893_v26 = vld [vmem:[#allocation9 + $0x288] ss:$16 sps:$4 sm:$0xff]  }
 0x161   :  { %v6898_v27 = vld [vmem:[#allocation9 + $0x2a4] ss:$16 sps:$4 sm:$0xff]   ;;  %v6901_v28 = vld [vmem:[#allocation9 + $0x2ac] ss:$16 sps:$4 sm:$0xff]   ;;  %v6896_v29 = vld [vmem:[#allocation9 + $0x2a0] ss:$16 sps:$4 sm:$0xff]  }
 0x162   :  { %3412 = vmatpush1.bf16.msra.mxu0 %v6816_v33  ;;  %3740 = vmatpush1.bf16.msra.mxu1 %v6817_v34  ;;  %v6899_v30 = vld [vmem:[#allocation9 + $0x2a8] ss:$16 sps:$4 sm:$0xff]   ;;  %v6904_v31 = vld [vmem:[#allocation9 + $0x2c4] ss:$16 sps:$4 sm:$0xff]   ;;  %v6907_v32 = vld [vmem:[#allocation9 + $0x2cc] ss:$16 sps:$4 sm:$0xff]  }
 0x163   :  { %3413 = vmatprep.subr.bf16.mxu0 %v6818_v35  ;;  %3741 = vmatprep.subr.bf16.mxu1 %v6820_v36  ;;  %v274_v33 = vld [vmem:[#allocation7 + $0x18] sm:$0xff]  ;;  %v6902_v34 = vld [vmem:[#allocation9 + $0x2c0] ss:$16 sps:$4 sm:$0xff]   ;;  %v6928_v49 = vld [vmem:[#allocation9 + $0x344] ss:$16 sps:$4 sm:$0xff]  }
 0x164   :  { %v290_v35 = vpack.c.bf16 %v274_v33, %v274_v33  ;;  %v6905_v36 = vld [vmem:[#allocation9 + $0x2c8] ss:$16 sps:$4 sm:$0xff]   ;;  %v6926_v51 = vld [vmem:[#allocation9 + $0x340] ss:$16 sps:$4 sm:$0xff]   ;;  %v6958_v5 = vld [vmem:[#allocation9 + $0x3e4] ss:$16 sps:$4 sm:$0xff]  }
 0x165   :  { %v6994_v33 = vld [vmem:[#allocation9 + $0x4a4] ss:$16 sps:$4 sm:$0xff]  }
 0x166   :  { %3414 = vmatpush1.bf16.msra.mxu0 %v6822_v37  ;;  %3742 = vmatpush1.bf16.msra.mxu1 %v6823_v38  ;;  %v6910_v37 = vld [vmem:[#allocation9 + $0x2e4] ss:$16 sps:$4 sm:$0xff]   ;;  %v6913_v38 = vld [vmem:[#allocation9 + $0x2ec] ss:$16 sps:$4 sm:$0xff]  }
 0x167   :  { %3415 = vmatprep.subr.bf16.mxu0 %v6824_v39  ;;  %3743 = vmatprep.subr.bf16.mxu1 %v6826_v40  ;;  %v6908_v39 = vld [vmem:[#allocation9 + $0x2e0] ss:$16 sps:$4 sm:$0xff]   ;;  %v6911_v40 = vld [vmem:[#allocation9 + $0x2e8] ss:$16 sps:$4 sm:$0xff]  }
 0x16a   :  { %3416 = vmatpush1.bf16.msra.mxu0 %v6828_v41  ;;  %3744 = vmatpush1.bf16.msra.mxu1 %v6829_v42  ;;  %v6916_v41 = vld [vmem:[#allocation9 + $0x304] ss:$16 sps:$4 sm:$0xff]   ;;  %v6919_v42 = vld [vmem:[#allocation9 + $0x30c] ss:$16 sps:$4 sm:$0xff]  }
 0x16b   :  { %3417 = vmatprep.subr.bf16.mxu0 %v6830_v43  ;;  %3745 = vmatprep.subr.bf16.mxu1 %v6832_v44  ;;  %v6914_v43 = vld [vmem:[#allocation9 + $0x300] ss:$16 sps:$4 sm:$0xff]   ;;  %v6917_v44 = vld [vmem:[#allocation9 + $0x308] ss:$16 sps:$4 sm:$0xff]  }
 0x16e   :  { %3418 = vmatpush1.bf16.msra.mxu0 %v6834_v45  ;;  %3746 = vmatpush1.bf16.msra.mxu1 %v6835_v46  ;;  %v6922_v45 = vld [vmem:[#allocation9 + $0x324] ss:$16 sps:$4 sm:$0xff]   ;;  %v6925_v46 = vld [vmem:[#allocation9 + $0x32c] ss:$16 sps:$4 sm:$0xff]  }
 0x16f   :  { %3419 = vmatprep.subr.bf16.mxu0 %v6836_v47  ;;  %3747 = vmatprep.subr.bf16.mxu1 %v6838_v48  ;;  %v6920_v47 = vld [vmem:[#allocation9 + $0x320] ss:$16 sps:$4 sm:$0xff]   ;;  %v6923_v48 = vld [vmem:[#allocation9 + $0x328] ss:$16 sps:$4 sm:$0xff]  }
 0x172   :  { %3420 = vmatpush1.bf16.msra.mxu0 %v6840_v50  ;;  %3748 = vmatpush1.bf16.msra.mxu1 %v6841_v52  ;;  %v6931_v50 = vld [vmem:[#allocation9 + $0x34c] ss:$16 sps:$4 sm:$0xff]   ;;  %v6929_v52 = vld [vmem:[#allocation9 + $0x348] ss:$16 sps:$4 sm:$0xff]  }
 0x173   :  { %3421 = vmatprep.subr.bf16.mxu0 %v6842_v53  ;;  %3749 = vmatprep.subr.bf16.mxu1 %v6844_v54  ;;  %v6934_v53 = vld [vmem:[#allocation9 + $0x364] ss:$16 sps:$4 sm:$0xff]   ;;  %v6937_v54 = vld [vmem:[#allocation9 + $0x36c] ss:$16 sps:$4 sm:$0xff]  }
 0x176   :  { %3422 = vmatpush1.bf16.msra.mxu0 %v6846_v55  ;;  %3750 = vmatpush1.bf16.msra.mxu1 %v6847_v56  ;;  %v6932_v55 = vld [vmem:[#allocation9 + $0x360] ss:$16 sps:$4 sm:$0xff]   ;;  %v6935_v56 = vld [vmem:[#allocation9 + $0x368] ss:$16 sps:$4 sm:$0xff]  }
 0x177   :  { %3423 = vmatprep.subr.bf16.mxu0 %v6848_v57  ;;  %3751 = vmatprep.subr.bf16.mxu1 %v6850_v58  ;;  %v6940_v57 = vld [vmem:[#allocation9 + $0x384] ss:$16 sps:$4 sm:$0xff]   ;;  %v6943_v58 = vld [vmem:[#allocation9 + $0x38c] ss:$16 sps:$4 sm:$0xff]  }
 0x17a   :  { %3424 = vmatpush1.bf16.msra.mxu0 %v6852_v59  ;;  %3752 = vmatpush1.bf16.msra.mxu1 %v6853_v60  ;;  %v6938_v59 = vld [vmem:[#allocation9 + $0x380] ss:$16 sps:$4 sm:$0xff]   ;;  %v6941_v60 = vld [vmem:[#allocation9 + $0x388] ss:$16 sps:$4 sm:$0xff]  }
 0x17b   :  { %3425 = vmatprep.subr.bf16.mxu0 %v6854_v61  ;;  %3753 = vmatprep.subr.bf16.mxu1 %v6856_v62  ;;  %v6946_v61 = vld [vmem:[#allocation9 + $0x3a4] ss:$16 sps:$4 sm:$0xff]   ;;  %v6949_v62 = vld [vmem:[#allocation9 + $0x3ac] ss:$16 sps:$4 sm:$0xff]  }
 0x17e   :  { %3426 = vmatpush1.bf16.msra.mxu0 %v6858_v63  ;;  %3754 = vmatpush1.bf16.msra.mxu1 %v6859_v0  ;;  %v6944_v63 = vld [vmem:[#allocation9 + $0x3a0] ss:$16 sps:$4 sm:$0xff]   ;;  %v6947_v0 = vld [vmem:[#allocation9 + $0x3a8] ss:$16 sps:$4 sm:$0xff]  }
 0x17f   :  { %3427 = vmatprep.subr.bf16.mxu0 %v6860_v1  ;;  %3755 = vmatprep.subr.bf16.mxu1 %v6862_v2  ;;  %v6952_v1 = vld [vmem:[#allocation9 + $0x3c4] ss:$16 sps:$4 sm:$0xff]   ;;  %v6955_v2 = vld [vmem:[#allocation9 + $0x3cc] ss:$16 sps:$4 sm:$0xff]  }
 0x182   :  { %3428 = vmatpush1.bf16.msra.mxu0 %v6864_v3  ;;  %3756 = vmatpush1.bf16.msra.mxu1 %v6865_v4  ;;  %v6950_v3 = vld [vmem:[#allocation9 + $0x3c0] ss:$16 sps:$4 sm:$0xff]   ;;  %v6953_v4 = vld [vmem:[#allocation9 + $0x3c8] ss:$16 sps:$4 sm:$0xff]  }
 0x183   :  { %3438 = vmatprep.subr.bf16.mxu0 %v6868_v6  ;;  %3766 = vmatprep.subr.bf16.mxu1 %v6871_v7  ;;  %v6961_v6 = vld [vmem:[#allocation9 + $0x3ec] ss:$16 sps:$4 sm:$0xff]   ;;  %v6956_v7 = vld [vmem:[#allocation9 + $0x3e0] ss:$16 sps:$4 sm:$0xff]  }
 0x185   :  { %3430 = vmatmul.mubr.bf16.vlgmr.msra.gmra.mrb[0].mxu0 %v287_v8  ;;  %3758 = vmatmul.mubr.bf16.vlgmr.msra.gmra.mrb[0].mxu1 %v287_v8  ;;  %v6959_v8 = vld [vmem:[#allocation9 + $0x3e8] ss:$16 sps:$4 sm:$0xff]  }
 0x186   :  { %3439 = vmatpush1.bf16.msra.mxu0 %v6866_v9  ;;  %3767 = vmatpush1.bf16.msra.mxu1 %v6869_v10  ;;  %v6964_v9 = vld [vmem:[#allocation9 + $0x404] ss:$16 sps:$4 sm:$0xff]  }
 0x187   :  { %3440 = vmatprep.subr.bf16.mxu0 %v6874_v11  ;;  %3768 = vmatprep.subr.bf16.mxu1 %v6877_v12  ;;  %v273_v10 = vld [vmem:[#allocation7 + $0x10] sm:$0xff]  ;;  %v6967_v11 = vld [vmem:[#allocation9 + $0x40c] ss:$16 sps:$4 sm:$0xff]  }
 0x188   :  { %3470 = vmatprep.mubr.bf16.mxu0 %v290_v35  ;;  %3798 = vmatprep.mubr.bf16.mxu1 %v290_v35  ;;  %v6962_v12 = vld [vmem:[#allocation9 + $0x400] ss:$16 sps:$4 sm:$0xff]  }
 0x189   :  { %v6992_v35 = vld [vmem:[#allocation9 + $0x4a0] ss:$16 sps:$4 sm:$0xff]  }
 0x18a   :  { %3441 = vmatpush1.bf16.msra.mxu0 %v6872_v13  ;;  %3769 = vmatpush1.bf16.msra.mxu1 %v6875_v14  ;;  %v6965_v13 = vld [vmem:[#allocation9 + $0x408] ss:$16 sps:$4 sm:$0xff]   ;;  %v289_v14 = vpack.c.bf16 %v273_v10, %v273_v10  ;;  %v7057_v10 = vld [vmem:[#allocation9 + $0x5ec] ss:$16 sps:$4 sm:$0xff]  }
 0x18b   :  { %3442 = vmatprep.subr.bf16.mxu0 %v6880_v15  ;;  %3770 = vmatprep.subr.bf16.mxu1 %v6883_v16  ;;  %v6970_v15 = vld [vmem:[#allocation9 + $0x424] ss:$16 sps:$4 sm:$0xff]   ;;  %v6973_v16 = vld [vmem:[#allocation9 + $0x42c] ss:$16 sps:$4 sm:$0xff]  }
 0x18e   :  { %3443 = vmatpush1.bf16.msra.mxu0 %v6878_v17  ;;  %3771 = vmatpush1.bf16.msra.mxu1 %v6881_v18  ;;  %v276_v17 = vld [vmem:[#allocation7 + $0x28] sm:$0xff] }
 0x18f   :  { %3444 = vmatprep.subr.bf16.mxu0 %v6886_v19  ;;  %3772 = vmatprep.subr.bf16.mxu1 %v6889_v20  ;;  %v292_v18 = vpack.c.bf16 %v276_v17, %v276_v17  ;;  %v6968_v19 = vld [vmem:[#allocation9 + $0x420] ss:$16 sps:$4 sm:$0xff]   ;;  %v6971_v20 = vld [vmem:[#allocation9 + $0x428] ss:$16 sps:$4 sm:$0xff]  }
 0x190   :  { %v7061_v17 = vld [vmem:[#allocation9 + $0x608] ss:$16 sps:$4 sm:$0xff]  }
 0x192   :  { %3445 = vmatpush1.bf16.msra.mxu0 %v6884_v21  ;;  %3773 = vmatpush1.bf16.msra.mxu1 %v6887_v22  ;;  %v6976_v21 = vld [vmem:[#allocation9 + $0x444] ss:$16 sps:$4 sm:$0xff]   ;;  %v6979_v22 = vld [vmem:[#allocation9 + $0x44c] ss:$16 sps:$4 sm:$0xff]  }
 0x193   :  { %3446 = vmatprep.subr.bf16.mxu0 %v6892_v23  ;;  %3774 = vmatprep.subr.bf16.mxu1 %v6895_v24  ;;  %v6974_v23 = vld [vmem:[#allocation9 + $0x440] ss:$16 sps:$4 sm:$0xff]   ;;  %v6977_v24 = vld [vmem:[#allocation9 + $0x448] ss:$16 sps:$4 sm:$0xff]  }
 0x196   :  { %3447 = vmatpush1.bf16.msra.mxu0 %v6890_v25  ;;  %3775 = vmatpush1.bf16.msra.mxu1 %v6893_v26  ;;  %v6982_v25 = vld [vmem:[#allocation9 + $0x464] ss:$16 sps:$4 sm:$0xff]   ;;  %v6985_v26 = vld [vmem:[#allocation9 + $0x46c] ss:$16 sps:$4 sm:$0xff]  }
 0x197   :  { %3448 = vmatprep.subr.bf16.mxu0 %v6898_v27  ;;  %3776 = vmatprep.subr.bf16.mxu1 %v6901_v28  ;;  %v6980_v27 = vld [vmem:[#allocation9 + $0x460] ss:$16 sps:$4 sm:$0xff]   ;;  %v6983_v28 = vld [vmem:[#allocation9 + $0x468] ss:$16 sps:$4 sm:$0xff]  }
 0x19a   :  { %3449 = vmatpush1.bf16.msra.mxu0 %v6896_v29  ;;  %3777 = vmatpush1.bf16.msra.mxu1 %v6899_v30  ;;  %v6988_v29 = vld [vmem:[#allocation9 + $0x484] ss:$16 sps:$4 sm:$0xff]   ;;  %v6991_v30 = vld [vmem:[#allocation9 + $0x48c] ss:$16 sps:$4 sm:$0xff]  }
 0x19b   :  { %3450 = vmatprep.subr.bf16.mxu0 %v6904_v31  ;;  %3778 = vmatprep.subr.bf16.mxu1 %v6907_v32  ;;  %v6986_v31 = vld [vmem:[#allocation9 + $0x480] ss:$16 sps:$4 sm:$0xff]   ;;  %v6989_v32 = vld [vmem:[#allocation9 + $0x488] ss:$16 sps:$4 sm:$0xff]  }
 0x19e   :  { %3451 = vmatpush1.bf16.msra.mxu0 %v6902_v34  ;;  %3779 = vmatpush1.bf16.msra.mxu1 %v6905_v36  ;;  %v6997_v34 = vld [vmem:[#allocation9 + $0x4ac] ss:$16 sps:$4 sm:$0xff]   ;;  %v6995_v36 = vld [vmem:[#allocation9 + $0x4a8] ss:$16 sps:$4 sm:$0xff]  }
 0x19f   :  { %3452 = vmatprep.subr.bf16.mxu0 %v6910_v37  ;;  %3780 = vmatprep.subr.bf16.mxu1 %v6913_v38  ;;  %v7000_v37 = vld [vmem:[#allocation9 + $0x4c4] ss:$16 sps:$4 sm:$0xff]   ;;  %v7003_v38 = vld [vmem:[#allocation9 + $0x4cc] ss:$16 sps:$4 sm:$0xff]  }
 0x1a2   :  { %3453 = vmatpush1.bf16.msra.mxu0 %v6908_v39  ;;  %3781 = vmatpush1.bf16.msra.mxu1 %v6911_v40  ;;  %v6998_v39 = vld [vmem:[#allocation9 + $0x4c0] ss:$16 sps:$4 sm:$0xff]   ;;  %v7001_v40 = vld [vmem:[#allocation9 + $0x4c8] ss:$16 sps:$4 sm:$0xff]  }
 0x1a3   :  { %3454 = vmatprep.subr.bf16.mxu0 %v6916_v41  ;;  %3782 = vmatprep.subr.bf16.mxu1 %v6919_v42  ;;  %v7006_v41 = vld [vmem:[#allocation9 + $0x4e4] ss:$16 sps:$4 sm:$0xff]   ;;  %v7009_v42 = vld [vmem:[#allocation9 + $0x4ec] ss:$16 sps:$4 sm:$0xff]  }
 0x1a6   :  { %3455 = vmatpush1.bf16.msra.mxu0 %v6914_v43  ;;  %3783 = vmatpush1.bf16.msra.mxu1 %v6917_v44  ;;  %v7004_v43 = vld [vmem:[#allocation9 + $0x4e0] ss:$16 sps:$4 sm:$0xff]   ;;  %v7007_v44 = vld [vmem:[#allocation9 + $0x4e8] ss:$16 sps:$4 sm:$0xff]  }
 0x1a7   :  { %3456 = vmatprep.subr.bf16.mxu0 %v6922_v45  ;;  %3784 = vmatprep.subr.bf16.mxu1 %v6925_v46  ;;  %v7012_v45 = vld [vmem:[#allocation9 + $0x504] ss:$16 sps:$4 sm:$0xff]   ;;  %v7015_v46 = vld [vmem:[#allocation9 + $0x50c] ss:$16 sps:$4 sm:$0xff]  }
 0x1aa   :  { %3457 = vmatpush1.bf16.msra.mxu0 %v6920_v47  ;;  %3785 = vmatpush1.bf16.msra.mxu1 %v6923_v48  ;;  %v7010_v47 = vld [vmem:[#allocation9 + $0x500] ss:$16 sps:$4 sm:$0xff]   ;;  %v7013_v48 = vld [vmem:[#allocation9 + $0x508] ss:$16 sps:$4 sm:$0xff]  }
 0x1ab   :  { %3458 = vmatprep.subr.bf16.mxu0 %v6928_v49  ;;  %3786 = vmatprep.subr.bf16.mxu1 %v6931_v50  ;;  %v7018_v49 = vld [vmem:[#allocation9 + $0x524] ss:$16 sps:$4 sm:$0xff]   ;;  %v7021_v50 = vld [vmem:[#allocation9 + $0x52c] ss:$16 sps:$4 sm:$0xff]  }
 0x1ae   :  { %3459 = vmatpush1.bf16.msra.mxu0 %v6926_v51  ;;  %3787 = vmatpush1.bf16.msra.mxu1 %v6929_v52  ;;  %v7016_v51 = vld [vmem:[#allocation9 + $0x520] ss:$16 sps:$4 sm:$0xff]   ;;  %v7019_v52 = vld [vmem:[#allocation9 + $0x528] ss:$16 sps:$4 sm:$0xff]  }
 0x1af   :  { %3460 = vmatprep.subr.bf16.mxu0 %v6934_v53  ;;  %3788 = vmatprep.subr.bf16.mxu1 %v6937_v54  ;;  %v7024_v53 = vld [vmem:[#allocation9 + $0x544] ss:$16 sps:$4 sm:$0xff]   ;;  %v7027_v54 = vld [vmem:[#allocation9 + $0x54c] ss:$16 sps:$4 sm:$0xff]  }
 0x1b2   :  { %3461 = vmatpush1.bf16.msra.mxu0 %v6932_v55  ;;  %3789 = vmatpush1.bf16.msra.mxu1 %v6935_v56  ;;  %v7022_v55 = vld [vmem:[#allocation9 + $0x540] ss:$16 sps:$4 sm:$0xff]   ;;  %v7025_v56 = vld [vmem:[#allocation9 + $0x548] ss:$16 sps:$4 sm:$0xff]  }
 0x1b3   :  { %3462 = vmatprep.subr.bf16.mxu0 %v6940_v57  ;;  %3790 = vmatprep.subr.bf16.mxu1 %v6943_v58  ;;  %v7030_v57 = vld [vmem:[#allocation9 + $0x564] ss:$16 sps:$4 sm:$0xff]   ;;  %v7033_v58 = vld [vmem:[#allocation9 + $0x56c] ss:$16 sps:$4 sm:$0xff]  }
 0x1b6   :  { %3463 = vmatpush1.bf16.msra.mxu0 %v6938_v59  ;;  %3791 = vmatpush1.bf16.msra.mxu1 %v6941_v60  ;;  %v7028_v59 = vld [vmem:[#allocation9 + $0x560] ss:$16 sps:$4 sm:$0xff]   ;;  %v7031_v60 = vld [vmem:[#allocation9 + $0x568] ss:$16 sps:$4 sm:$0xff]  }
 0x1b7   :  { %3464 = vmatprep.subr.bf16.mxu0 %v6946_v61  ;;  %3792 = vmatprep.subr.bf16.mxu1 %v6949_v62  ;;  %v7036_v61 = vld [vmem:[#allocation9 + $0x584] ss:$16 sps:$4 sm:$0xff]   ;;  %v7039_v62 = vld [vmem:[#allocation9 + $0x58c] ss:$16 sps:$4 sm:$0xff]  }
 0x1ba   :  { %3465 = vmatpush1.bf16.msra.mxu0 %v6944_v63  ;;  %3793 = vmatpush1.bf16.msra.mxu1 %v6947_v0  ;;  %v7034_v63 = vld [vmem:[#allocation9 + $0x580] ss:$16 sps:$4 sm:$0xff]   ;;  %v7037_v0 = vld [vmem:[#allocation9 + $0x588] ss:$16 sps:$4 sm:$0xff]  }
 0x1bb   :  { %3466 = vmatprep.subr.bf16.mxu0 %v6952_v1  ;;  %3794 = vmatprep.subr.bf16.mxu1 %v6955_v2  ;;  %v7042_v1 = vld [vmem:[#allocation9 + $0x5a4] ss:$16 sps:$4 sm:$0xff]   ;;  %v7045_v2 = vld [vmem:[#allocation9 + $0x5ac] ss:$16 sps:$4 sm:$0xff]  }
 0x1be   :  { %3467 = vmatpush1.bf16.msra.mxu0 %v6950_v3  ;;  %3795 = vmatpush1.bf16.msra.mxu1 %v6953_v4  ;;  %v7040_v3 = vld [vmem:[#allocation9 + $0x5a0] ss:$16 sps:$4 sm:$0xff]   ;;  %v7043_v4 = vld [vmem:[#allocation9 + $0x5a8] ss:$16 sps:$4 sm:$0xff]  }
 0x1bf   :  { %3468 = vmatprep.subr.bf16.mxu0 %v6958_v5  ;;  %3796 = vmatprep.subr.bf16.mxu1 %v6961_v6  ;;  %v7048_v5 = vld [vmem:[#allocation9 + $0x5c4] ss:$16 sps:$4 sm:$0xff]   ;;  %v7051_v6 = vld [vmem:[#allocation9 + $0x5cc] ss:$16 sps:$4 sm:$0xff]  }
 0x1c2   :  { %3469 = vmatpush1.bf16.msra.mxu0 %v6956_v7  ;;  %3797 = vmatpush1.bf16.msra.mxu1 %v6959_v8  ;;  %v7046_v7 = vld [vmem:[#allocation9 + $0x5c0] ss:$16 sps:$4 sm:$0xff]   ;;  %v7049_v8 = vld [vmem:[#allocation9 + $0x5c8] ss:$16 sps:$4 sm:$0xff]  }
 0x1c3   :  { %3479 = vmatprep.subr.bf16.mxu0 %v6964_v9  ;;  %3807 = vmatprep.subr.bf16.mxu1 %v6967_v11  ;;  %v7054_v9 = vld [vmem:[#allocation9 + $0x5e4] ss:$16 sps:$4 sm:$0xff]   ;;  %v7052_v11 = vld [vmem:[#allocation9 + $0x5e0] ss:$16 sps:$4 sm:$0xff]  }
 0x1c5   :  { %3471 = vmatmul.mubr.bf16.vlgmr.msra.gmra.mrb[0].mxu0 %v289_v14  ;;  %3799 = vmatmul.mubr.bf16.vlgmr.msra.gmra.mrb[0].mxu1 %v289_v14  ;;  %v275_v14 = vld [vmem:[#allocation7 + $0x20] sm:$0xff] }
 0x1c6   :  { %3480 = vmatpush1.bf16.msra.mxu0 %v6962_v12  ;;  %3808 = vmatpush1.bf16.msra.mxu1 %v6965_v13  ;;  %v7055_v12 = vld [vmem:[#allocation9 + $0x5e8] ss:$16 sps:$4 sm:$0xff]   ;;  %v7060_v13 = vld [vmem:[#allocation9 + $0x604] ss:$16 sps:$4 sm:$0xff]  }
 0x1c7   :  { %3481 = vmatprep.subr.bf16.mxu0 %v6970_v15  ;;  %3809 = vmatprep.subr.bf16.mxu1 %v6973_v16  ;;  %v7063_v15 = vld [vmem:[#allocation9 + $0x60c] ss:$16 sps:$4 sm:$0xff]   ;;  %v7058_v16 = vld [vmem:[#allocation9 + $0x600] ss:$16 sps:$4 sm:$0xff]  }
 0x1c8   :  { %3511 = vmatprep.mubr.bf16.mxu0 %v292_v18  ;;  %3839 = vmatprep.mubr.bf16.mxu1 %v292_v18  ;;  %v291_v18 = vpack.c.bf16 %v275_v14, %v275_v14  ;;  %v7153_v14 = vld [vmem:[#allocation9 + $0x7ec] ss:$16 sps:$4 sm:$0xff]  }
 0x1ca   :  { %3482 = vmatpush1.bf16.msra.mxu0 %v6968_v19  ;;  %3810 = vmatpush1.bf16.msra.mxu1 %v6971_v20  ;;  %v278_v19 = vld [vmem:[#allocation7 + $0x38] sm:$0xff]  ;;  %v7066_v20 = vld [vmem:[#allocation9 + $0x624] ss:$16 sps:$4 sm:$0xff]  }
 0x1cb   :  { %3483 = vmatprep.subr.bf16.mxu0 %v6976_v21  ;;  %3811 = vmatprep.subr.bf16.mxu1 %v6979_v22  ;;  %v7069_v21 = vld [vmem:[#allocation9 + $0x62c] ss:$16 sps:$4 sm:$0xff]   ;;  %v294_v22 = vpack.c.bf16 %v278_v19, %v278_v19 }
 0x1cc   :  { %v7159_v19 = vld [vmem:[#allocation9 + $0x80c] ss:$16 sps:$4 sm:$0xff]  }
 0x1ce   :  { %3484 = vmatpush1.bf16.msra.mxu0 %v6974_v23  ;;  %3812 = vmatpush1.bf16.msra.mxu1 %v6977_v24  ;;  %v7064_v23 = vld [vmem:[#allocation9 + $0x620] ss:$16 sps:$4 sm:$0xff]   ;;  %v7067_v24 = vld [vmem:[#allocation9 + $0x628] ss:$16 sps:$4 sm:$0xff]  }
 0x1cf   :  { %3485 = vmatprep.subr.bf16.mxu0 %v6982_v25  ;;  %3813 = vmatprep.subr.bf16.mxu1 %v6985_v26  ;;  %v7072_v25 = vld [vmem:[#allocation9 + $0x644] ss:$16 sps:$4 sm:$0xff]   ;;  %v7075_v26 = vld [vmem:[#allocation9 + $0x64c] ss:$16 sps:$4 sm:$0xff]  }
 0x1d2   :  { %3486 = vmatpush1.bf16.msra.mxu0 %v6980_v27  ;;  %3814 = vmatpush1.bf16.msra.mxu1 %v6983_v28  ;;  %v7070_v27 = vld [vmem:[#allocation9 + $0x640] ss:$16 sps:$4 sm:$0xff]   ;;  %v7073_v28 = vld [vmem:[#allocation9 + $0x648] ss:$16 sps:$4 sm:$0xff]  }
 0x1d3   :  { %3487 = vmatprep.subr.bf16.mxu0 %v6988_v29  ;;  %3815 = vmatprep.subr.bf16.mxu1 %v6991_v30  ;;  %v7078_v29 = vld [vmem:[#allocation9 + $0x664] ss:$16 sps:$4 sm:$0xff]   ;;  %v7081_v30 = vld [vmem:[#allocation9 + $0x66c] ss:$16 sps:$4 sm:$0xff]  }
 0x1d6   :  { %3488 = vmatpush1.bf16.msra.mxu0 %v6986_v31  ;;  %3816 = vmatpush1.bf16.msra.mxu1 %v6989_v32  ;;  %v7076_v31 = vld [vmem:[#allocation9 + $0x660] ss:$16 sps:$4 sm:$0xff]   ;;  %v7079_v32 = vld [vmem:[#allocation9 + $0x668] ss:$16 sps:$4 sm:$0xff]  }
 0x1d7   :  { %3489 = vmatprep.subr.bf16.mxu0 %v6994_v33  ;;  %3817 = vmatprep.subr.bf16.mxu1 %v6997_v34  ;;  %v7084_v33 = vld [vmem:[#allocation9 + $0x684] ss:$16 sps:$4 sm:$0xff]   ;;  %v7087_v34 = vld [vmem:[#allocation9 + $0x68c] ss:$16 sps:$4 sm:$0xff]  }
 0x1da   :  { %3490 = vmatpush1.bf16.msra.mxu0 %v6992_v35  ;;  %3818 = vmatpush1.bf16.msra.mxu1 %v6995_v36  ;;  %v7082_v35 = vld [vmem:[#allocation9 + $0x680] ss:$16 sps:$4 sm:$0xff]   ;;  %v7085_v36 = vld [vmem:[#allocation9 + $0x688] ss:$16 sps:$4 sm:$0xff]  }
 0x1db   :  { %3491 = vmatprep.subr.bf16.mxu0 %v7000_v37  ;;  %3819 = vmatprep.subr.bf16.mxu1 %v7003_v38  ;;  %v7090_v37 = vld [vmem:[#allocation9 + $0x6a4] ss:$16 sps:$4 sm:$0xff]   ;;  %v7093_v38 = vld [vmem:[#allocation9 + $0x6ac] ss:$16 sps:$4 sm:$0xff]  }
 0x1de   :  { %3492 = vmatpush1.bf16.msra.mxu0 %v6998_v39  ;;  %3820 = vmatpush1.bf16.msra.mxu1 %v7001_v40  ;;  %v7088_v39 = vld [vmem:[#allocation9 + $0x6a0] ss:$16 sps:$4 sm:$0xff]   ;;  %v7091_v40 = vld [vmem:[#allocation9 + $0x6a8] ss:$16 sps:$4 sm:$0xff]  }
 0x1df   :  { %3493 = vmatprep.subr.bf16.mxu0 %v7006_v41  ;;  %3821 = vmatprep.subr.bf16.mxu1 %v7009_v42  ;;  %v7096_v41 = vld [vmem:[#allocation9 + $0x6c4] ss:$16 sps:$4 sm:$0xff]   ;;  %v7099_v42 = vld [vmem:[#allocation9 + $0x6cc] ss:$16 sps:$4 sm:$0xff]  }
 0x1e2   :  { %3494 = vmatpush1.bf16.msra.mxu0 %v7004_v43  ;;  %3822 = vmatpush1.bf16.msra.mxu1 %v7007_v44  ;;  %v7094_v43 = vld [vmem:[#allocation9 + $0x6c0] ss:$16 sps:$4 sm:$0xff]   ;;  %v7097_v44 = vld [vmem:[#allocation9 + $0x6c8] ss:$16 sps:$4 sm:$0xff]  }
 0x1e3   :  { %3495 = vmatprep.subr.bf16.mxu0 %v7012_v45  ;;  %3823 = vmatprep.subr.bf16.mxu1 %v7015_v46  ;;  %v7102_v45 = vld [vmem:[#allocation9 + $0x6e4] ss:$16 sps:$4 sm:$0xff]   ;;  %v7105_v46 = vld [vmem:[#allocation9 + $0x6ec] ss:$16 sps:$4 sm:$0xff]  }
 0x1e6   :  { %3496 = vmatpush1.bf16.msra.mxu0 %v7010_v47  ;;  %3824 = vmatpush1.bf16.msra.mxu1 %v7013_v48  ;;  %v7100_v47 = vld [vmem:[#allocation9 + $0x6e0] ss:$16 sps:$4 sm:$0xff]   ;;  %v7103_v48 = vld [vmem:[#allocation9 + $0x6e8] ss:$16 sps:$4 sm:$0xff]  }
 0x1e7   :  { %3497 = vmatprep.subr.bf16.mxu0 %v7018_v49  ;;  %3825 = vmatprep.subr.bf16.mxu1 %v7021_v50  ;;  %v7108_v49 = vld [vmem:[#allocation9 + $0x704] ss:$16 sps:$4 sm:$0xff]   ;;  %v7111_v50 = vld [vmem:[#allocation9 + $0x70c] ss:$16 sps:$4 sm:$0xff]  }
 0x1ea   :  { %3498 = vmatpush1.bf16.msra.mxu0 %v7016_v51  ;;  %3826 = vmatpush1.bf16.msra.mxu1 %v7019_v52  ;;  %v7106_v51 = vld [vmem:[#allocation9 + $0x700] ss:$16 sps:$4 sm:$0xff]   ;;  %v7109_v52 = vld [vmem:[#allocation9 + $0x708] ss:$16 sps:$4 sm:$0xff]  }
 0x1eb   :  { %3499 = vmatprep.subr.bf16.mxu0 %v7024_v53  ;;  %3827 = vmatprep.subr.bf16.mxu1 %v7027_v54  ;;  %v7114_v53 = vld [vmem:[#allocation9 + $0x724] ss:$16 sps:$4 sm:$0xff]   ;;  %v7117_v54 = vld [vmem:[#allocation9 + $0x72c] ss:$16 sps:$4 sm:$0xff]  }
 0x1ee   :  { %3500 = vmatpush1.bf16.msra.mxu0 %v7022_v55  ;;  %3828 = vmatpush1.bf16.msra.mxu1 %v7025_v56  ;;  %v7112_v55 = vld [vmem:[#allocation9 + $0x720] ss:$16 sps:$4 sm:$0xff]   ;;  %v7115_v56 = vld [vmem:[#allocation9 + $0x728] ss:$16 sps:$4 sm:$0xff]  }
 0x1ef   :  { %3501 = vmatprep.subr.bf16.mxu0 %v7030_v57  ;;  %3829 = vmatprep.subr.bf16.mxu1 %v7033_v58  ;;  %v7120_v57 = vld [vmem:[#allocation9 + $0x744] ss:$16 sps:$4 sm:$0xff]   ;;  %v7123_v58 = vld [vmem:[#allocation9 + $0x74c] ss:$16 sps:$4 sm:$0xff]  }
 0x1f2   :  { %3502 = vmatpush1.bf16.msra.mxu0 %v7028_v59  ;;  %3830 = vmatpush1.bf16.msra.mxu1 %v7031_v60  ;;  %v7118_v59 = vld [vmem:[#allocation9 + $0x740] ss:$16 sps:$4 sm:$0xff]   ;;  %v7121_v60 = vld [vmem:[#allocation9 + $0x748] ss:$16 sps:$4 sm:$0xff]  }
 0x1f3   :  { %3503 = vmatprep.subr.bf16.mxu0 %v7036_v61  ;;  %3831 = vmatprep.subr.bf16.mxu1 %v7039_v62  ;;  %v7126_v61 = vld [vmem:[#allocation9 + $0x764] ss:$16 sps:$4 sm:$0xff]   ;;  %v7129_v62 = vld [vmem:[#allocation9 + $0x76c] ss:$16 sps:$4 sm:$0xff]  }
 0x1f6   :  { %3504 = vmatpush1.bf16.msra.mxu0 %v7034_v63  ;;  %3832 = vmatpush1.bf16.msra.mxu1 %v7037_v0  ;;  %v7124_v63 = vld [vmem:[#allocation9 + $0x760] ss:$16 sps:$4 sm:$0xff]   ;;  %v7127_v0 = vld [vmem:[#allocation9 + $0x768] ss:$16 sps:$4 sm:$0xff]  }
 0x1f7   :  { %3505 = vmatprep.subr.bf16.mxu0 %v7042_v1  ;;  %3833 = vmatprep.subr.bf16.mxu1 %v7045_v2  ;;  %v7132_v1 = vld [vmem:[#allocation9 + $0x784] ss:$16 sps:$4 sm:$0xff]   ;;  %v7135_v2 = vld [vmem:[#allocation9 + $0x78c] ss:$16 sps:$4 sm:$0xff]  }
 0x1fa   :  { %3506 = vmatpush1.bf16.msra.mxu0 %v7040_v3  ;;  %3834 = vmatpush1.bf16.msra.mxu1 %v7043_v4  ;;  %v7130_v3 = vld [vmem:[#allocation9 + $0x780] ss:$16 sps:$4 sm:$0xff]   ;;  %v7133_v4 = vld [vmem:[#allocation9 + $0x788] ss:$16 sps:$4 sm:$0xff]  }
 0x1fb   :  { %3507 = vmatprep.subr.bf16.mxu0 %v7048_v5  ;;  %3835 = vmatprep.subr.bf16.mxu1 %v7051_v6  ;;  %v7138_v5 = vld [vmem:[#allocation9 + $0x7a4] ss:$16 sps:$4 sm:$0xff]   ;;  %v7141_v6 = vld [vmem:[#allocation9 + $0x7ac] ss:$16 sps:$4 sm:$0xff]  }
 0x1fe   :  { %3508 = vmatpush1.bf16.msra.mxu0 %v7046_v7  ;;  %3836 = vmatpush1.bf16.msra.mxu1 %v7049_v8  ;;  %v7136_v7 = vld [vmem:[#allocation9 + $0x7a0] ss:$16 sps:$4 sm:$0xff]   ;;  %v7139_v8 = vld [vmem:[#allocation9 + $0x7a8] ss:$16 sps:$4 sm:$0xff]  }
 0x1ff   :  { %3509 = vmatprep.subr.bf16.mxu0 %v7054_v9  ;;  %3837 = vmatprep.subr.bf16.mxu1 %v7057_v10  ;;  %v7144_v9 = vld [vmem:[#allocation9 + $0x7c4] ss:$16 sps:$4 sm:$0xff]   ;;  %v7147_v10 = vld [vmem:[#allocation9 + $0x7cc] ss:$16 sps:$4 sm:$0xff]  }
 0x202   :  { %3510 = vmatpush1.bf16.msra.mxu0 %v7052_v11  ;;  %3838 = vmatpush1.bf16.msra.mxu1 %v7055_v12  ;;  %v7142_v11 = vld [vmem:[#allocation9 + $0x7c0] ss:$16 sps:$4 sm:$0xff]   ;;  %v7145_v12 = vld [vmem:[#allocation9 + $0x7c8] ss:$16 sps:$4 sm:$0xff]  }
 0x203   :  { %3520 = vmatprep.subr.bf16.mxu0 %v7060_v13  ;;  %3848 = vmatprep.subr.bf16.mxu1 %v7063_v15  ;;  %v7150_v13 = vld [vmem:[#allocation9 + $0x7e4] ss:$16 sps:$4 sm:$0xff]   ;;  %v7148_v15 = vld [vmem:[#allocation9 + $0x7e0] ss:$16 sps:$4 sm:$0xff]  }
 0x205   :  { %3512 = vmatmul.mubr.bf16.vlgmr.msra.gmra.mrb[0].mxu0 %v291_v18  ;;  %3840 = vmatmul.mubr.bf16.vlgmr.msra.gmra.mrb[0].mxu1 %v291_v18  ;;  %v7156_v18 = vld [vmem:[#allocation9 + $0x804] ss:$16 sps:$4 sm:$0xff]  }
 0x206   :  { %3521 = vmatpush1.bf16.msra.mxu0 %v7058_v16  ;;  %3849 = vmatpush1.bf16.msra.mxu1 %v7061_v17  ;;  %v7151_v16 = vld [vmem:[#allocation9 + $0x7e8] ss:$16 sps:$4 sm:$0xff]   ;;  %v277_v17 = vld [vmem:[#allocation7 + $0x30] sm:$0xff] }
 0x207   :  { %3522 = vmatprep.subr.bf16.mxu0 %v7066_v20  ;;  %3850 = vmatprep.subr.bf16.mxu1 %v7069_v21  ;;  %v293_v20 = vpack.c.bf16 %v277_v17, %v277_v17  ;;  %v280_v21 = vld [vmem:[#allocation7 + $0x48] sm:$0xff]  ;;  %v7246_v17 = vld [vmem:[#allocation9 + $0x9e4] ss:$16 sps:$4 sm:$0xff]  }
 0x208   :  { %3552 = vmatprep.mubr.bf16.mxu0 %v294_v22  ;;  %3880 = vmatprep.mubr.bf16.mxu1 %v294_v22  ;;  %v7154_v22 = vld [vmem:[#allocation9 + $0x800] ss:$16 sps:$4 sm:$0xff]  }
 0x20a   :  { %3523 = vmatpush1.bf16.msra.mxu0 %v7064_v23  ;;  %3851 = vmatpush1.bf16.msra.mxu1 %v7067_v24  ;;  %v7157_v23 = vld [vmem:[#allocation9 + $0x808] ss:$16 sps:$4 sm:$0xff]   ;;  %v7162_v24 = vld [vmem:[#allocation9 + $0x824] ss:$16 sps:$4 sm:$0xff]  }
 0x20b   :  { %3524 = vmatprep.subr.bf16.mxu0 %v7072_v25  ;;  %3852 = vmatprep.subr.bf16.mxu1 %v7075_v26  ;;  %v7165_v25 = vld [vmem:[#allocation9 + $0x82c] ss:$16 sps:$4 sm:$0xff]   ;;  %v296_v26 = vpack.c.bf16 %v280_v21, %v280_v21  ;;  %v7252_v21 = vld [vmem:[#allocation9 + $0xa04] ss:$16 sps:$4 sm:$0xff]  }
 0x20e   :  { %3525 = vmatpush1.bf16.msra.mxu0 %v7070_v27  ;;  %3853 = vmatpush1.bf16.msra.mxu1 %v7073_v28  ;;  %v7160_v27 = vld [vmem:[#allocation9 + $0x820] ss:$16 sps:$4 sm:$0xff]   ;;  %v7163_v28 = vld [vmem:[#allocation9 + $0x828] ss:$16 sps:$4 sm:$0xff]  }
 0x20f   :  { %3526 = vmatprep.subr.bf16.mxu0 %v7078_v29  ;;  %3854 = vmatprep.subr.bf16.mxu1 %v7081_v30  ;;  %v7168_v29 = vld [vmem:[#allocation9 + $0x844] ss:$16 sps:$4 sm:$0xff]   ;;  %v7171_v30 = vld [vmem:[#allocation9 + $0x84c] ss:$16 sps:$4 sm:$0xff]  }
 0x212   :  { %3527 = vmatpush1.bf16.msra.mxu0 %v7076_v31  ;;  %3855 = vmatpush1.bf16.msra.mxu1 %v7079_v32  ;;  %v7166_v31 = vld [vmem:[#allocation9 + $0x840] ss:$16 sps:$4 sm:$0xff]   ;;  %v7169_v32 = vld [vmem:[#allocation9 + $0x848] ss:$16 sps:$4 sm:$0xff]  }
 0x213   :  { %3528 = vmatprep.subr.bf16.mxu0 %v7084_v33  ;;  %3856 = vmatprep.subr.bf16.mxu1 %v7087_v34  ;;  %v7174_v33 = vld [vmem:[#allocation9 + $0x864] ss:$16 sps:$4 sm:$0xff]   ;;  %v7177_v34 = vld [vmem:[#allocation9 + $0x86c] ss:$16 sps:$4 sm:$0xff]  }
 0x216   :  { %3529 = vmatpush1.bf16.msra.mxu0 %v7082_v35  ;;  %3857 = vmatpush1.bf16.msra.mxu1 %v7085_v36  ;;  %v7172_v35 = vld [vmem:[#allocation9 + $0x860] ss:$16 sps:$4 sm:$0xff]   ;;  %v7175_v36 = vld [vmem:[#allocation9 + $0x868] ss:$16 sps:$4 sm:$0xff]  }
 0x217   :  { %3530 = vmatprep.subr.bf16.mxu0 %v7090_v37  ;;  %3858 = vmatprep.subr.bf16.mxu1 %v7093_v38  ;;  %v7180_v37 = vld [vmem:[#allocation9 + $0x884] ss:$16 sps:$4 sm:$0xff]   ;;  %v7183_v38 = vld [vmem:[#allocation9 + $0x88c] ss:$16 sps:$4 sm:$0xff]  }
 0x21a   :  { %3531 = vmatpush1.bf16.msra.mxu0 %v7088_v39  ;;  %3859 = vmatpush1.bf16.msra.mxu1 %v7091_v40  ;;  %v7178_v39 = vld [vmem:[#allocation9 + $0x880] ss:$16 sps:$4 sm:$0xff]   ;;  %v7181_v40 = vld [vmem:[#allocation9 + $0x888] ss:$16 sps:$4 sm:$0xff]  }
 0x21b   :  { %3532 = vmatprep.subr.bf16.mxu0 %v7096_v41  ;;  %3860 = vmatprep.subr.bf16.mxu1 %v7099_v42  ;;  %v7186_v41 = vld [vmem:[#allocation9 + $0x8a4] ss:$16 sps:$4 sm:$0xff]   ;;  %v7189_v42 = vld [vmem:[#allocation9 + $0x8ac] ss:$16 sps:$4 sm:$0xff]  }
 0x21e   :  { %3533 = vmatpush1.bf16.msra.mxu0 %v7094_v43  ;;  %3861 = vmatpush1.bf16.msra.mxu1 %v7097_v44  ;;  %v7184_v43 = vld [vmem:[#allocation9 + $0x8a0] ss:$16 sps:$4 sm:$0xff]   ;;  %v7187_v44 = vld [vmem:[#allocation9 + $0x8a8] ss:$16 sps:$4 sm:$0xff]  }
 0x21f   :  { %3534 = vmatprep.subr.bf16.mxu0 %v7102_v45  ;;  %3862 = vmatprep.subr.bf16.mxu1 %v7105_v46  ;;  %v7192_v45 = vld [vmem:[#allocation9 + $0x8c4] ss:$16 sps:$4 sm:$0xff]   ;;  %v7195_v46 = vld [vmem:[#allocation9 + $0x8cc] ss:$16 sps:$4 sm:$0xff]  }
 0x222   :  { %3535 = vmatpush1.bf16.msra.mxu0 %v7100_v47  ;;  %3863 = vmatpush1.bf16.msra.mxu1 %v7103_v48  ;;  %v7190_v47 = vld [vmem:[#allocation9 + $0x8c0] ss:$16 sps:$4 sm:$0xff]   ;;  %v7193_v48 = vld [vmem:[#allocation9 + $0x8c8] ss:$16 sps:$4 sm:$0xff]  }
 0x223   :  { %3536 = vmatprep.subr.bf16.mxu0 %v7108_v49  ;;  %3864 = vmatprep.subr.bf16.mxu1 %v7111_v50  ;;  %v7198_v49 = vld [vmem:[#allocation9 + $0x8e4] ss:$16 sps:$4 sm:$0xff]   ;;  %v7201_v50 = vld [vmem:[#allocation9 + $0x8ec] ss:$16 sps:$4 sm:$0xff]  }
 0x226   :  { %3537 = vmatpush1.bf16.msra.mxu0 %v7106_v51  ;;  %3865 = vmatpush1.bf16.msra.mxu1 %v7109_v52  ;;  %v7196_v51 = vld [vmem:[#allocation9 + $0x8e0] ss:$16 sps:$4 sm:$0xff]   ;;  %v7199_v52 = vld [vmem:[#allocation9 + $0x8e8] ss:$16 sps:$4 sm:$0xff]  }
 0x227   :  { %3538 = vmatprep.subr.bf16.mxu0 %v7114_v53  ;;  %3866 = vmatprep.subr.bf16.mxu1 %v7117_v54  ;;  %v7204_v53 = vld [vmem:[#allocation9 + $0x904] ss:$16 sps:$4 sm:$0xff]   ;;  %v7207_v54 = vld [vmem:[#allocation9 + $0x90c] ss:$16 sps:$4 sm:$0xff]  }
 0x22a   :  { %3539 = vmatpush1.bf16.msra.mxu0 %v7112_v55  ;;  %3867 = vmatpush1.bf16.msra.mxu1 %v7115_v56  ;;  %v7202_v55 = vld [vmem:[#allocation9 + $0x900] ss:$16 sps:$4 sm:$0xff]   ;;  %v7205_v56 = vld [vmem:[#allocation9 + $0x908] ss:$16 sps:$4 sm:$0xff]  }
 0x22b   :  { %3540 = vmatprep.subr.bf16.mxu0 %v7120_v57  ;;  %3868 = vmatprep.subr.bf16.mxu1 %v7123_v58  ;;  %v7210_v57 = vld [vmem:[#allocation9 + $0x924] ss:$16 sps:$4 sm:$0xff]   ;;  %v7213_v58 = vld [vmem:[#allocation9 + $0x92c] ss:$16 sps:$4 sm:$0xff]  }
 0x22e   :  { %3541 = vmatpush1.bf16.msra.mxu0 %v7118_v59  ;;  %3869 = vmatpush1.bf16.msra.mxu1 %v7121_v60  ;;  %v7208_v59 = vld [vmem:[#allocation9 + $0x920] ss:$16 sps:$4 sm:$0xff]   ;;  %v7211_v60 = vld [vmem:[#allocation9 + $0x928] ss:$16 sps:$4 sm:$0xff]  }
 0x22f   :  { %3542 = vmatprep.subr.bf16.mxu0 %v7126_v61  ;;  %3870 = vmatprep.subr.bf16.mxu1 %v7129_v62  ;;  %v7216_v61 = vld [vmem:[#allocation9 + $0x944] ss:$16 sps:$4 sm:$0xff]   ;;  %v7219_v62 = vld [vmem:[#allocation9 + $0x94c] ss:$16 sps:$4 sm:$0xff]  }
 0x232   :  { %3543 = vmatpush1.bf16.msra.mxu0 %v7124_v63  ;;  %3871 = vmatpush1.bf16.msra.mxu1 %v7127_v0  ;;  %v7214_v63 = vld [vmem:[#allocation9 + $0x940] ss:$16 sps:$4 sm:$0xff]   ;;  %v7217_v0 = vld [vmem:[#allocation9 + $0x948] ss:$16 sps:$4 sm:$0xff]  }
 0x233   :  { %3544 = vmatprep.subr.bf16.mxu0 %v7132_v1  ;;  %3872 = vmatprep.subr.bf16.mxu1 %v7135_v2  ;;  %v7222_v1 = vld [vmem:[#allocation9 + $0x964] ss:$16 sps:$4 sm:$0xff]   ;;  %v7225_v2 = vld [vmem:[#allocation9 + $0x96c] ss:$16 sps:$4 sm:$0xff]  }
 0x236   :  { %3545 = vmatpush1.bf16.msra.mxu0 %v7130_v3  ;;  %3873 = vmatpush1.bf16.msra.mxu1 %v7133_v4  ;;  %v7220_v3 = vld [vmem:[#allocation9 + $0x960] ss:$16 sps:$4 sm:$0xff]   ;;  %v7223_v4 = vld [vmem:[#allocation9 + $0x968] ss:$16 sps:$4 sm:$0xff]  }
 0x237   :  { %3546 = vmatprep.subr.bf16.mxu0 %v7138_v5  ;;  %3874 = vmatprep.subr.bf16.mxu1 %v7141_v6  ;;  %v7228_v5 = vld [vmem:[#allocation9 + $0x984] ss:$16 sps:$4 sm:$0xff]   ;;  %v7231_v6 = vld [vmem:[#allocation9 + $0x98c] ss:$16 sps:$4 sm:$0xff]  }
 0x23a   :  { %3547 = vmatpush1.bf16.msra.mxu0 %v7136_v7  ;;  %3875 = vmatpush1.bf16.msra.mxu1 %v7139_v8  ;;  %v7226_v7 = vld [vmem:[#allocation9 + $0x980] ss:$16 sps:$4 sm:$0xff]   ;;  %v7229_v8 = vld [vmem:[#allocation9 + $0x988] ss:$16 sps:$4 sm:$0xff]  }
 0x23b   :  { %3548 = vmatprep.subr.bf16.mxu0 %v7144_v9  ;;  %3876 = vmatprep.subr.bf16.mxu1 %v7147_v10  ;;  %v7234_v9 = vld [vmem:[#allocation9 + $0x9a4] ss:$16 sps:$4 sm:$0xff]   ;;  %v7237_v10 = vld [vmem:[#allocation9 + $0x9ac] ss:$16 sps:$4 sm:$0xff]  }
 0x23e   :  { %3549 = vmatpush1.bf16.msra.mxu0 %v7142_v11  ;;  %3877 = vmatpush1.bf16.msra.mxu1 %v7145_v12  ;;  %v7232_v11 = vld [vmem:[#allocation9 + $0x9a0] ss:$16 sps:$4 sm:$0xff]   ;;  %v7235_v12 = vld [vmem:[#allocation9 + $0x9a8] ss:$16 sps:$4 sm:$0xff]  }
 0x23f   :  { %3550 = vmatprep.subr.bf16.mxu0 %v7150_v13  ;;  %3878 = vmatprep.subr.bf16.mxu1 %v7153_v14  ;;  %v7240_v13 = vld [vmem:[#allocation9 + $0x9c4] ss:$16 sps:$4 sm:$0xff]   ;;  %v7243_v14 = vld [vmem:[#allocation9 + $0x9cc] ss:$16 sps:$4 sm:$0xff]  }
 0x242   :  { %3551 = vmatpush1.bf16.msra.mxu0 %v7148_v15  ;;  %3879 = vmatpush1.bf16.msra.mxu1 %v7151_v16  ;;  %v7238_v15 = vld [vmem:[#allocation9 + $0x9c0] ss:$16 sps:$4 sm:$0xff]   ;;  %v7241_v16 = vld [vmem:[#allocation9 + $0x9c8] ss:$16 sps:$4 sm:$0xff]  }
 0x243   :  { %3561 = vmatprep.subr.bf16.mxu0 %v7156_v18  ;;  %3889 = vmatprep.subr.bf16.mxu1 %v7159_v19  ;;  %v7249_v18 = vld [vmem:[#allocation9 + $0x9ec] ss:$16 sps:$4 sm:$0xff]   ;;  %v7244_v19 = vld [vmem:[#allocation9 + $0x9e0] ss:$16 sps:$4 sm:$0xff]  }
 0x245   :  { %3553 = vmatmul.mubr.bf16.vlgmr.msra.gmra.mrb[0].mxu0 %v293_v20  ;;  %3881 = vmatmul.mubr.bf16.vlgmr.msra.gmra.mrb[0].mxu1 %v293_v20  ;;  %v7247_v20 = vld [vmem:[#allocation9 + $0x9e8] ss:$16 sps:$4 sm:$0xff]  }
 0x246   :  { %3562 = vmatpush1.bf16.msra.mxu0 %v7154_v22  ;;  %3890 = vmatpush1.bf16.msra.mxu1 %v7157_v23  ;;  %v279_v22 = vld [vmem:[#allocation7 + $0x40] sm:$0xff]  ;;  %v7255_v23 = vld [vmem:[#allocation9 + $0xa0c] ss:$16 sps:$4 sm:$0xff]  }
 0x247   :  { %3563 = vmatprep.subr.bf16.mxu0 %v7162_v24  ;;  %3891 = vmatprep.subr.bf16.mxu1 %v7165_v25  ;;  %v282_v24 = vld [vmem:[#allocation7 + $0x58] sm:$0xff]  ;;  %v295_v25 = vpack.c.bf16 %v279_v22, %v279_v22 }
 0x248   :  { %3593 = vmatprep.mubr.bf16.mxu0 %v296_v26  ;;  %3921 = vmatprep.mubr.bf16.mxu1 %v296_v26  ;;  %v7250_v26 = vld [vmem:[#allocation9 + $0xa00] ss:$16 sps:$4 sm:$0xff]   ;;  %v7345_v22 = vld [vmem:[#allocation9 + $0xbec] ss:$16 sps:$4 sm:$0xff]  }
 0x24a   :  { %3564 = vmatpush1.bf16.msra.mxu0 %v7160_v27  ;;  %3892 = vmatpush1.bf16.msra.mxu1 %v7163_v28  ;;  %v7253_v27 = vld [vmem:[#allocation9 + $0xa08] ss:$16 sps:$4 sm:$0xff]   ;;  %v7258_v28 = vld [vmem:[#allocation9 + $0xa24] ss:$16 sps:$4 sm:$0xff]  }
 0x24b   :  { %3565 = vmatprep.subr.bf16.mxu0 %v7168_v29  ;;  %3893 = vmatprep.subr.bf16.mxu1 %v7171_v30  ;;  %v7261_v29 = vld [vmem:[#allocation9 + $0xa2c] ss:$16 sps:$4 sm:$0xff]   ;;  %v298_v30 = vpack.c.bf16 %v282_v24, %v282_v24  ;;  %v7343_v24 = vld [vmem:[#allocation9 + $0xbe8] ss:$16 sps:$4 sm:$0xff]  }
 0x24e   :  { %3566 = vmatpush1.bf16.msra.mxu0 %v7166_v31  ;;  %3894 = vmatpush1.bf16.msra.mxu1 %v7169_v32  ;;  %v7256_v31 = vld [vmem:[#allocation9 + $0xa20] ss:$16 sps:$4 sm:$0xff]   ;;  %v7259_v32 = vld [vmem:[#allocation9 + $0xa28] ss:$16 sps:$4 sm:$0xff]  }
 0x24f   :  { %3567 = vmatprep.subr.bf16.mxu0 %v7174_v33  ;;  %3895 = vmatprep.subr.bf16.mxu1 %v7177_v34  ;;  %v7264_v33 = vld [vmem:[#allocation9 + $0xa44] ss:$16 sps:$4 sm:$0xff]   ;;  %v7267_v34 = vld [vmem:[#allocation9 + $0xa4c] ss:$16 sps:$4 sm:$0xff]  }
 0x252   :  { %3568 = vmatpush1.bf16.msra.mxu0 %v7172_v35  ;;  %3896 = vmatpush1.bf16.msra.mxu1 %v7175_v36  ;;  %v7262_v35 = vld [vmem:[#allocation9 + $0xa40] ss:$16 sps:$4 sm:$0xff]   ;;  %v7265_v36 = vld [vmem:[#allocation9 + $0xa48] ss:$16 sps:$4 sm:$0xff]  }
 0x253   :  { %3569 = vmatprep.subr.bf16.mxu0 %v7180_v37  ;;  %3897 = vmatprep.subr.bf16.mxu1 %v7183_v38  ;;  %v7270_v37 = vld [vmem:[#allocation9 + $0xa64] ss:$16 sps:$4 sm:$0xff]   ;;  %v7273_v38 = vld [vmem:[#allocation9 + $0xa6c] ss:$16 sps:$4 sm:$0xff]  }
 0x256   :  { %3570 = vmatpush1.bf16.msra.mxu0 %v7178_v39  ;;  %3898 = vmatpush1.bf16.msra.mxu1 %v7181_v40  ;;  %v7268_v39 = vld [vmem:[#allocation9 + $0xa60] ss:$16 sps:$4 sm:$0xff]   ;;  %v7271_v40 = vld [vmem:[#allocation9 + $0xa68] ss:$16 sps:$4 sm:$0xff]  }
 0x257   :  { %3571 = vmatprep.subr.bf16.mxu0 %v7186_v41  ;;  %3899 = vmatprep.subr.bf16.mxu1 %v7189_v42  ;;  %v7276_v41 = vld [vmem:[#allocation9 + $0xa84] ss:$16 sps:$4 sm:$0xff]   ;;  %v7279_v42 = vld [vmem:[#allocation9 + $0xa8c] ss:$16 sps:$4 sm:$0xff]  }
 0x25a   :  { %3572 = vmatpush1.bf16.msra.mxu0 %v7184_v43  ;;  %3900 = vmatpush1.bf16.msra.mxu1 %v7187_v44  ;;  %v7274_v43 = vld [vmem:[#allocation9 + $0xa80] ss:$16 sps:$4 sm:$0xff]   ;;  %v7277_v44 = vld [vmem:[#allocation9 + $0xa88] ss:$16 sps:$4 sm:$0xff]  }
 0x25b   :  { %3573 = vmatprep.subr.bf16.mxu0 %v7192_v45  ;;  %3901 = vmatprep.subr.bf16.mxu1 %v7195_v46  ;;  %v7282_v45 = vld [vmem:[#allocation9 + $0xaa4] ss:$16 sps:$4 sm:$0xff]   ;;  %v7285_v46 = vld [vmem:[#allocation9 + $0xaac] ss:$16 sps:$4 sm:$0xff]  }
 0x25e   :  { %3574 = vmatpush1.bf16.msra.mxu0 %v7190_v47  ;;  %3902 = vmatpush1.bf16.msra.mxu1 %v7193_v48  ;;  %v7280_v47 = vld [vmem:[#allocation9 + $0xaa0] ss:$16 sps:$4 sm:$0xff]   ;;  %v7283_v48 = vld [vmem:[#allocation9 + $0xaa8] ss:$16 sps:$4 sm:$0xff]  }
 0x25f   :  { %3575 = vmatprep.subr.bf16.mxu0 %v7198_v49  ;;  %3903 = vmatprep.subr.bf16.mxu1 %v7201_v50  ;;  %v7288_v49 = vld [vmem:[#allocation9 + $0xac4] ss:$16 sps:$4 sm:$0xff]   ;;  %v7291_v50 = vld [vmem:[#allocation9 + $0xacc] ss:$16 sps:$4 sm:$0xff]  }
 0x262   :  { %3576 = vmatpush1.bf16.msra.mxu0 %v7196_v51  ;;  %3904 = vmatpush1.bf16.msra.mxu1 %v7199_v52  ;;  %v7286_v51 = vld [vmem:[#allocation9 + $0xac0] ss:$16 sps:$4 sm:$0xff]   ;;  %v7289_v52 = vld [vmem:[#allocation9 + $0xac8] ss:$16 sps:$4 sm:$0xff]  }
 0x263   :  { %3577 = vmatprep.subr.bf16.mxu0 %v7204_v53  ;;  %3905 = vmatprep.subr.bf16.mxu1 %v7207_v54  ;;  %v7294_v53 = vld [vmem:[#allocation9 + $0xae4] ss:$16 sps:$4 sm:$0xff]   ;;  %v7297_v54 = vld [vmem:[#allocation9 + $0xaec] ss:$16 sps:$4 sm:$0xff]  }
 0x266   :  { %3578 = vmatpush1.bf16.msra.mxu0 %v7202_v55  ;;  %3906 = vmatpush1.bf16.msra.mxu1 %v7205_v56  ;;  %v7292_v55 = vld [vmem:[#allocation9 + $0xae0] ss:$16 sps:$4 sm:$0xff]   ;;  %v7295_v56 = vld [vmem:[#allocation9 + $0xae8] ss:$16 sps:$4 sm:$0xff]  }
 0x267   :  { %3579 = vmatprep.subr.bf16.mxu0 %v7210_v57  ;;  %3907 = vmatprep.subr.bf16.mxu1 %v7213_v58  ;;  %v7300_v57 = vld [vmem:[#allocation9 + $0xb04] ss:$16 sps:$4 sm:$0xff]   ;;  %v7303_v58 = vld [vmem:[#allocation9 + $0xb0c] ss:$16 sps:$4 sm:$0xff]  }
 0x26a   :  { %3580 = vmatpush1.bf16.msra.mxu0 %v7208_v59  ;;  %3908 = vmatpush1.bf16.msra.mxu1 %v7211_v60  ;;  %v7298_v59 = vld [vmem:[#allocation9 + $0xb00] ss:$16 sps:$4 sm:$0xff]   ;;  %v7301_v60 = vld [vmem:[#allocation9 + $0xb08] ss:$16 sps:$4 sm:$0xff]  }
 0x26b   :  { %3581 = vmatprep.subr.bf16.mxu0 %v7216_v61  ;;  %3909 = vmatprep.subr.bf16.mxu1 %v7219_v62  ;;  %v7306_v61 = vld [vmem:[#allocation9 + $0xb24] ss:$16 sps:$4 sm:$0xff]   ;;  %v7309_v62 = vld [vmem:[#allocation9 + $0xb2c] ss:$16 sps:$4 sm:$0xff]  }
 0x26e   :  { %3582 = vmatpush1.bf16.msra.mxu0 %v7214_v63  ;;  %3910 = vmatpush1.bf16.msra.mxu1 %v7217_v0  ;;  %v7304_v63 = vld [vmem:[#allocation9 + $0xb20] ss:$16 sps:$4 sm:$0xff]   ;;  %v7307_v0 = vld [vmem:[#allocation9 + $0xb28] ss:$16 sps:$4 sm:$0xff]  }
 0x26f   :  { %3583 = vmatprep.subr.bf16.mxu0 %v7222_v1  ;;  %3911 = vmatprep.subr.bf16.mxu1 %v7225_v2  ;;  %v7312_v1 = vld [vmem:[#allocation9 + $0xb44] ss:$16 sps:$4 sm:$0xff]   ;;  %v7315_v2 = vld [vmem:[#allocation9 + $0xb4c] ss:$16 sps:$4 sm:$0xff]  }
 0x272   :  { %3584 = vmatpush1.bf16.msra.mxu0 %v7220_v3  ;;  %3912 = vmatpush1.bf16.msra.mxu1 %v7223_v4  ;;  %v7310_v3 = vld [vmem:[#allocation9 + $0xb40] ss:$16 sps:$4 sm:$0xff]   ;;  %v7313_v4 = vld [vmem:[#allocation9 + $0xb48] ss:$16 sps:$4 sm:$0xff]  }
 0x273   :  { %3585 = vmatprep.subr.bf16.mxu0 %v7228_v5  ;;  %3913 = vmatprep.subr.bf16.mxu1 %v7231_v6  ;;  %v7318_v5 = vld [vmem:[#allocation9 + $0xb64] ss:$16 sps:$4 sm:$0xff]   ;;  %v7321_v6 = vld [vmem:[#allocation9 + $0xb6c] ss:$16 sps:$4 sm:$0xff]  }
 0x276   :  { %3586 = vmatpush1.bf16.msra.mxu0 %v7226_v7  ;;  %3914 = vmatpush1.bf16.msra.mxu1 %v7229_v8  ;;  %v7316_v7 = vld [vmem:[#allocation9 + $0xb60] ss:$16 sps:$4 sm:$0xff]   ;;  %v7319_v8 = vld [vmem:[#allocation9 + $0xb68] ss:$16 sps:$4 sm:$0xff]  }
 0x277   :  { %3587 = vmatprep.subr.bf16.mxu0 %v7234_v9  ;;  %3915 = vmatprep.subr.bf16.mxu1 %v7237_v10  ;;  %v7324_v9 = vld [vmem:[#allocation9 + $0xb84] ss:$16 sps:$4 sm:$0xff]   ;;  %v7327_v10 = vld [vmem:[#allocation9 + $0xb8c] ss:$16 sps:$4 sm:$0xff]  }
 0x27a   :  { %3588 = vmatpush1.bf16.msra.mxu0 %v7232_v11  ;;  %3916 = vmatpush1.bf16.msra.mxu1 %v7235_v12  ;;  %v7322_v11 = vld [vmem:[#allocation9 + $0xb80] ss:$16 sps:$4 sm:$0xff]   ;;  %v7325_v12 = vld [vmem:[#allocation9 + $0xb88] ss:$16 sps:$4 sm:$0xff]  }
 0x27b   :  { %3589 = vmatprep.subr.bf16.mxu0 %v7240_v13  ;;  %3917 = vmatprep.subr.bf16.mxu1 %v7243_v14  ;;  %v7330_v13 = vld [vmem:[#allocation9 + $0xba4] ss:$16 sps:$4 sm:$0xff]   ;;  %v7333_v14 = vld [vmem:[#allocation9 + $0xbac] ss:$16 sps:$4 sm:$0xff]  }
 0x27e   :  { %3590 = vmatpush1.bf16.msra.mxu0 %v7238_v15  ;;  %3918 = vmatpush1.bf16.msra.mxu1 %v7241_v16  ;;  %v7328_v15 = vld [vmem:[#allocation9 + $0xba0] ss:$16 sps:$4 sm:$0xff]   ;;  %v7331_v16 = vld [vmem:[#allocation9 + $0xba8] ss:$16 sps:$4 sm:$0xff]  }
 0x27f   :  { %3591 = vmatprep.subr.bf16.mxu0 %v7246_v17  ;;  %3919 = vmatprep.subr.bf16.mxu1 %v7249_v18  ;;  %v7336_v17 = vld [vmem:[#allocation9 + $0xbc4] ss:$16 sps:$4 sm:$0xff]   ;;  %v7339_v18 = vld [vmem:[#allocation9 + $0xbcc] ss:$16 sps:$4 sm:$0xff]  }
 0x282   :  { %3592 = vmatpush1.bf16.msra.mxu0 %v7244_v19  ;;  %3920 = vmatpush1.bf16.msra.mxu1 %v7247_v20  ;;  %v7334_v19 = vld [vmem:[#allocation9 + $0xbc0] ss:$16 sps:$4 sm:$0xff]   ;;  %v7337_v20 = vld [vmem:[#allocation9 + $0xbc8] ss:$16 sps:$4 sm:$0xff]  }
 0x283   :  { %3602 = vmatprep.subr.bf16.mxu0 %v7252_v21  ;;  %3930 = vmatprep.subr.bf16.mxu1 %v7255_v23  ;;  %v7342_v21 = vld [vmem:[#allocation9 + $0xbe4] ss:$16 sps:$4 sm:$0xff]   ;;  %v7340_v23 = vld [vmem:[#allocation9 + $0xbe0] ss:$16 sps:$4 sm:$0xff]  }
 0x285   :  { %3594 = vmatmul.mubr.bf16.vlgmr.msra.gmra.mrb[0].mxu0 %v295_v25  ;;  %3922 = vmatmul.mubr.bf16.vlgmr.msra.gmra.mrb[0].mxu1 %v295_v25  ;;  %v281_v25 = vld [vmem:[#allocation7 + $0x50] sm:$0xff] }
 0x286   :  { %3603 = vmatpush1.bf16.msra.mxu0 %v7250_v26  ;;  %3931 = vmatpush1.bf16.msra.mxu1 %v7253_v27  ;;  %v7348_v26 = vld [vmem:[#allocation9 + $0xc04] ss:$16 sps:$4 sm:$0xff]   ;;  %v7351_v27 = vld [vmem:[#allocation9 + $0xc0c] ss:$16 sps:$4 sm:$0xff]  }
 0x287   :  { %3604 = vmatprep.subr.bf16.mxu0 %v7258_v28  ;;  %3932 = vmatprep.subr.bf16.mxu1 %v7261_v29  ;;  %v7346_v28 = vld [vmem:[#allocation9 + $0xc00] ss:$16 sps:$4 sm:$0xff]   ;;  %v7349_v29 = vld [vmem:[#allocation9 + $0xc08] ss:$16 sps:$4 sm:$0xff]  }
 0x288   :  { %3634 = vmatprep.mubr.bf16.mxu0 %v298_v30  ;;  %3962 = vmatprep.mubr.bf16.mxu1 %v298_v30  ;;  %v297_v30 = vpack.c.bf16 %v281_v25, %v281_v25  ;;  %v7438_v25 = vld [vmem:[#allocation9 + $0xde4] ss:$16 sps:$4 sm:$0xff]  }
 0x28a   :  { %3605 = vmatpush1.bf16.msra.mxu0 %v7256_v31  ;;  %3933 = vmatpush1.bf16.msra.mxu1 %v7259_v32  ;;  %v7354_v31 = vld [vmem:[#allocation9 + $0xc24] ss:$16 sps:$4 sm:$0xff]   ;;  %v284_v32 = vld [vmem:[#allocation7 + $0x68] sm:$0xff] }
 0x28b   :  { %3606 = vmatprep.subr.bf16.mxu0 %v7264_v33  ;;  %3934 = vmatprep.subr.bf16.mxu1 %v7267_v34  ;;  %v7357_v33 = vld [vmem:[#allocation9 + $0xc2c] ss:$16 sps:$4 sm:$0xff]   ;;  %v300_v34 = vpack.c.bf16 %v284_v32, %v284_v32 }
 0x28e   :  { %3607 = vmatpush1.bf16.msra.mxu0 %v7262_v35  ;;  %3935 = vmatpush1.bf16.msra.mxu1 %v7265_v36  ;;  %v7352_v35 = vld [vmem:[#allocation9 + $0xc20] ss:$16 sps:$4 sm:$0xff]   ;;  %v7355_v36 = vld [vmem:[#allocation9 + $0xc28] ss:$16 sps:$4 sm:$0xff]  }
 0x28f   :  { %3608 = vmatprep.subr.bf16.mxu0 %v7270_v37  ;;  %3936 = vmatprep.subr.bf16.mxu1 %v7273_v38  ;;  %v7360_v37 = vld [vmem:[#allocation9 + $0xc44] ss:$16 sps:$4 sm:$0xff]   ;;  %v7363_v38 = vld [vmem:[#allocation9 + $0xc4c] ss:$16 sps:$4 sm:$0xff]  }
 0x292   :  { %3609 = vmatpush1.bf16.msra.mxu0 %v7268_v39  ;;  %3937 = vmatpush1.bf16.msra.mxu1 %v7271_v40  ;;  %v7358_v39 = vld [vmem:[#allocation9 + $0xc40] ss:$16 sps:$4 sm:$0xff]   ;;  %v7361_v40 = vld [vmem:[#allocation9 + $0xc48] ss:$16 sps:$4 sm:$0xff]  }
 0x293   :  { %3610 = vmatprep.subr.bf16.mxu0 %v7276_v41  ;;  %3938 = vmatprep.subr.bf16.mxu1 %v7279_v42  ;;  %v7366_v41 = vld [vmem:[#allocation9 + $0xc64] ss:$16 sps:$4 sm:$0xff]   ;;  %v7369_v42 = vld [vmem:[#allocation9 + $0xc6c] ss:$16 sps:$4 sm:$0xff]  }
 0x296   :  { %3611 = vmatpush1.bf16.msra.mxu0 %v7274_v43  ;;  %3939 = vmatpush1.bf16.msra.mxu1 %v7277_v44  ;;  %v7364_v43 = vld [vmem:[#allocation9 + $0xc60] ss:$16 sps:$4 sm:$0xff]   ;;  %v7367_v44 = vld [vmem:[#allocation9 + $0xc68] ss:$16 sps:$4 sm:$0xff]  }
 0x297   :  { %3612 = vmatprep.subr.bf16.mxu0 %v7282_v45  ;;  %3940 = vmatprep.subr.bf16.mxu1 %v7285_v46  ;;  %v7372_v45 = vld [vmem:[#allocation9 + $0xc84] ss:$16 sps:$4 sm:$0xff]   ;;  %v7375_v46 = vld [vmem:[#allocation9 + $0xc8c] ss:$16 sps:$4 sm:$0xff]  }
 0x29a   :  { %3613 = vmatpush1.bf16.msra.mxu0 %v7280_v47  ;;  %3941 = vmatpush1.bf16.msra.mxu1 %v7283_v48  ;;  %v7370_v47 = vld [vmem:[#allocation9 + $0xc80] ss:$16 sps:$4 sm:$0xff]   ;;  %v7373_v48 = vld [vmem:[#allocation9 + $0xc88] ss:$16 sps:$4 sm:$0xff]  }
 0x29b   :  { %3614 = vmatprep.subr.bf16.mxu0 %v7288_v49  ;;  %3942 = vmatprep.subr.bf16.mxu1 %v7291_v50  ;;  %v7378_v49 = vld [vmem:[#allocation9 + $0xca4] ss:$16 sps:$4 sm:$0xff]   ;;  %v7381_v50 = vld [vmem:[#allocation9 + $0xcac] ss:$16 sps:$4 sm:$0xff]  }
 0x29e   :  { %3615 = vmatpush1.bf16.msra.mxu0 %v7286_v51  ;;  %3943 = vmatpush1.bf16.msra.mxu1 %v7289_v52  ;;  %v7376_v51 = vld [vmem:[#allocation9 + $0xca0] ss:$16 sps:$4 sm:$0xff]   ;;  %v7379_v52 = vld [vmem:[#allocation9 + $0xca8] ss:$16 sps:$4 sm:$0xff]  }
 0x29f   :  { %3616 = vmatprep.subr.bf16.mxu0 %v7294_v53  ;;  %3944 = vmatprep.subr.bf16.mxu1 %v7297_v54  ;;  %v7384_v53 = vld [vmem:[#allocation9 + $0xcc4] ss:$16 sps:$4 sm:$0xff]   ;;  %v7387_v54 = vld [vmem:[#allocation9 + $0xccc] ss:$16 sps:$4 sm:$0xff]  }
 0x2a2   :  { %3617 = vmatpush1.bf16.msra.mxu0 %v7292_v55  ;;  %3945 = vmatpush1.bf16.msra.mxu1 %v7295_v56  ;;  %v7382_v55 = vld [vmem:[#allocation9 + $0xcc0] ss:$16 sps:$4 sm:$0xff]   ;;  %v7385_v56 = vld [vmem:[#allocation9 + $0xcc8] ss:$16 sps:$4 sm:$0xff]  }
 0x2a3   :  { %3618 = vmatprep.subr.bf16.mxu0 %v7300_v57  ;;  %3946 = vmatprep.subr.bf16.mxu1 %v7303_v58  ;;  %v7390_v57 = vld [vmem:[#allocation9 + $0xce4] ss:$16 sps:$4 sm:$0xff]   ;;  %v7393_v58 = vld [vmem:[#allocation9 + $0xcec] ss:$16 sps:$4 sm:$0xff]  }
 0x2a6   :  { %3619 = vmatpush1.bf16.msra.mxu0 %v7298_v59  ;;  %3947 = vmatpush1.bf16.msra.mxu1 %v7301_v60  ;;  %v7388_v59 = vld [vmem:[#allocation9 + $0xce0] ss:$16 sps:$4 sm:$0xff]   ;;  %v7391_v60 = vld [vmem:[#allocation9 + $0xce8] ss:$16 sps:$4 sm:$0xff]  }
 0x2a7   :  { %3620 = vmatprep.subr.bf16.mxu0 %v7306_v61  ;;  %3948 = vmatprep.subr.bf16.mxu1 %v7309_v62  ;;  %v7396_v61 = vld [vmem:[#allocation9 + $0xd04] ss:$16 sps:$4 sm:$0xff]   ;;  %v7399_v62 = vld [vmem:[#allocation9 + $0xd0c] ss:$16 sps:$4 sm:$0xff]  }
 0x2aa   :  { %3621 = vmatpush1.bf16.msra.mxu0 %v7304_v63  ;;  %3949 = vmatpush1.bf16.msra.mxu1 %v7307_v0  ;;  %v7394_v63 = vld [vmem:[#allocation9 + $0xd00] ss:$16 sps:$4 sm:$0xff]   ;;  %v7397_v0 = vld [vmem:[#allocation9 + $0xd08] ss:$16 sps:$4 sm:$0xff]  }
 0x2ab   :  { %3622 = vmatprep.subr.bf16.mxu0 %v7312_v1  ;;  %3950 = vmatprep.subr.bf16.mxu1 %v7315_v2  ;;  %v7402_v1 = vld [vmem:[#allocation9 + $0xd24] ss:$16 sps:$4 sm:$0xff]   ;;  %v7405_v2 = vld [vmem:[#allocation9 + $0xd2c] ss:$16 sps:$4 sm:$0xff]  }
 0x2ae   :  { %3623 = vmatpush1.bf16.msra.mxu0 %v7310_v3  ;;  %3951 = vmatpush1.bf16.msra.mxu1 %v7313_v4  ;;  %v7400_v3 = vld [vmem:[#allocation9 + $0xd20] ss:$16 sps:$4 sm:$0xff]   ;;  %v7403_v4 = vld [vmem:[#allocation9 + $0xd28] ss:$16 sps:$4 sm:$0xff]  }
 0x2af   :  { %3624 = vmatprep.subr.bf16.mxu0 %v7318_v5  ;;  %3952 = vmatprep.subr.bf16.mxu1 %v7321_v6  ;;  %v7408_v5 = vld [vmem:[#allocation9 + $0xd44] ss:$16 sps:$4 sm:$0xff]   ;;  %v7411_v6 = vld [vmem:[#allocation9 + $0xd4c] ss:$16 sps:$4 sm:$0xff]  }
 0x2b2   :  { %3625 = vmatpush1.bf16.msra.mxu0 %v7316_v7  ;;  %3953 = vmatpush1.bf16.msra.mxu1 %v7319_v8  ;;  %v7406_v7 = vld [vmem:[#allocation9 + $0xd40] ss:$16 sps:$4 sm:$0xff]   ;;  %v7409_v8 = vld [vmem:[#allocation9 + $0xd48] ss:$16 sps:$4 sm:$0xff]  }
 0x2b3   :  { %3626 = vmatprep.subr.bf16.mxu0 %v7324_v9  ;;  %3954 = vmatprep.subr.bf16.mxu1 %v7327_v10  ;;  %v7414_v9 = vld [vmem:[#allocation9 + $0xd64] ss:$16 sps:$4 sm:$0xff]   ;;  %v7417_v10 = vld [vmem:[#allocation9 + $0xd6c] ss:$16 sps:$4 sm:$0xff]  }
 0x2b6   :  { %3627 = vmatpush1.bf16.msra.mxu0 %v7322_v11  ;;  %3955 = vmatpush1.bf16.msra.mxu1 %v7325_v12  ;;  %v7412_v11 = vld [vmem:[#allocation9 + $0xd60] ss:$16 sps:$4 sm:$0xff]   ;;  %v7415_v12 = vld [vmem:[#allocation9 + $0xd68] ss:$16 sps:$4 sm:$0xff]  }
 0x2b7   :  { %3628 = vmatprep.subr.bf16.mxu0 %v7330_v13  ;;  %3956 = vmatprep.subr.bf16.mxu1 %v7333_v14  ;;  %v7420_v13 = vld [vmem:[#allocation9 + $0xd84] ss:$16 sps:$4 sm:$0xff]   ;;  %v7423_v14 = vld [vmem:[#allocation9 + $0xd8c] ss:$16 sps:$4 sm:$0xff]  }
 0x2ba   :  { %3629 = vmatpush1.bf16.msra.mxu0 %v7328_v15  ;;  %3957 = vmatpush1.bf16.msra.mxu1 %v7331_v16  ;;  %v7418_v15 = vld [vmem:[#allocation9 + $0xd80] ss:$16 sps:$4 sm:$0xff]   ;;  %v7421_v16 = vld [vmem:[#allocation9 + $0xd88] ss:$16 sps:$4 sm:$0xff]  }
 0x2bb   :  { %3630 = vmatprep.subr.bf16.mxu0 %v7336_v17  ;;  %3958 = vmatprep.subr.bf16.mxu1 %v7339_v18  ;;  %v7426_v17 = vld [vmem:[#allocation9 + $0xda4] ss:$16 sps:$4 sm:$0xff]   ;;  %v7429_v18 = vld [vmem:[#allocation9 + $0xdac] ss:$16 sps:$4 sm:$0xff]  }
 0x2be   :  { %3631 = vmatpush1.bf16.msra.mxu0 %v7334_v19  ;;  %3959 = vmatpush1.bf16.msra.mxu1 %v7337_v20  ;;  %v7424_v19 = vld [vmem:[#allocation9 + $0xda0] ss:$16 sps:$4 sm:$0xff]   ;;  %v7427_v20 = vld [vmem:[#allocation9 + $0xda8] ss:$16 sps:$4 sm:$0xff]  }
 0x2bf   :  { %3632 = vmatprep.subr.bf16.mxu0 %v7342_v21  ;;  %3960 = vmatprep.subr.bf16.mxu1 %v7345_v22  ;;  %v7432_v21 = vld [vmem:[#allocation9 + $0xdc4] ss:$16 sps:$4 sm:$0xff]   ;;  %v7435_v22 = vld [vmem:[#allocation9 + $0xdcc] ss:$16 sps:$4 sm:$0xff]  }
 0x2c2   :  { %3633 = vmatpush1.bf16.msra.mxu0 %v7340_v23  ;;  %3961 = vmatpush1.bf16.msra.mxu1 %v7343_v24  ;;  %v7430_v23 = vld [vmem:[#allocation9 + $0xdc0] ss:$16 sps:$4 sm:$0xff]   ;;  %v7433_v24 = vld [vmem:[#allocation9 + $0xdc8] ss:$16 sps:$4 sm:$0xff]  }
 0x2c3   :  { %3643 = vmatprep.subr.bf16.mxu0 %v7348_v26  ;;  %3971 = vmatprep.subr.bf16.mxu1 %v7351_v27  ;;  %v7441_v26 = vld [vmem:[#allocation9 + $0xdec] ss:$16 sps:$4 sm:$0xff]   ;;  %v7436_v27 = vld [vmem:[#allocation9 + $0xde0] ss:$16 sps:$4 sm:$0xff]  }
 0x2c5   :  { %3635 = vmatmul.mubr.bf16.vlgmr.msra.gmra.mrb[0].mxu0 %v297_v30  ;;  %3963 = vmatmul.mubr.bf16.vlgmr.msra.gmra.mrb[0].mxu1 %v297_v30  ;;  %v7444_v30 = vld [vmem:[#allocation9 + $0xe04] ss:$16 sps:$4 sm:$0xff]  }
 0x2c6   :  { %3644 = vmatpush1.bf16.msra.mxu0 %v7346_v28  ;;  %3972 = vmatpush1.bf16.msra.mxu1 %v7349_v29  ;;  %v7439_v28 = vld [vmem:[#allocation9 + $0xde8] ss:$16 sps:$4 sm:$0xff]   ;;  %v283_v29 = vld [vmem:[#allocation7 + $0x60] sm:$0xff] }
 0x2c7   :  { %3645 = vmatprep.subr.bf16.mxu0 %v7354_v31  ;;  %3973 = vmatprep.subr.bf16.mxu1 %v7357_v33  ;;  %v7447_v31 = vld [vmem:[#allocation9 + $0xe0c] ss:$16 sps:$4 sm:$0xff]   ;;  %v299_v32 = vpack.c.bf16 %v283_v29, %v283_v29  ;;  %v7534_v29 = vld [vmem:[#allocation9 + $0xfe4] ss:$16 sps:$4 sm:$0xff]  }
 0x2c8   :  { %3675 = vmatprep.mubr.bf16.mxu0 %v300_v34  ;;  %4003 = vmatprep.mubr.bf16.mxu1 %v300_v34  ;;  %v286_v33 = vld [vmem:[#allocation7 + $0x78] sm:$0xff]  ;;  %v7442_v34 = vld [vmem:[#allocation9 + $0xe00] ss:$16 sps:$4 sm:$0xff]  }
 0x2ca   :  { %3646 = vmatpush1.bf16.msra.mxu0 %v7352_v35  ;;  %3974 = vmatpush1.bf16.msra.mxu1 %v7355_v36  ;;  %v7445_v35 = vld [vmem:[#allocation9 + $0xe08] ss:$16 sps:$4 sm:$0xff]   ;;  %v7450_v36 = vld [vmem:[#allocation9 + $0xe24] ss:$16 sps:$4 sm:$0xff]  }
 0x2cb   :  { %3647 = vmatprep.subr.bf16.mxu0 %v7360_v37  ;;  %3975 = vmatprep.subr.bf16.mxu1 %v7363_v38  ;;  %v7453_v37 = vld [vmem:[#allocation9 + $0xe2c] ss:$16 sps:$4 sm:$0xff]   ;;  %v302_v38 = vpack.c.bf16 %v286_v33, %v286_v33  ;;  %v285_v33 = vld [vmem:[#allocation7 + $0x70] sm:$0xff] }
 0x2ce   :  { %3648 = vmatpush1.bf16.msra.mxu0 %v7358_v39  ;;  %3976 = vmatpush1.bf16.msra.mxu1 %v7361_v40  ;;  %v7448_v39 = vld [vmem:[#allocation9 + $0xe20] ss:$16 sps:$4 sm:$0xff]   ;;  %v7451_v40 = vld [vmem:[#allocation9 + $0xe28] ss:$16 sps:$4 sm:$0xff]  }
 0x2cf   :  { %3649 = vmatprep.subr.bf16.mxu0 %v7366_v41  ;;  %3977 = vmatprep.subr.bf16.mxu1 %v7369_v42  ;;  %v7456_v41 = vld [vmem:[#allocation9 + $0xe44] ss:$16 sps:$4 sm:$0xff]   ;;  %v7459_v42 = vld [vmem:[#allocation9 + $0xe4c] ss:$16 sps:$4 sm:$0xff]  }
 0x2d2   :  { %3650 = vmatpush1.bf16.msra.mxu0 %v7364_v43  ;;  %3978 = vmatpush1.bf16.msra.mxu1 %v7367_v44  ;;  %v7454_v43 = vld [vmem:[#allocation9 + $0xe40] ss:$16 sps:$4 sm:$0xff]   ;;  %v7457_v44 = vld [vmem:[#allocation9 + $0xe48] ss:$16 sps:$4 sm:$0xff]  }
 0x2d3   :  { %3651 = vmatprep.subr.bf16.mxu0 %v7372_v45  ;;  %3979 = vmatprep.subr.bf16.mxu1 %v7375_v46  ;;  %v7462_v45 = vld [vmem:[#allocation9 + $0xe64] ss:$16 sps:$4 sm:$0xff]   ;;  %v7465_v46 = vld [vmem:[#allocation9 + $0xe6c] ss:$16 sps:$4 sm:$0xff]  }
 0x2d6   :  { %3652 = vmatpush1.bf16.msra.mxu0 %v7370_v47  ;;  %3980 = vmatpush1.bf16.msra.mxu1 %v7373_v48  ;;  %v7460_v47 = vld [vmem:[#allocation9 + $0xe60] ss:$16 sps:$4 sm:$0xff]   ;;  %v7463_v48 = vld [vmem:[#allocation9 + $0xe68] ss:$16 sps:$4 sm:$0xff]  }
 0x2d7   :  { %3653 = vmatprep.subr.bf16.mxu0 %v7378_v49  ;;  %3981 = vmatprep.subr.bf16.mxu1 %v7381_v50  ;;  %v7468_v49 = vld [vmem:[#allocation9 + $0xe84] ss:$16 sps:$4 sm:$0xff]   ;;  %v7471_v50 = vld [vmem:[#allocation9 + $0xe8c] ss:$16 sps:$4 sm:$0xff]  }
 0x2da   :  { %3654 = vmatpush1.bf16.msra.mxu0 %v7376_v51  ;;  %3982 = vmatpush1.bf16.msra.mxu1 %v7379_v52  ;;  %v7466_v51 = vld [vmem:[#allocation9 + $0xe80] ss:$16 sps:$4 sm:$0xff]   ;;  %v7469_v52 = vld [vmem:[#allocation9 + $0xe88] ss:$16 sps:$4 sm:$0xff]  }
 0x2db   :  { %3655 = vmatprep.subr.bf16.mxu0 %v7384_v53  ;;  %3983 = vmatprep.subr.bf16.mxu1 %v7387_v54  ;;  %v7474_v53 = vld [vmem:[#allocation9 + $0xea4] ss:$16 sps:$4 sm:$0xff]   ;;  %v7477_v54 = vld [vmem:[#allocation9 + $0xeac] ss:$16 sps:$4 sm:$0xff]  }
 0x2de   :  { %3656 = vmatpush1.bf16.msra.mxu0 %v7382_v55  ;;  %3984 = vmatpush1.bf16.msra.mxu1 %v7385_v56  ;;  %v7472_v55 = vld [vmem:[#allocation9 + $0xea0] ss:$16 sps:$4 sm:$0xff]   ;;  %v7475_v56 = vld [vmem:[#allocation9 + $0xea8] ss:$16 sps:$4 sm:$0xff]  }
 0x2df   :  { %3657 = vmatprep.subr.bf16.mxu0 %v7390_v57  ;;  %3985 = vmatprep.subr.bf16.mxu1 %v7393_v58  ;;  %v7480_v57 = vld [vmem:[#allocation9 + $0xec4] ss:$16 sps:$4 sm:$0xff]   ;;  %v7483_v58 = vld [vmem:[#allocation9 + $0xecc] ss:$16 sps:$4 sm:$0xff]  }
 0x2e2   :  { %3658 = vmatpush1.bf16.msra.mxu0 %v7388_v59  ;;  %3986 = vmatpush1.bf16.msra.mxu1 %v7391_v60  ;;  %v7478_v59 = vld [vmem:[#allocation9 + $0xec0] ss:$16 sps:$4 sm:$0xff]   ;;  %v7481_v60 = vld [vmem:[#allocation9 + $0xec8] ss:$16 sps:$4 sm:$0xff]  }
 0x2e3   :  { %3659 = vmatprep.subr.bf16.mxu0 %v7396_v61  ;;  %3987 = vmatprep.subr.bf16.mxu1 %v7399_v62  ;;  %v7486_v61 = vld [vmem:[#allocation9 + $0xee4] ss:$16 sps:$4 sm:$0xff]   ;;  %v7489_v62 = vld [vmem:[#allocation9 + $0xeec] ss:$16 sps:$4 sm:$0xff]  }
 0x2e6   :  { %3660 = vmatpush1.bf16.msra.mxu0 %v7394_v63  ;;  %3988 = vmatpush1.bf16.msra.mxu1 %v7397_v0  ;;  %v7484_v63 = vld [vmem:[#allocation9 + $0xee0] ss:$16 sps:$4 sm:$0xff]   ;;  %v7487_v0 = vld [vmem:[#allocation9 + $0xee8] ss:$16 sps:$4 sm:$0xff]  }
 0x2e7   :  { %3661 = vmatprep.subr.bf16.mxu0 %v7402_v1  ;;  %3989 = vmatprep.subr.bf16.mxu1 %v7405_v2  ;;  %v7492_v1 = vld [vmem:[#allocation9 + $0xf04] ss:$16 sps:$4 sm:$0xff]   ;;  %v7495_v2 = vld [vmem:[#allocation9 + $0xf0c] ss:$16 sps:$4 sm:$0xff]  }
 0x2ea   :  { %3662 = vmatpush1.bf16.msra.mxu0 %v7400_v3  ;;  %3990 = vmatpush1.bf16.msra.mxu1 %v7403_v4  ;;  %v7490_v3 = vld [vmem:[#allocation9 + $0xf00] ss:$16 sps:$4 sm:$0xff]   ;;  %v7493_v4 = vld [vmem:[#allocation9 + $0xf08] ss:$16 sps:$4 sm:$0xff]  }
 0x2eb   :  { %3663 = vmatprep.subr.bf16.mxu0 %v7408_v5  ;;  %3991 = vmatprep.subr.bf16.mxu1 %v7411_v6  ;;  %v7498_v5 = vld [vmem:[#allocation9 + $0xf24] ss:$16 sps:$4 sm:$0xff]   ;;  %v7501_v6 = vld [vmem:[#allocation9 + $0xf2c] ss:$16 sps:$4 sm:$0xff]  }
 0x2ee   :  { %3664 = vmatpush1.bf16.msra.mxu0 %v7406_v7  ;;  %3992 = vmatpush1.bf16.msra.mxu1 %v7409_v8  ;;  %v7496_v7 = vld [vmem:[#allocation9 + $0xf20] ss:$16 sps:$4 sm:$0xff]   ;;  %v7499_v8 = vld [vmem:[#allocation9 + $0xf28] ss:$16 sps:$4 sm:$0xff]  }
 0x2ef   :  { %3665 = vmatprep.subr.bf16.mxu0 %v7414_v9  ;;  %3993 = vmatprep.subr.bf16.mxu1 %v7417_v10  ;;  %v7504_v9 = vld [vmem:[#allocation9 + $0xf44] ss:$16 sps:$4 sm:$0xff]   ;;  %v7507_v10 = vld [vmem:[#allocation9 + $0xf4c] ss:$16 sps:$4 sm:$0xff]  }
 0x2f2   :  { %3666 = vmatpush1.bf16.msra.mxu0 %v7412_v11  ;;  %3994 = vmatpush1.bf16.msra.mxu1 %v7415_v12  ;;  %v7502_v11 = vld [vmem:[#allocation9 + $0xf40] ss:$16 sps:$4 sm:$0xff]   ;;  %v7505_v12 = vld [vmem:[#allocation9 + $0xf48] ss:$16 sps:$4 sm:$0xff]  }
 0x2f3   :  { %3667 = vmatprep.subr.bf16.mxu0 %v7420_v13  ;;  %3995 = vmatprep.subr.bf16.mxu1 %v7423_v14  ;;  %v7510_v13 = vld [vmem:[#allocation9 + $0xf64] ss:$16 sps:$4 sm:$0xff]   ;;  %v7513_v14 = vld [vmem:[#allocation9 + $0xf6c] ss:$16 sps:$4 sm:$0xff]  }
 0x2f6   :  { %3668 = vmatpush1.bf16.msra.mxu0 %v7418_v15  ;;  %3996 = vmatpush1.bf16.msra.mxu1 %v7421_v16  ;;  %v7508_v15 = vld [vmem:[#allocation9 + $0xf60] ss:$16 sps:$4 sm:$0xff]   ;;  %v7511_v16 = vld [vmem:[#allocation9 + $0xf68] ss:$16 sps:$4 sm:$0xff]  }
 0x2f7   :  { %3669 = vmatprep.subr.bf16.mxu0 %v7426_v17  ;;  %3997 = vmatprep.subr.bf16.mxu1 %v7429_v18  ;;  %v7516_v17 = vld [vmem:[#allocation9 + $0xf84] ss:$16 sps:$4 sm:$0xff]   ;;  %v7519_v18 = vld [vmem:[#allocation9 + $0xf8c] ss:$16 sps:$4 sm:$0xff]  }
 0x2fa   :  { %3670 = vmatpush1.bf16.msra.mxu0 %v7424_v19  ;;  %3998 = vmatpush1.bf16.msra.mxu1 %v7427_v20  ;;  %v7514_v19 = vld [vmem:[#allocation9 + $0xf80] ss:$16 sps:$4 sm:$0xff]   ;;  %v7517_v20 = vld [vmem:[#allocation9 + $0xf88] ss:$16 sps:$4 sm:$0xff]  }
 0x2fb   :  { %3671 = vmatprep.subr.bf16.mxu0 %v7432_v21  ;;  %3999 = vmatprep.subr.bf16.mxu1 %v7435_v22  ;;  %v7522_v21 = vld [vmem:[#allocation9 + $0xfa4] ss:$16 sps:$4 sm:$0xff]   ;;  %v7525_v22 = vld [vmem:[#allocation9 + $0xfac] ss:$16 sps:$4 sm:$0xff]  }
 0x2fe   :  { %3672 = vmatpush1.bf16.msra.mxu0 %v7430_v23  ;;  %4000 = vmatpush1.bf16.msra.mxu1 %v7433_v24  ;;  %v7520_v23 = vld [vmem:[#allocation9 + $0xfa0] ss:$16 sps:$4 sm:$0xff]   ;;  %v7523_v24 = vld [vmem:[#allocation9 + $0xfa8] ss:$16 sps:$4 sm:$0xff]  }
 0x2ff   :  { %3673 = vmatprep.subr.bf16.mxu0 %v7438_v25  ;;  %4001 = vmatprep.subr.bf16.mxu1 %v7441_v26  ;;  %v7528_v25 = vld [vmem:[#allocation9 + $0xfc4] ss:$16 sps:$4 sm:$0xff]   ;;  %v7531_v26 = vld [vmem:[#allocation9 + $0xfcc] ss:$16 sps:$4 sm:$0xff]  }
 0x302   :  { %3674 = vmatpush1.bf16.msra.mxu0 %v7436_v27  ;;  %4002 = vmatpush1.bf16.msra.mxu1 %v7439_v28  ;;  %v7526_v27 = vld [vmem:[#allocation9 + $0xfc0] ss:$16 sps:$4 sm:$0xff]   ;;  %v7529_v28 = vld [vmem:[#allocation9 + $0xfc8] ss:$16 sps:$4 sm:$0xff]  }
 0x303   :  { %3684 = vmatprep.subr.bf16.mxu0 %v7444_v30  ;;  %4012 = vmatprep.subr.bf16.mxu1 %v7447_v31  ;;  %v7537_v30 = vld [vmem:[#allocation9 + $0xfec] ss:$16 sps:$4 sm:$0xff]   ;;  %v7532_v31 = vld [vmem:[#allocation9 + $0xfe0] ss:$16 sps:$4 sm:$0xff]  }
 0x305   :  { %3676 = vmatmul.mubr.bf16.vlgmr.msra.gmra.mrb[0].mxu0 %v299_v32  ;;  %4004 = vmatmul.mubr.bf16.vlgmr.msra.gmra.mrb[0].mxu1 %v299_v32  ;;  %v7535_v32 = vld [vmem:[#allocation9 + $0xfe8] ss:$16 sps:$4 sm:$0xff]  }
 0x306   :  { %3685 = vmatpush1.bf16.msra.mxu0 %v7442_v34  ;;  %4013 = vmatpush1.bf16.msra.mxu1 %v7445_v35  ;;  %v7540_v34 = vld [vmem:[#allocation13 + $0x4] ss:$8 sps:$4 sm:$0xff]  }
 0x307   :  { %3686 = vmatprep.subr.bf16.mxu0 %v7450_v36  ;;  %4014 = vmatprep.subr.bf16.mxu1 %v7453_v37  ;;  %v7543_v35 = vld [vmem:[#allocation16 + $0x4] ss:$8 sps:$4 sm:$0xff]   ;;  %v301_v36 = vpack.c.bf16 %v285_v33, %v285_v33 }
 0x308   :  { %3716 = vmatprep.mubr.bf16.mxu0 %v302_v38  ;;  %4044 = vmatprep.mubr.bf16.mxu1 %v302_v38  ;;  %v7538_v37 = vld [vmem:[#allocation13] ss:$8 sps:$4 sm:$0xff]   ;;  %v7628_v33 = vld [vmem:[#allocation13 + $0xf0] ss:$8 sps:$4 sm:$0xff]  }
 0x309   :  { %v7541_v38 = vld [vmem:[#allocation16] ss:$8 sps:$4 sm:$0xff]  }
 0x30a   :  { %3687 = vmatpush1.bf16.msra.mxu0 %v7448_v39  ;;  %4015 = vmatpush1.bf16.msra.mxu1 %v7451_v40  ;;  %v7546_v39 = vld [vmem:[#allocation13 + $0x14] ss:$8 sps:$4 sm:$0xff]  }
 0x30b   :  { %3688 = vmatprep.subr.bf16.mxu0 %v7456_v41  ;;  %4016 = vmatprep.subr.bf16.mxu1 %v7459_v42  ;;  %v7549_v40 = vld [vmem:[#allocation16 + $0x14] ss:$8 sps:$4 sm:$0xff]   ;;  %v7547_v42 = vld [vmem:[#allocation16 + $0x10] ss:$8 sps:$4 sm:$0xff]  }
 0x30c   :  { %v7544_v41 = vld [vmem:[#allocation13 + $0x10] ss:$8 sps:$4 sm:$0xff]  }
 0x30e   :  { %3689 = vmatpush1.bf16.msra.mxu0 %v7454_v43  ;;  %4017 = vmatpush1.bf16.msra.mxu1 %v7457_v44  ;;  %v7552_v43 = vld [vmem:[#allocation13 + $0x24] ss:$8 sps:$4 sm:$0xff]  }
 0x30f   :  { %3690 = vmatprep.subr.bf16.mxu0 %v7462_v45  ;;  %4018 = vmatprep.subr.bf16.mxu1 %v7465_v46  ;;  %v7555_v44 = vld [vmem:[#allocation16 + $0x24] ss:$8 sps:$4 sm:$0xff]   ;;  %v7553_v46 = vld [vmem:[#allocation16 + $0x20] ss:$8 sps:$4 sm:$0xff]  }
 0x310   :  { %v7550_v45 = vld [vmem:[#allocation13 + $0x20] ss:$8 sps:$4 sm:$0xff]  }
 0x312   :  { %3691 = vmatpush1.bf16.msra.mxu0 %v7460_v47  ;;  %4019 = vmatpush1.bf16.msra.mxu1 %v7463_v48  ;;  %v7558_v47 = vld [vmem:[#allocation13 + $0x34] ss:$8 sps:$4 sm:$0xff]  }
 0x313   :  { %3692 = vmatprep.subr.bf16.mxu0 %v7468_v49  ;;  %4020 = vmatprep.subr.bf16.mxu1 %v7471_v50  ;;  %v7561_v48 = vld [vmem:[#allocation16 + $0x34] ss:$8 sps:$4 sm:$0xff]   ;;  %v7559_v50 = vld [vmem:[#allocation16 + $0x30] ss:$8 sps:$4 sm:$0xff]  }
 0x314   :  { %v7556_v49 = vld [vmem:[#allocation13 + $0x30] ss:$8 sps:$4 sm:$0xff]  }
 0x316   :  { %3693 = vmatpush1.bf16.msra.mxu0 %v7466_v51  ;;  %4021 = vmatpush1.bf16.msra.mxu1 %v7469_v52  ;;  %v7564_v51 = vld [vmem:[#allocation13 + $0x44] ss:$8 sps:$4 sm:$0xff]  }
 0x317   :  { %3694 = vmatprep.subr.bf16.mxu0 %v7474_v53  ;;  %4022 = vmatprep.subr.bf16.mxu1 %v7477_v54  ;;  %v7567_v52 = vld [vmem:[#allocation16 + $0x44] ss:$8 sps:$4 sm:$0xff]   ;;  %v7565_v54 = vld [vmem:[#allocation16 + $0x40] ss:$8 sps:$4 sm:$0xff]  }
 0x318   :  { %v7562_v53 = vld [vmem:[#allocation13 + $0x40] ss:$8 sps:$4 sm:$0xff]  }
 0x31a   :  { %3695 = vmatpush1.bf16.msra.mxu0 %v7472_v55  ;;  %4023 = vmatpush1.bf16.msra.mxu1 %v7475_v56  ;;  %v7570_v55 = vld [vmem:[#allocation13 + $0x54] ss:$8 sps:$4 sm:$0xff]  }
 0x31b   :  { %3696 = vmatprep.subr.bf16.mxu0 %v7480_v57  ;;  %4024 = vmatprep.subr.bf16.mxu1 %v7483_v58  ;;  %v7573_v56 = vld [vmem:[#allocation16 + $0x54] ss:$8 sps:$4 sm:$0xff]   ;;  %v7571_v58 = vld [vmem:[#allocation16 + $0x50] ss:$8 sps:$4 sm:$0xff]  }
 0x31c   :  { %v7568_v57 = vld [vmem:[#allocation13 + $0x50] ss:$8 sps:$4 sm:$0xff]  }
 0x31e   :  { %3697 = vmatpush1.bf16.msra.mxu0 %v7478_v59  ;;  %4025 = vmatpush1.bf16.msra.mxu1 %v7481_v60  ;;  %v7576_v59 = vld [vmem:[#allocation13 + $0x64] ss:$8 sps:$4 sm:$0xff]  }
 0x31f   :  { %3698 = vmatprep.subr.bf16.mxu0 %v7486_v61  ;;  %4026 = vmatprep.subr.bf16.mxu1 %v7489_v62  ;;  %v7579_v60 = vld [vmem:[#allocation16 + $0x64] ss:$8 sps:$4 sm:$0xff]   ;;  %v7577_v62 = vld [vmem:[#allocation16 + $0x60] ss:$8 sps:$4 sm:$0xff]  }
 0x320   :  { %v7574_v61 = vld [vmem:[#allocation13 + $0x60] ss:$8 sps:$4 sm:$0xff]  }
 0x322   :  { %3699 = vmatpush1.bf16.msra.mxu0 %v7484_v63  ;;  %4027 = vmatpush1.bf16.msra.mxu1 %v7487_v0  ;;  %v7582_v63 = vld [vmem:[#allocation13 + $0x74] ss:$8 sps:$4 sm:$0xff]  }
 0x323   :  { %3700 = vmatprep.subr.bf16.mxu0 %v7492_v1  ;;  %4028 = vmatprep.subr.bf16.mxu1 %v7495_v2  ;;  %v7585_v0 = vld [vmem:[#allocation16 + $0x74] ss:$8 sps:$4 sm:$0xff]   ;;  %v7583_v2 = vld [vmem:[#allocation16 + $0x70] ss:$8 sps:$4 sm:$0xff]  }
 0x324   :  { %v7580_v1 = vld [vmem:[#allocation13 + $0x70] ss:$8 sps:$4 sm:$0xff]  }
 0x326   :  { %3701 = vmatpush1.bf16.msra.mxu0 %v7490_v3  ;;  %4029 = vmatpush1.bf16.msra.mxu1 %v7493_v4  ;;  %v7588_v3 = vld [vmem:[#allocation13 + $0x84] ss:$8 sps:$4 sm:$0xff]  }
 0x327   :  { %3702 = vmatprep.subr.bf16.mxu0 %v7498_v5  ;;  %4030 = vmatprep.subr.bf16.mxu1 %v7501_v6  ;;  %v7591_v4 = vld [vmem:[#allocation16 + $0x84] ss:$8 sps:$4 sm:$0xff]   ;;  %v7589_v6 = vld [vmem:[#allocation16 + $0x80] ss:$8 sps:$4 sm:$0xff]  }
 0x328   :  { %v7586_v5 = vld [vmem:[#allocation13 + $0x80] ss:$8 sps:$4 sm:$0xff]  }
 0x32a   :  { %3703 = vmatpush1.bf16.msra.mxu0 %v7496_v7  ;;  %4031 = vmatpush1.bf16.msra.mxu1 %v7499_v8  ;;  %v7594_v7 = vld [vmem:[#allocation13 + $0x94] ss:$8 sps:$4 sm:$0xff]  }
 0x32b   :  { %3704 = vmatprep.subr.bf16.mxu0 %v7504_v9  ;;  %4032 = vmatprep.subr.bf16.mxu1 %v7507_v10  ;;  %v7597_v8 = vld [vmem:[#allocation16 + $0x94] ss:$8 sps:$4 sm:$0xff]   ;;  %v7595_v10 = vld [vmem:[#allocation16 + $0x90] ss:$8 sps:$4 sm:$0xff]  }
 0x32c   :  { %v7592_v9 = vld [vmem:[#allocation13 + $0x90] ss:$8 sps:$4 sm:$0xff]  }
 0x32e   :  { %3705 = vmatpush1.bf16.msra.mxu0 %v7502_v11  ;;  %4033 = vmatpush1.bf16.msra.mxu1 %v7505_v12  ;;  %v7600_v11 = vld [vmem:[#allocation13 + $0xa4] ss:$8 sps:$4 sm:$0xff]  }
 0x32f   :  { %3706 = vmatprep.subr.bf16.mxu0 %v7510_v13  ;;  %4034 = vmatprep.subr.bf16.mxu1 %v7513_v14  ;;  %v7603_v12 = vld [vmem:[#allocation16 + $0xa4] ss:$8 sps:$4 sm:$0xff]   ;;  %v7601_v14 = vld [vmem:[#allocation16 + $0xa0] ss:$8 sps:$4 sm:$0xff]  }
 0x330   :  { %v7598_v13 = vld [vmem:[#allocation13 + $0xa0] ss:$8 sps:$4 sm:$0xff]  }
 0x332   :  { %3707 = vmatpush1.bf16.msra.mxu0 %v7508_v15  ;;  %4035 = vmatpush1.bf16.msra.mxu1 %v7511_v16  ;;  %v7606_v15 = vld [vmem:[#allocation13 + $0xb4] ss:$8 sps:$4 sm:$0xff]  }
 0x333   :  { %3708 = vmatprep.subr.bf16.mxu0 %v7516_v17  ;;  %4036 = vmatprep.subr.bf16.mxu1 %v7519_v18  ;;  %v7609_v16 = vld [vmem:[#allocation16 + $0xb4] ss:$8 sps:$4 sm:$0xff]   ;;  %v7607_v18 = vld [vmem:[#allocation16 + $0xb0] ss:$8 sps:$4 sm:$0xff]  }
 0x334   :  { %v7604_v17 = vld [vmem:[#allocation13 + $0xb0] ss:$8 sps:$4 sm:$0xff]  }
 0x336   :  { %3709 = vmatpush1.bf16.msra.mxu0 %v7514_v19  ;;  %4037 = vmatpush1.bf16.msra.mxu1 %v7517_v20  ;;  %v7612_v19 = vld [vmem:[#allocation13 + $0xc4] ss:$8 sps:$4 sm:$0xff]  }
 0x337   :  { %3710 = vmatprep.subr.bf16.mxu0 %v7522_v21  ;;  %4038 = vmatprep.subr.bf16.mxu1 %v7525_v22  ;;  %v7615_v20 = vld [vmem:[#allocation16 + $0xc4] ss:$8 sps:$4 sm:$0xff]   ;;  %v7613_v22 = vld [vmem:[#allocation16 + $0xc0] ss:$8 sps:$4 sm:$0xff]  }
 0x338   :  { %v7610_v21 = vld [vmem:[#allocation13 + $0xc0] ss:$8 sps:$4 sm:$0xff]  }
 0x33a   :  { %3711 = vmatpush1.bf16.msra.mxu0 %v7520_v23  ;;  %4039 = vmatpush1.bf16.msra.mxu1 %v7523_v24  ;;  %v7618_v23 = vld [vmem:[#allocation13 + $0xd4] ss:$8 sps:$4 sm:$0xff]  }
 0x33b   :  { %3712 = vmatprep.subr.bf16.mxu0 %v7528_v25  ;;  %4040 = vmatprep.subr.bf16.mxu1 %v7531_v26  ;;  %v7621_v24 = vld [vmem:[#allocation16 + $0xd4] ss:$8 sps:$4 sm:$0xff]   ;;  %v7619_v26 = vld [vmem:[#allocation16 + $0xd0] ss:$8 sps:$4 sm:$0xff]  }
 0x33c   :  { %v7616_v25 = vld [vmem:[#allocation13 + $0xd0] ss:$8 sps:$4 sm:$0xff]  }
 0x33e   :  { %3713 = vmatpush1.bf16.msra.mxu0 %v7526_v27  ;;  %4041 = vmatpush1.bf16.msra.mxu1 %v7529_v28  ;;  %v7624_v27 = vld [vmem:[#allocation13 + $0xe4] ss:$8 sps:$4 sm:$0xff]  }
 0x33f   :  { %3714 = vmatprep.subr.bf16.mxu0 %v7534_v29  ;;  %4042 = vmatprep.subr.bf16.mxu1 %v7537_v30  ;;  %v7627_v28 = vld [vmem:[#allocation16 + $0xe4] ss:$8 sps:$4 sm:$0xff]   ;;  %v7625_v30 = vld [vmem:[#allocation16 + $0xe0] ss:$8 sps:$4 sm:$0xff]  }
 0x340   :  { %v7622_v29 = vld [vmem:[#allocation13 + $0xe0] ss:$8 sps:$4 sm:$0xff]  }
 0x342   :  { %3715 = vmatpush1.bf16.msra.mxu0 %v7532_v31  ;;  %4043 = vmatpush1.bf16.msra.mxu1 %v7535_v32  ;;  %v7630_v31 = vld [vmem:[#allocation13 + $0xf4] ss:$8 sps:$4 sm:$0xff]  }
 0x343   :  { %4510 = vmatprep.subr.bf16.mxu0 %v7540_v34  ;;  %5019 = vmatprep.subr.bf16.mxu1 %v7543_v35  ;;  %v7633_v32 = vld [vmem:[#allocation16 + $0xf4] ss:$8 sps:$4 sm:$0xff]   ;;  %v7631_v34 = vld [vmem:[#allocation16 + $0xf0] ss:$8 sps:$4 sm:$0xff]   ;;  %v7636_v35 = vld [vmem:[#allocation13 + $0x104] ss:$8 sps:$4 sm:$0xff]  }
 0x345   :  { %3717 = vmatmul.mubr.bf16.vlgmr.msra.gmra.mrb[0].mxu0 %v301_v36  ;;  %4045 = vmatmul.mubr.bf16.vlgmr.msra.gmra.mrb[0].mxu1 %v301_v36  ;;  %v7639_v36 = vld [vmem:[#allocation16 + $0x104] ss:$8 sps:$4 sm:$0xff]  }
 0x346   :  { %4511 = vmatpush1.bf16.msra.mxu0 %v7538_v37  ;;  %5020 = vmatpush1.bf16.msra.mxu1 %v7541_v38  ;;  %v817_v37 = vlaneseq }
 0x347   :  { %4512 = vmatprep.subr.bf16.mxu0 %v7546_v39  ;;  %5021 = vmatprep.subr.bf16.mxu1 %v7549_v40 }
 0x348   :  { %v818_v38 = vshrl.u32 %v817_v37, 7  ;;  %v7672_v37 = vld [vmem:[#allocation13 + $0x164] ss:$8 sps:$4 sm:$0xff]  }
 0x34a   :  { %4513 = vmatpush1.bf16.msra.mxu0 %v7544_v41  ;;  %5022 = vmatpush1.bf16.msra.mxu1 %v7547_v42  ;;  %v8544_v39 = vsub.s32 0, %v818_v38  ;;  %v827_v40 = vsub.s32 2, %v818_v38  ;;  %v815_v41 = vld [vmem:[#allocation10] sm:$0xf]  ;;  %v8546_v42 = vsub.s32 1, %v818_v38 }
 0x34b   :  { %4514 = vmatprep.subr.bf16.mxu0 %v7552_v43  ;;  %5023 = vmatprep.subr.bf16.mxu1 %v7555_v44  ;;  %v831_v43 = vsub.s32 3, %v818_v38  ;;  %v7675_v38 = vld [vmem:[#allocation16 + $0x164] ss:$8 sps:$4 sm:$0xff]  }
 0x34c   :  { %v820_v44 = vrot.slane %v815_v41, %v8544_v39 }
 0x34e   :  { %4515 = vmatpush1.bf16.msra.mxu0 %v7550_v45  ;;  %5024 = vmatpush1.bf16.msra.mxu1 %v7553_v46  ;;  %v828_v45 = vrot.slane %v815_v41, %v827_v40  ;;  %v824_v46 = vrot.slane %v815_v41, %v8546_v42 }
 0x34f   :  { %4516 = vmatprep.subr.bf16.mxu0 %v7558_v47  ;;  %5025 = vmatprep.subr.bf16.mxu1 %v7561_v48  ;;  %v832_v47 = vrot.slane %v815_v41, %v831_v43  ;;  %v7673_v41 = vld [vmem:[#allocation16 + $0x160] ss:$8 sps:$4 sm:$0xff]  }
 0x352   :  { %4517 = vmatpush1.bf16.msra.mxu0 %v7556_v49  ;;  %5026 = vmatpush1.bf16.msra.mxu1 %v7559_v50 }
 0x353   :  { %4518 = vmatprep.subr.bf16.mxu0 %v7564_v51  ;;  %5027 = vmatprep.subr.bf16.mxu1 %v7567_v52 }
 0x356   :  { %4519 = vmatpush1.bf16.msra.mxu0 %v7562_v53  ;;  %5028 = vmatpush1.bf16.msra.mxu1 %v7565_v54 }
 0x357   :  { %4520 = vmatprep.subr.bf16.mxu0 %v7570_v55  ;;  %5029 = vmatprep.subr.bf16.mxu1 %v7573_v56 }
 0x35a   :  { %4521 = vmatpush1.bf16.msra.mxu0 %v7568_v57  ;;  %5030 = vmatpush1.bf16.msra.mxu1 %v7571_v58 }
 0x35b   :  { %4522 = vmatprep.subr.bf16.mxu0 %v7576_v59  ;;  %5031 = vmatprep.subr.bf16.mxu1 %v7579_v60  ;;  %v4057_v60 = vld [vmem:[#allocation12] sm:$0xf] }
 0x35e   :  { %4523 = vmatpush1.bf16.msra.mxu0 %v7574_v61  ;;  %5032 = vmatpush1.bf16.msra.mxu1 %v7577_v62  ;;  %v4062_v61 = vrot.slane %v4057_v60, %v8544_v39  ;;  %v4070_v62 = vrot.slane %v4057_v60, %v827_v40  ;;  %v7670_v40 = vld [vmem:[#allocation13 + $0x160] ss:$8 sps:$4 sm:$0xff]  }
 0x35f   :  { %4524 = vmatprep.subr.bf16.mxu0 %v7582_v63  ;;  %5033 = vmatprep.subr.bf16.mxu1 %v7585_v0  ;;  %v4066_v63 = vrot.slane %v4057_v60, %v8546_v42 }
 0x362   :  { %4525 = vmatpush1.bf16.msra.mxu0 %v7580_v1  ;;  %5034 = vmatpush1.bf16.msra.mxu1 %v7583_v2  ;;  %v4074_v1 = vrot.slane %v4057_v60, %v831_v43  ;;  %v7678_v43 = vld [vmem:[#allocation13 + $0x174] ss:$8 sps:$4 sm:$0xff]  }
 0x363   :  { %4526 = vmatprep.subr.bf16.mxu0 %v7588_v3  ;;  %5035 = vmatprep.subr.bf16.mxu1 %v7591_v4  ;;  %v7705_v60 = vld [vmem:[#allocation16 + $0x1b4] ss:$8 sps:$4 sm:$0xff]  }
 0x366   :  { %4527 = vmatpush1.bf16.msra.mxu0 %v7586_v5  ;;  %5036 = vmatpush1.bf16.msra.mxu1 %v7589_v6 }
 0x367   :  { %4528 = vmatprep.subr.bf16.mxu0 %v7594_v7  ;;  %5037 = vmatprep.subr.bf16.mxu1 %v7597_v8  ;;  %v7634_v8 = vld [vmem:[#allocation13 + $0x100] ss:$8 sps:$4 sm:$0xff]  }
 0x36a   :  { %4529 = vmatpush1.bf16.msra.mxu0 %v7592_v9  ;;  %5038 = vmatpush1.bf16.msra.mxu1 %v7595_v10  ;;  %v7637_v9 = vld [vmem:[#allocation16 + $0x100] ss:$8 sps:$4 sm:$0xff]  }
 0x36b   :  { %4530 = vmatprep.subr.bf16.mxu0 %v7600_v11  ;;  %5039 = vmatprep.subr.bf16.mxu1 %v7603_v12 }
 0x36e   :  { %4531 = vmatpush1.bf16.msra.mxu0 %v7598_v13  ;;  %5040 = vmatpush1.bf16.msra.mxu1 %v7601_v14  ;;  %v7642_v13 = vld [vmem:[#allocation13 + $0x114] ss:$8 sps:$4 sm:$0xff]  }
 0x36f   :  { %4532 = vmatprep.subr.bf16.mxu0 %v7606_v15  ;;  %5041 = vmatprep.subr.bf16.mxu1 %v7609_v16  ;;  %v7645_v14 = vld [vmem:[#allocation16 + $0x114] ss:$8 sps:$4 sm:$0xff]  }
 0x372   :  { %4533 = vmatpush1.bf16.msra.mxu0 %v7604_v17  ;;  %5042 = vmatpush1.bf16.msra.mxu1 %v7607_v18  ;;  %v7640_v17 = vld [vmem:[#allocation13 + $0x110] ss:$8 sps:$4 sm:$0xff]  }
 0x373   :  { %4534 = vmatprep.subr.bf16.mxu0 %v7612_v19  ;;  %5043 = vmatprep.subr.bf16.mxu1 %v7615_v20  ;;  %v7643_v18 = vld [vmem:[#allocation16 + $0x110] ss:$8 sps:$4 sm:$0xff]   ;;  %v7648_v20 = vld [vmem:[#allocation13 + $0x124] ss:$8 sps:$4 sm:$0xff]  }
 0x376   :  { %4535 = vmatpush1.bf16.msra.mxu0 %v7610_v21  ;;  %5044 = vmatpush1.bf16.msra.mxu1 %v7613_v22  ;;  %v7651_v21 = vld [vmem:[#allocation16 + $0x124] ss:$8 sps:$4 sm:$0xff]  }
 0x377   :  { %4536 = vmatprep.subr.bf16.mxu0 %v7618_v23  ;;  %5045 = vmatprep.subr.bf16.mxu1 %v7621_v24  ;;  %v7646_v23 = vld [vmem:[#allocation13 + $0x120] ss:$8 sps:$4 sm:$0xff]  }
 0x378   :  { %v7649_v24 = vld [vmem:[#allocation16 + $0x120] ss:$8 sps:$4 sm:$0xff]  }
 0x37a   :  { %4537 = vmatpush1.bf16.msra.mxu0 %v7616_v25  ;;  %5046 = vmatpush1.bf16.msra.mxu1 %v7619_v26  ;;  %v7654_v25 = vld [vmem:[#allocation13 + $0x134] ss:$8 sps:$4 sm:$0xff]  }
 0x37b   :  { %4538 = vmatprep.subr.bf16.mxu0 %v7624_v27  ;;  %5047 = vmatprep.subr.bf16.mxu1 %v7627_v28  ;;  %v7657_v26 = vld [vmem:[#allocation16 + $0x134] ss:$8 sps:$4 sm:$0xff]   ;;  %v7655_v28 = vld [vmem:[#allocation16 + $0x130] ss:$8 sps:$4 sm:$0xff]  }
 0x37c   :  { %v7652_v27 = vld [vmem:[#allocation13 + $0x130] ss:$8 sps:$4 sm:$0xff]  }
 0x37e   :  { %4539 = vmatpush1.bf16.msra.mxu0 %v7622_v29  ;;  %5048 = vmatpush1.bf16.msra.mxu1 %v7625_v30  ;;  %v7660_v29 = vld [vmem:[#allocation13 + $0x144] ss:$8 sps:$4 sm:$0xff]  }
 0x37f   :  { %4540 = vmatprep.subr.bf16.mxu0 %v7630_v31  ;;  %5049 = vmatprep.subr.bf16.mxu1 %v7633_v32  ;;  %v7663_v30 = vld [vmem:[#allocation16 + $0x144] ss:$8 sps:$4 sm:$0xff]   ;;  %v7661_v32 = vld [vmem:[#allocation16 + $0x140] ss:$8 sps:$4 sm:$0xff]  }
 0x380   :  { %v7658_v31 = vld [vmem:[#allocation13 + $0x140] ss:$8 sps:$4 sm:$0xff]  }
 0x382   :  { %4541 = vmatpush1.bf16.msra.mxu0 %v7628_v33  ;;  %5050 = vmatpush1.bf16.msra.mxu1 %v7631_v34  ;;  %v7666_v33 = vld [vmem:[#allocation13 + $0x154] ss:$8 sps:$4 sm:$0xff]  }
 0x383   :  { %4551 = vmatprep.subr.bf16.mxu0 %v7636_v35  ;;  %5060 = vmatprep.subr.bf16.mxu1 %v7639_v36  ;;  %v7669_v34 = vld [vmem:[#allocation16 + $0x154] ss:$8 sps:$4 sm:$0xff]   ;;  %v7667_v36 = vld [vmem:[#allocation16 + $0x150] ss:$8 sps:$4 sm:$0xff]  }
 0x384   :  { %v7664_v35 = vld [vmem:[#allocation13 + $0x150] ss:$8 sps:$4 sm:$0xff]  }
 0x418   :  { %v3718_v48 = vpop.f32.mrb[0].mxu0  ;;  %v4046_v49 = vpop.f32.mrb[0].mxu1 }
 0x419   :  { %v6462_v50 = vadd.f32 %v3718_v48, %v820_v44  ;;  %v6464_v51 = vadd.f32 %v4046_v49, %v828_v45  ;;  %v3720_v52 = vpop.f32.mrb[1].mxu0  ;;  %v4048_v53 = vpop.f32.mrb[1].mxu1  ;;  %v7681_v44 = vld [vmem:[#allocation16 + $0x174] ss:$8 sps:$4 sm:$0xff]   ;;  %v7687_v48 = vld [vmem:[#allocation16 + $0x184] ss:$8 sps:$4 sm:$0xff]  }
 0x41a   :  { %v6463_v54 = vadd.f32 %v3720_v52, %v824_v46  ;;  %v6465_v55 = vadd.f32 %v4048_v53, %v832_v47  ;;  %v3722_v56 = vpop.f32.mrb[2].mxu0  ;;  %v4050_v57 = vpop.f32.mrb[2].mxu1  ;;  %v7676_v45 = vld [vmem:[#allocation13 + $0x170] ss:$8 sps:$4 sm:$0xff]   ;;  %v7684_v47 = vld [vmem:[#allocation13 + $0x184] ss:$8 sps:$4 sm:$0xff]  }
 0x41b   :  { %7770 = vtanh.f32 %v6462_v50  ;;  %v3723_v58 = vpop.f32.mrb[3].mxu0  ;;  %v4051_v59 = vpop.f32.mrb[3].mxu1  ;;  %v7679_v46 = vld [vmem:[#allocation16 + $0x170] ss:$8 sps:$4 sm:$0xff]   ;;  %v7682_v49 = vld [vmem:[#allocation13 + $0x180] ss:$8 sps:$4 sm:$0xff]  }
 0x41c   :  { %7772 = vtanh.f32 %v6464_v51  ;;  %v7685_v50 = vld [vmem:[#allocation16 + $0x180] ss:$8 sps:$4 sm:$0xff]   ;;  %v7690_v51 = vld [vmem:[#allocation13 + $0x194] ss:$8 sps:$4 sm:$0xff]   ;;  %v7688_v53 = vld [vmem:[#allocation13 + $0x190] ss:$8 sps:$4 sm:$0xff]  }
 0x41d   :  { %7774 = vtanh.f32 %v6463_v54  ;;  %v7693_v52 = vld [vmem:[#allocation16 + $0x194] ss:$8 sps:$4 sm:$0xff]   ;;  %v7691_v54 = vld [vmem:[#allocation16 + $0x190] ss:$8 sps:$4 sm:$0xff]   ;;  %v7699_v56 = vld [vmem:[#allocation16 + $0x1a4] ss:$8 sps:$4 sm:$0xff]  }
 0x41e   :  { %7776 = vtanh.f32 %v6465_v55  ;;  %v7696_v55 = vld [vmem:[#allocation13 + $0x1a4] ss:$8 sps:$4 sm:$0xff]   ;;  %v7694_v57 = vld [vmem:[#allocation13 + $0x1a0] ss:$8 sps:$4 sm:$0xff]   ;;  %v7702_v59 = vld [vmem:[#allocation13 + $0x1b4] ss:$8 sps:$4 sm:$0xff]  }
 0x41f   :  { %v7697_v58 = vld [vmem:[#allocation16 + $0x1a0] ss:$8 sps:$4 sm:$0xff]  }
 0x425   :  { %v7771_v0 = vpop.eup %7770 }
 0x426   :  { %v8552_v2 = vpop.eup %7772  ;;  %v4079_v3 = vmul.f32 %v7771_v0, %v4062_v61  ;;  %v4110_v11 = vpack.c.bf16 %v7771_v0, %v7771_v0  ;;  %v7700_v61 = vld [vmem:[#allocation13 + $0x1b0] ss:$8 sps:$4 sm:$0xff]  }
 0x427   :  { %v7775_v4 = vpop.eup %7774  ;;  %v4081_v5 = vmul.f32 %v8552_v2, %v4070_v62  ;;  %v7703_v62 = vld [vmem:[#allocation16 + $0x1b0] ss:$8 sps:$4 sm:$0xff]   ;;  %v7711_v0 = vld [vmem:[#allocation16 + $0x1c4] ss:$8 sps:$4 sm:$0xff]  }
 0x428   :  { %v7777_v6 = vpop.eup %7776  ;;  %v4111_v7 = vpack.c.bf16 %v7775_v4, %v7775_v4  ;;  %v4080_v10 = vmul.f32 %v7775_v4, %v4066_v63  ;;  %v7708_v63 = vld [vmem:[#allocation13 + $0x1c4] ss:$8 sps:$4 sm:$0xff]   ;;  %v7714_v4 = vld [vmem:[#allocation13 + $0x1d4] ss:$8 sps:$4 sm:$0xff]  }
 0x429   :  { %v4082_v12 = vmul.f32 %v7777_v6, %v4074_v1  ;;  %v4113_v16 = vpack.c.bf16 %v7777_v6, %v7777_v6  ;;  %v7706_v1 = vld [vmem:[#allocation13 + $0x1c0] ss:$8 sps:$4 sm:$0xff]   ;;  %v7712_v6 = vld [vmem:[#allocation13 + $0x1d0] ss:$8 sps:$4 sm:$0xff]  }
 0x42a   :  { %4542 = vmatprep.mubr.bf16.mxu0 %v4111_v7  ;;  %5051 = vmatprep.mubr.bf16.mxu1 %v4111_v7  ;;  %v4083_v15 = vadd.f32 %v4080_v10, %v4079_v3  ;;  %v7709_v3 = vld [vmem:[#allocation16 + $0x1c0] ss:$8 sps:$4 sm:$0xff]   ;;  %v7715_v7 = vld [vmem:[#allocation16 + $0x1d0] ss:$8 sps:$4 sm:$0xff]  }
 0x42b   :  { %4543 = vmatmul.mubr.bf16.vlgmr.msra.gmra.mrb[4].mxu0 %v4110_v11  ;;  %5052 = vmatmul.mubr.bf16.vlgmr.msra.gmra.mrb[4].mxu1 %v4110_v11  ;;  %v7718_v10 = vld [vmem:[#allocation13 + $0x1e0] ss:$8 sps:$4 sm:$0xff]  }
 0x42c   :  { %4552 = vmatpush1.bf16.msra.mxu0 %v7634_v8  ;;  %5061 = vmatpush1.bf16.msra.mxu1 %v7637_v9  ;;  %v4084_v19 = vadd.f32 %v4083_v15, %v4081_v5  ;;  %v7717_v5 = vld [vmem:[#allocation16 + $0x1d4] ss:$8 sps:$4 sm:$0xff]   ;;  %v7720_v8 = vld [vmem:[#allocation13 + $0x1e4] ss:$8 sps:$4 sm:$0xff]   ;;  %v7727_v15 = vld [vmem:[#allocation16 + $0x1f0] ss:$8 sps:$4 sm:$0xff]  }
 0x42d   :  { %4583 = vmatprep.mubr.bf16.mxu0 %v4113_v16  ;;  %5092 = vmatprep.mubr.bf16.mxu1 %v4113_v16  ;;  %v7723_v9 = vld [vmem:[#allocation16 + $0x1e4] ss:$8 sps:$4 sm:$0xff]   ;;  %v7721_v11 = vld [vmem:[#allocation16 + $0x1e0] ss:$8 sps:$4 sm:$0xff]  }
 0x42e   :  { %4553 = vmatprep.subr.bf16.mxu0 %v7642_v13  ;;  %5062 = vmatprep.subr.bf16.mxu1 %v7645_v14  ;;  %v8555_v22 = vadd.f32 %v4084_v19, %v4082_v12  ;;  %v7726_v12 = vld [vmem:[#allocation13 + $0x1f4] ss:$8 sps:$4 sm:$0xff]   ;;  %v7724_v14 = vld [vmem:[#allocation13 + $0x1f0] ss:$8 sps:$4 sm:$0xff]   ;;  %v7730_v16 = vld [vmem:[#allocation21 + $0x40] sm:$0xff]  }
 0x42f   :  { %v7729_v13 = vld [vmem:[#allocation16 + $0x1f4] ss:$8 sps:$4 sm:$0xff]   ;;  %v7733_v19 = vld [vmem:[#allocation24] sm:$0xff]  }
 0x430   :  { %4554 = vmatpush1.bf16.msra.mxu0 %v7640_v17  ;;  %5063 = vmatpush1.bf16.msra.mxu1 %v7643_v18  ;;  %v7731_v17 = vld [vmem:[#allocation24 + $0x40] sm:$0xff]  }
 0x431   :  { %4555 = vmatprep.subr.bf16.mxu0 %v7648_v20  ;;  %5064 = vmatprep.subr.bf16.mxu1 %v7651_v21  ;;  %v7732_v18 = vld [vmem:[#allocation21] sm:$0xff]   ;;  %v4112_v20 = vpack.c.bf16 %v8552_v2, %v8552_v2  ;;  %v7734_v21 = vld [vmem:[#allocation21 + $0x48] sm:$0xff]   ;;  %v7742_v2 = vld [vmem:[#allocation21 + $0x58] sm:$0xff]  }
 0x434   :  { %4556 = vmatpush1.bf16.msra.mxu0 %v7646_v23  ;;  %5065 = vmatpush1.bf16.msra.mxu1 %v7649_v24  ;;  %v7735_v23 = vld [vmem:[#allocation24 + $0x48] sm:$0xff]  }
 0x435   :  { %4557 = vmatprep.subr.bf16.mxu0 %v7654_v25  ;;  %5066 = vmatprep.subr.bf16.mxu1 %v7657_v26  ;;  %v7736_v24 = vld [vmem:[#allocation21 + $0x8] sm:$0xff]   ;;  %v7738_v26 = vld [vmem:[#allocation21 + $0x50] sm:$0xff]  }
 0x436   :  { %v7737_v25 = vld [vmem:[#allocation24 + $0x8] sm:$0xff]  }
 0x438   :  { %4558 = vmatpush1.bf16.msra.mxu0 %v7652_v27  ;;  %5067 = vmatpush1.bf16.msra.mxu1 %v7655_v28  ;;  %v7739_v27 = vld [vmem:[#allocation24 + $0x50] sm:$0xff]  }
 0x439   :  { %4559 = vmatprep.subr.bf16.mxu0 %v7660_v29  ;;  %5068 = vmatprep.subr.bf16.mxu1 %v7663_v30  ;;  %v7740_v28 = vld [vmem:[#allocation21 + $0x10] sm:$0xff]   ;;  %v7743_v30 = vld [vmem:[#allocation24 + $0x58] sm:$0xff]  }
 0x43a   :  { %v7741_v29 = vld [vmem:[#allocation24 + $0x10] sm:$0xff]  }
 0x43c   :  { %4560 = vmatpush1.bf16.msra.mxu0 %v7658_v31  ;;  %5069 = vmatpush1.bf16.msra.mxu1 %v7661_v32  ;;  %v7744_v31 = vld [vmem:[#allocation21 + $0x18] sm:$0xff]  }
 0x43d   :  { %4561 = vmatprep.subr.bf16.mxu0 %v7666_v33  ;;  %5070 = vmatprep.subr.bf16.mxu1 %v7669_v34  ;;  %v7745_v32 = vld [vmem:[#allocation24 + $0x18] sm:$0xff]   ;;  %v7747_v34 = vld [vmem:[#allocation24 + $0x60] sm:$0xff]  }
 0x43e   :  { %v7746_v33 = vld [vmem:[#allocation21 + $0x60] sm:$0xff]  }
 0x440   :  { %4562 = vmatpush1.bf16.msra.mxu0 %v7664_v35  ;;  %5071 = vmatpush1.bf16.msra.mxu1 %v7667_v36  ;;  %v7748_v35 = vld [vmem:[#allocation21 + $0x20] sm:$0xff]  }
 0x441   :  { %4563 = vmatprep.subr.bf16.mxu0 %v7672_v37  ;;  %5072 = vmatprep.subr.bf16.mxu1 %v7675_v38  ;;  %v7749_v36 = vld [vmem:[#allocation24 + $0x20] sm:$0xff]   ;;  %v7751_v38 = vld [vmem:[#allocation24 + $0x68] sm:$0xff]  }
 0x442   :  { %v7750_v37 = vld [vmem:[#allocation21 + $0x68] sm:$0xff]  }
 0x444   :  { %4564 = vmatpush1.bf16.msra.mxu0 %v7670_v40  ;;  %5073 = vmatpush1.bf16.msra.mxu1 %v7673_v41  ;;  %v7752_v40 = vld [vmem:[#allocation21 + $0x28] sm:$0xff]  }
 0x445   :  { %4565 = vmatprep.subr.bf16.mxu0 %v7678_v43  ;;  %5074 = vmatprep.subr.bf16.mxu1 %v7681_v44  ;;  %v7753_v41 = vld [vmem:[#allocation24 + $0x28] sm:$0xff]   ;;  %v7755_v44 = vld [vmem:[#allocation24 + $0x70] sm:$0xff]  }
 0x446   :  { %v7754_v43 = vld [vmem:[#allocation21 + $0x70] sm:$0xff]  }
 0x448   :  { %4566 = vmatpush1.bf16.msra.mxu0 %v7676_v45  ;;  %5075 = vmatpush1.bf16.msra.mxu1 %v7679_v46  ;;  %v7756_v45 = vld [vmem:[#allocation21 + $0x30] sm:$0xff]  }
 0x449   :  { %4567 = vmatprep.subr.bf16.mxu0 %v7684_v47  ;;  %5076 = vmatprep.subr.bf16.mxu1 %v7687_v48  ;;  %v7757_v46 = vld [vmem:[#allocation24 + $0x30] sm:$0xff]   ;;  %v7759_v48 = vld [vmem:[#allocation24 + $0x78] sm:$0xff]  }
 0x44a   :  { %v7758_v47 = vld [vmem:[#allocation21 + $0x78] sm:$0xff]  }
 0x44c   :  { %4568 = vmatpush1.bf16.msra.mxu0 %v7682_v49  ;;  %5077 = vmatpush1.bf16.msra.mxu1 %v7685_v50  ;;  %v7760_v49 = vld [vmem:[#allocation21 + $0x38] sm:$0xff]  }
 0x44d   :  { %4569 = vmatprep.subr.bf16.mxu0 %v7690_v51  ;;  %5078 = vmatprep.subr.bf16.mxu1 %v7693_v52  ;;  %v7761_v50 = vld [vmem:[#allocation24 + $0x38] sm:$0xff]  }
 0x44e   :  { %v4178_v51 = vld [vmem:[#allocation15] sm:$0x3]  ;;  %v4687_v52 = vld [vmem:[#allocation18] sm:$0x3] }
 0x450   :  { %4570 = vmatpush1.bf16.msra.mxu0 %v7688_v53  ;;  %5079 = vmatpush1.bf16.msra.mxu1 %v7691_v54  ;;  %v4183_v53 = vrot.slane %v4178_v51, %v8544_v39  ;;  %v4692_v54 = vrot.slane %v4687_v52, %v8544_v39 }
 0x451   :  { %4571 = vmatprep.subr.bf16.mxu0 %v7696_v55  ;;  %5080 = vmatprep.subr.bf16.mxu1 %v7699_v56  ;;  %v4187_v55 = vrot.slane %v4178_v51, %v8546_v42  ;;  %v4696_v56 = vrot.slane %v4687_v52, %v8546_v42  ;;  %v6378_v52 = vld [vmem:[#allocation27] ss:$0 sm:$0xff] }
 0x454   :  { %4572 = vmatpush1.bf16.msra.mxu0 %v7694_v57  ;;  %5081 = vmatpush1.bf16.msra.mxu1 %v7697_v58 }
 0x455   :  { %4573 = vmatprep.subr.bf16.mxu0 %v7702_v59  ;;  %5082 = vmatprep.subr.bf16.mxu1 %v7705_v60 }
 0x458   :  { %4574 = vmatpush1.bf16.msra.mxu0 %v7700_v61  ;;  %5083 = vmatpush1.bf16.msra.mxu1 %v7703_v62 }
 0x459   :  { %4575 = vmatprep.subr.bf16.mxu0 %v7708_v63  ;;  %5084 = vmatprep.subr.bf16.mxu1 %v7711_v0 }
 0x45c   :  { %4576 = vmatpush1.bf16.msra.mxu0 %v7706_v1  ;;  %5085 = vmatpush1.bf16.msra.mxu1 %v7709_v3 }
 0x45d   :  { %4577 = vmatprep.subr.bf16.mxu0 %v7714_v4  ;;  %5086 = vmatprep.subr.bf16.mxu1 %v7717_v5 }
 0x460   :  { %4578 = vmatpush1.bf16.msra.mxu0 %v7712_v6  ;;  %5087 = vmatpush1.bf16.msra.mxu1 %v7715_v7 }
 0x461   :  { %4579 = vmatprep.subr.bf16.mxu0 %v7720_v8  ;;  %5088 = vmatprep.subr.bf16.mxu1 %v7723_v9  ;;  %v5103_v8 = vld [vmem:[#allocation19] sm:$0x3] }
 0x462   :  { %v5108_v9 = vrot.slane %v5103_v8, %v8544_v39 }
 0x464   :  { %4580 = vmatpush1.bf16.msra.mxu0 %v7718_v10  ;;  %5089 = vmatpush1.bf16.msra.mxu1 %v7721_v11  ;;  %v5112_v10 = vrot.slane %v5103_v8, %v8546_v42 }
 0x465   :  { %4581 = vmatprep.subr.bf16.mxu0 %v7726_v12  ;;  %5090 = vmatprep.subr.bf16.mxu1 %v7729_v13 }
 0x468   :  { %4582 = vmatpush1.bf16.msra.mxu0 %v7724_v14  ;;  %5091 = vmatpush1.bf16.msra.mxu1 %v7727_v15 }
 0x469   :  { %6389 = vmatprep.subr.bf16.mxu0 %v7730_v16  ;;  %6411 = vmatprep.subr.bf16.mxu1 %v7731_v17 }
 0x46b   :  { %4584 = vmatmul.mubr.bf16.vlgmr.msra.gmra.mrb[4].mxu0 %v4112_v20  ;;  %5093 = vmatmul.mubr.bf16.vlgmr.msra.gmra.mrb[4].mxu1 %v4112_v20 }
 0x46c   :  { %6390 = vmatpush3.bf16.msra.mxu0 %v7732_v18  ;;  %6412 = vmatpush3.bf16.msra.mxu1 %v7733_v19 }
 0x46d   :  { %6391 = vmatprep.subr.bf16.mxu0 %v7734_v21  ;;  %6413 = vmatprep.subr.bf16.mxu1 %v7735_v23 }
 0x470   :  { %6392 = vmatpush3.bf16.msra.mxu0 %v7736_v24  ;;  %6414 = vmatpush3.bf16.msra.mxu1 %v7737_v25 }
 0x471   :  { %6393 = vmatprep.subr.bf16.mxu0 %v7738_v26  ;;  %6415 = vmatprep.subr.bf16.mxu1 %v7739_v27  ;;  %v7762_v27 = vld [vmem:[%s9084_s18] sm:$0xff]  }
 0x474   :  { %6394 = vmatpush3.bf16.msra.mxu0 %v7740_v28  ;;  %6416 = vmatpush3.bf16.msra.mxu1 %v7741_v29  ;;  %v8234_v28 = vmov 0.0   ;;  %v7763_v29 = vld [vmem:[%s9084_s18 + $0x8] sm:$0xff]  }
 0x475   :  { %6395 = vmatprep.subr.bf16.mxu0 %v7742_v2  ;;  %6417 = vmatprep.subr.bf16.mxu1 %v7743_v30  ;;  %v7764_v2 = vld [vmem:[%s9084_s18 + $0x10] sm:$0xff]   ;;  %v7765_v30 = vld [vmem:[%s9084_s18 + $0x18] sm:$0xff]  }
 0x478   :  { %6396 = vmatpush3.bf16.msra.mxu0 %v7744_v31  ;;  %6418 = vmatpush3.bf16.msra.mxu1 %v7745_v32  ;;  %v7766_v31 = vld [vmem:[%s9084_s18 + $0x20] sm:$0xff]   ;;  %v7767_v32 = vld [vmem:[%s9084_s18 + $0x28] sm:$0xff]  }
 0x479   :  { %6397 = vmatprep.subr.bf16.mxu0 %v7746_v33  ;;  %6419 = vmatprep.subr.bf16.mxu1 %v7747_v34  ;;  %v7768_v33 = vld [vmem:[%s9084_s18 + $0x30] sm:$0xff]   ;;  %v7769_v34 = vld [vmem:[%s9084_s18 + $0x38] sm:$0xff]  }
 0x47c   :  { %6398 = vmatpush3.bf16.msra.mxu0 %v7748_v35  ;;  %6420 = vmatpush3.bf16.msra.mxu1 %v7749_v36 }
 0x47d   :  { %6399 = vmatprep.subr.bf16.mxu0 %v7750_v37  ;;  %6421 = vmatprep.subr.bf16.mxu1 %v7751_v38  ;;  %v6344_v37 = vld [vmem:[#allocation22] ss:$0 sm:$0xff] }
 0x480   :  { %6400 = vmatpush3.bf16.msra.mxu0 %v7752_v40  ;;  %6422 = vmatpush3.bf16.msra.mxu1 %v7753_v41  ;;  %v6361_v40 = vld [vmem:[#allocation25] ss:$0 sm:$0xff] }
 0x481   :  { %6401 = vmatprep.subr.bf16.mxu0 %v7754_v43  ;;  %6423 = vmatprep.subr.bf16.mxu1 %v7755_v44 }
 0x484   :  { %6402 = vmatpush3.bf16.msra.mxu0 %v7756_v45  ;;  %6424 = vmatpush3.bf16.msra.mxu1 %v7757_v46 }
 0x485   :  { %6403 = vmatprep.subr.bf16.mxu0 %v7758_v47  ;;  %6425 = vmatprep.subr.bf16.mxu1 %v7759_v48 }
 0x488   :  { %6404 = vmatpush3.bf16.msra.mxu0 %v7760_v49  ;;  %6426 = vmatpush3.bf16.msra.mxu1 %v7761_v50 }
 0x489   :  { %6442 = vmatprep.subr.bf16.mxu0 %v8234_v28 }
 0x53e   :  { %v4585_v57 = vpop.f32.mrb[4].mxu0  ;;  %v5094_v58 = vpop.f32.mrb[4].mxu1 }
 0x53f   :  { %v6466_v59 = vadd.f32 %v4585_v57, %v4183_v53  ;;  %v6468_v60 = vadd.f32 %v5094_v58, %v4692_v54  ;;  %v4587_v61 = vpop.f32.mrb[5].mxu0  ;;  %v5096_v62 = vpop.f32.mrb[5].mxu1 }
 0x540   :  { %v6467_v63 = vadd.f32 %v4587_v61, %v4187_v55  ;;  %v6469_v0 = vadd.f32 %v5096_v62, %v4696_v56  ;;  %v4589_v1 = vpop.f32.mrb[6].mxu0  ;;  %v5098_v3 = vpop.f32.mrb[6].mxu1  ;;  %v8236_v61 = vmov 0   ;;  %v6343_v62 = vld [vmem:[#allocation3] ss:$0 sm:$0xff] }
 0x541   :  { %v4592_v4 = vmul.f32 1.442695, %v6466_v59  ;;  %7778 = vtanh.f32 %v6468_v60  ;;  %v4590_v5 = vpop.f32.mrb[7].mxu0  ;;  %v5099_v6 = vpop.f32.mrb[7].mxu1  ;;  %6768 = vset.pattern.permute.xlu1 %v8236_v61  ;;  %6769 = vset.pattern.permute.xlu0 %v8236_v61  ;;  %v6379_v1 = vld [vmem:[#allocation4] ss:$0 sm:$0xff] }
 0x542   :  { %v4594_v7 = vmul.f32 1.442695, %v6467_v63  ;;  %7780 = vtanh.f32 %v6469_v0  ;;  %v6214_v5 = vld [vmem:[#allocation2] ss:$0 sm:$0xff] }
 0x543   :  { %7782 = vpow2.f32 %v4592_v4 }
 0x544   :  { %7784 = vpow2.f32 %v4594_v7 }
 0x54b   :  { %v7779_v11 = vpop.eup %7778 }
 0x54c   :  { %v7781_v12 = vpop.eup %7780  ;;  %v5115_v13 = vmul.f32 %v7779_v11, %v5108_v9  ;;  %v5142_v19 = vpack.c.bf16 %v7779_v11, %v7779_v11 }
 0x54d   :  { %v7783_v14 = vpop.eup %7782  ;;  %v5143_v15 = vpack.c.bf16 %v7781_v12, %v7781_v12  ;;  %v5116_v16 = vmul.f32 %v7781_v12, %v5112_v10 }
 0x54e   :  { %v7785_v17 = vpop.eup %7784  ;;  %v4596_v18 = vadd.f32 1.0, %v7783_v14 }
 0x54f   :  { %v4597_v20 = vadd.f32 1.0, %v7785_v17  ;;  %5311 = vmatprep.mubr.bf16.mxu0 %v5143_v15  ;;  %5504 = vmatprep.mubr.bf16.mxu1 %v5143_v15  ;;  %v5117_v21 = vadd.f32 %v5116_v16, %v5115_v13 }
 0x550   :  { %7786 = vlog2.f32 %v4596_v18  ;;  %5312 = vmatmul.mubr.bf16.vlgmr.msra.gmra.mrb[8].mxu0 %v5142_v19  ;;  %5505 = vmatmul.mubr.bf16.vlgmr.msra.gmra.mrb[8].mxu1 %v5142_v19 }
 0x551   :  { %7788 = vlog2.f32 %v4597_v20  ;;  %5118 = vadd.xlane.f32.xlu1 %v5117_v21  ;;  %6443 = vmatpush3.bf16.msra.mxu0 %v7762_v27 }
 0x552   :  { %6444 = vmatprep.subr.bf16.mxu0 %v8234_v28  ;;  %6458 = vmatprep.mubr.msk.bf16.mxu0 %vm8235_vm0, %v8234_v28 }
 0x555   :  { %6445 = vmatpush3.bf16.msra.mxu0 %v7763_v29 }
 0x556   :  { %6446 = vmatprep.subr.bf16.mxu0 %v8234_v28 }
 0x559   :  { %6447 = vmatpush3.bf16.msra.mxu0 %v7764_v2 }
 0x55a   :  { %v7787_v39 = vpop.eup %7786  ;;  %6448 = vmatprep.subr.bf16.mxu0 %v8234_v28 }
 0x55b   :  { %v7789_v42 = vpop.eup %7788  ;;  %v8565_v23 = vmul.f32 0.6931472, %v7787_v39 }
 0x55c   :  { %v8567_v24 = vmul.f32 0.6931472, %v7789_v42 }
 0x55d   :  { %v4602_v25 = vmax.f32 %v8565_v23, 1e-10  ;;  %6449 = vmatpush3.bf16.msra.mxu0 %v7765_v30 }
 0x55e   :  { %v4603_v26 = vmax.f32 %v8567_v24, 1e-10  ;;  %6450 = vmatprep.subr.bf16.mxu0 %v8234_v28 }
 0x55f   :  { %5679 = vst [vmem:[%s9086_s20 + $0x20] sm:$0xff] %v4602_v25 }
 0x560   :  { %5680 = vst [vmem:[%s9086_s20 + $0x28] sm:$0xff] %v4603_v26 }
 0x561   :  { %6451 = vmatpush3.bf16.msra.mxu0 %v7766_v31 }
 0x562   :  { %6452 = vmatprep.subr.bf16.mxu0 %v8234_v28 }
 0x565   :  { %6453 = vmatpush3.bf16.msra.mxu0 %v7767_v32 }
 0x566   :  { %6454 = vmatprep.subr.bf16.mxu0 %v8234_v28 }
 0x569   :  { %6455 = vmatpush3.bf16.msra.mxu0 %v7768_v33  ;;  %v6380_v33 = vld [vmem:[#allocation28] ss:$0 sm:$0xff] }
 0x56a   :  { %6456 = vmatprep.subr.bf16.mxu0 %v8234_v28 }
 0x56d   :  { %6457 = vmatpush3.bf16.msra.mxu0 %v7769_v34 }
 0x5de   :  { %v5119_v63 = vpop.xlane.xlu1 %5118 }
 0x5df   :  { %v5127_v0 = vadd.f32 %v6343_v62, %v5119_v63 }
 0x623   :  { %v6405_v35 = vpop.f32.mrb[8].mxu0  ;;  %v6427_v36 = vpop.f32.mrb[8].mxu1 }
 0x624   :  { %v6406_v38 = vpop.f32.mrb[9].mxu0  ;;  %v6428_v41 = vpop.f32.mrb[9].mxu1 }
 0x625   :  { %v6407_v43 = vadd.f32 %v6406_v38, %v6405_v35  ;;  %v6429_v44 = vadd.f32 %v6428_v41, %v6427_v36  ;;  %v6408_v45 = vpop.f32.mrb[10].mxu0  ;;  %v6430_v46 = vpop.f32.mrb[10].mxu1 }
 0x626   :  { %v6409_v47 = vpop.f32.mrb[11].mxu0  ;;  %v6431_v48 = vpop.f32.mrb[11].mxu1 }
 0x627   :  { %v5314_v49 = vadd.f32 %v6407_v43, %v6344_v37  ;;  %v5507_v50 = vadd.f32 %v6429_v44, %v6361_v40  ;;  %v270_v47 = vld [vmem:[#allocation5 + $0x18] sm:$0xff] }
 0x628   :  { %v5663_v48 = vsub.f32 1.0, %v270_v47 }
 0x629   :  { %v5319_v51 = vmul.f32 1.442695, %v5314_v49  ;;  %7790 = vtanh.f32 %v5507_v50  ;;  %v267_v49 = vld [vmem:[#allocation5] sm:$0xff] }
 0x62a   :  { %v4604_v50 = vsub.f32 1.0, %v267_v49 }
 0x62b   :  { %7792 = vpow2.f32 %v5319_v51  ;;  %v5664_v51 = vmax.f32 %v5663_v48, 1e-10 }
 0x633   :  { %v7791_v53 = vpop.eup %7790 }
 0x634   :  { %v5520_v54 = vmul.f32 %v7791_v53, %v6378_v52  ;;  %v5545_v55 = vpack.c.bf16 %v7791_v53, %v7791_v53  ;;  %v268_v52 = vld [vmem:[#allocation5 + $0x8] sm:$0xff] }
 0x635   :  { %v7793_v56 = vpop.eup %7792  ;;  %v4605_v53 = vsub.f32 1.0, %v268_v52 }
 0x636   :  { %v5321_v57 = vadd.f32 1.0, %v7793_v56  ;;  %5521 = vadd.xlane.f32.xlu0 %v5520_v54  ;;  %6459 = vmatmul.mubr.bf16.vlgmr.msra.gmra.mrb[12].mxu0 %v5545_v55  ;;  %v4606_v54 = vmax.f32 %v4604_v50, 1e-10  ;;  %v269_v56 = vld [vmem:[#allocation5 + $0x10] sm:$0xff]  ;;  %v8237_v50 = vmov 2139095040  }
 0x637   :  { %v4607_v55 = vmax.f32 %v4605_v53, 1e-10 }
 0x638   :  { %7794 = vlog2.f32 %v5321_v57  ;;  %v5325_v57 = vsub.f32 1.0, %v269_v56 }
 0x63a   :  { %4086 = vadd.xlane.f32.xlu0 %v8555_v22  ;;  %v5128_v22 = vmul.f32 1.442695, %v5127_v0  ;;  %v5326_v62 = vmax.f32 %v5325_v57, 1e-10 }
 0x63c   :  { %7796 = vpow2.f32 %v5128_v22 }
 0x642   :  { %v7795_v58 = vpop.eup %7794 }
 0x643   :  { %v8606_v59 = vmul.f32 0.6931472, %v7795_v58 }
 0x645   :  { %v5324_v60 = vmax.f32 %v8606_v59, 1e-10 }
 0x646   :  { %v7797_v10 = vpop.eup %7796 }
 0x647   :  { %5683 = vst [vmem:[%s9086_s20 + $0x40] sm:$0xff] %v5324_v60  ;;  %v5130_v11 = vadd.f32 1.0, %v7797_v10 }
 0x6c3   :  { %v5522_v3 = vpop.xlane.xlu0 %5521 }
 0x6c4   :  { %v5530_v4 = vadd.f32 %v6379_v1, %v5522_v3 }
 0x6c6   :  { %v5531_v6 = vmul.f32 1.442695, %v5530_v4 }
 0x6c7   :  { %v4087_v7 = vpop.xlane.xlu0 %4086 }
 0x6c8   :  { %7798 = vpow2.f32 %v5531_v6  ;;  %v4095_v8 = vadd.f32 %v6214_v5, %v4087_v7 }
 0x6ca   :  { %v4096_v9 = vmul.f32 1.442695, %v4095_v8 }
 0x6cc   :  { %7800 = vpow2.f32 %v4096_v9 }
 0x6cd   :  { %7802 = vlog2.f32 %v5130_v11 }
 0x6d2   :  { %v7799_v12 = vpop.eup %7798 }
 0x6d3   :  { %v5533_v13 = vadd.f32 1.0, %v7799_v12 }
 0x6d5   :  { %7804 = vlog2.f32 %v5533_v13 }
 0x6d6   :  { %v7801_v14 = vpop.eup %7800 }
 0x6d7   :  { %v4098_v15 = vadd.f32 1.0, %v7801_v14  ;;  %v7803_v16 = vpop.eup %7802 }
 0x6d8   :  { %v5132_v19 = vmul.f32 0.6931472, %v7803_v16 }
 0x6d9   :  { %7806 = vlog2.f32 %v4098_v15 }
 0x6da   :  { %v5133_v27 = vmax.f32 %v5132_v19, 1e-10 }
 0x6dc   :  { %v5134_v2 = vmin.f32 %v5133_v27, 10.0 }
 0x6df   :  { %v7805_v17 = vpop.eup %7804 }
 0x6e0   :  { %v5535_v18 = vmul.f32 0.6931472, %v7805_v17 }
 0x6e2   :  { %v5536_v20 = vmax.f32 %v5535_v18, 1e-10 }
 0x6e3   :  { %v7807_v21 = vpop.eup %7806 }
 0x6e4   :  { %v5537_v39 = vmin.f32 %v5536_v20, 10.0  ;;  %v4100_v42 = vmul.f32 0.6931472, %v7807_v21 }
 0x6e6   :  { %7808 = vrcp.f32 %v5537_v39  ;;  %v4101_v28 = vmax.f32 %v4100_v42, 1e-10 }
 0x6e8   :  { %v4102_v29 = vmin.f32 %v4101_v28, 10.0 }
 0x6ea   :  { %4107 = vperm.xlu1 %6768, %v4102_v29   ;;  %7810 = vrcp.f32 %v4102_v29 }
 0x6eb   :  { %7812 = vrcp.f32 %v5134_v2 }
 0x6f0   :  { %v7809_v30 = vpop.eup %7808 }
 0x6f1   :  { %5670 = vperm.xlu0 %6769, %v7809_v30  }
 0x6f4   :  { %v7811_v31 = vpop.eup %7810 }
 0x6f5   :  { %4616 = vperm.xlu1 %6768, %v7811_v31   ;;  %v7813_v32 = vpop.eup %7812 }
 0x6f9   :  { %5332 = vperm.xlu1 %6768, %v7813_v32  }
 0x6fd   :  { %5139 = vperm.xlu1 %6768, %v5134_v2  }
 0x701   :  { %5542 = vperm.xlu1 %6768, %v5537_v39  }
 0x709   :  { %v5651_v34 = vpop.f32.mrb[12].mxu0 }
 0x70a   :  { %v5652_v35 = vadd.f32 %v6380_v33, %v5651_v34  ;;  %v6460_v36 = vpop.f32.mrb[13].mxu0  ;;  %v9119_v33 = vmov 0 }
 0x70b   :  { %v5654_v37 = vpop.f32.mrb[14].mxu0 }
 0x70c   :  { %v5657_v38 = vmul.f32 1.442695, %v5652_v35  ;;  %v6461_v40 = vpop.f32.mrb[15].mxu0 }
 0x70e   :  { %7814 = vpow2.f32 %v5657_v38 }
 0x718   :  { %v7815_v41 = vpop.eup %7814 }
 0x719   :  { %v5659_v43 = vadd.f32 1.0, %v7815_v41 }
 0x71b   :  { %7816 = vlog2.f32 %v5659_v43 }
 0x71c   :  { %7818 = vlog2.f32 %v5664_v51 }
 0x71d   :  { %7820 = vlog2.f32 %v4606_v54 }
 0x71e   :  { %7822 = vlog2.f32 %v4607_v55 }
 0x71f   :  { %7824 = vlog2.f32 %v5326_v62 }
 0x725   :  { %v7817_v44 = vpop.eup %7816 }
 0x726   :  { %v8616_v45 = vmul.f32 0.6931472, %v7817_v44  ;;  %v7819_v58 = vpop.eup %7818 }
 0x727   :  { %v7821_v63 = vpop.eup %7820  ;;  %v5666_v0 = vmul.f32 0.6931472, %v7819_v58 }
 0x728   :  { %v5662_v46 = vmax.f32 %v8616_v45, 1e-10  ;;  %v4609_v22 = vmul.f32 0.6931472, %v7821_v63  ;;  %v7823_v1 = vpop.eup %7822 }
 0x729   :  { %v8625_v3 = vsub.f32 0.0, %v5666_v0  ;;  %v4611_v4 = vmul.f32 0.6931472, %v7823_v1  ;;  %v7825_v9 = vpop.eup %7824 }
 0x72a   :  { %5688 = vst.msk [vmem:[%s9086_s20 + $0x50] sm:$0xff] %vm9094_vm1, %v5662_v46  ;;  %v8627_v5 = vsub.f32 0.0, %v4609_v22  ;;  %v5328_v12 = vmul.f32 0.6931472, %v7825_v9 }
 0x72b   :  { %v8630_v6 = vand.u32 2147483647, %v8625_v3  ;;  %v8632_v7 = vsub.f32 0.0, %v4611_v4  ;;  %vm9098_vm5 = vcmp.eq.f32.partialorder %v8625_v3, 0  ;;  %vm9095_vm12 = vcmp.lt.f32.partialorder %v8625_v3, 0 }
 0x72c   :  { %v8635_v8 = vand.u32 2147483647, %v8627_v5  ;;  %v8649_v13 = vsub.f32 0.0, %v5328_v12  ;;  %vm9100_vm1 = vcmp.lt.f32.partialorder %v8627_v5, 0 }
 0x72d   :  { %7826 = vlog2.f32 %v8630_v6  ;;  %v8640_v10 = vand.u32 2147483647, %v8632_v7  ;;  %vm6714_vm6 = vcmp.gt.f32.partialorder %v8630_v6, 1065353216 }
 0x72e   :  { %7828 = vlog2.f32 %v8635_v8  ;;  %v8657_v17 = vand.u32 2147483647, %v8649_v13 }
 0x72f   :  { %7830 = vlog2.f32 %v8640_v10 }
 0x730   :  { %7832 = vlog2.f32 %v8657_v17 }
 0x737   :  { %v7827_v14 = vpop.eup %7826 }
 0x738   :  { %v7829_v18 = vpop.eup %7828 }
 0x739   :  { %v7831_v2 = vpop.eup %7830 }
 0x73a   :  { %v7833_v49 = vpop.eup %7832 }
 0x769   :  { %v4108_v11 = vpop.permute.xlu1 %4107 }
 0x76a   :  { %5677 = vst [vmem:[%s9086_s20 + $0x10] sm:$0xff] %v4108_v11  ;;  %5678 = vst [vmem:[%s9086_s20 + $0x18] sm:$0xff] %v4108_v11 }
 0x770   :  { %v8651_v15 = vpop.permute.xlu0 %5670 }
 0x771   :  { %v8654_v16 = vand.u32 2147483647, %v8651_v15  ;;  %v6692_v19 = vmul.f32 %v7827_v14, %v8651_v15  ;;  %v6699_v20 = vtrunc.f32 %v8651_v15  ;;  %vm9099_vm3 = vcmp.lt.f32.partialorder %v8651_v15, 0 }
 0x772   :  { %vm8685_vm8 = vmand %vm9099_vm3, %vm9098_vm5  ;;  %vm6555_vm5 = vcmp.eq.f32.partialorder %v8627_v5, 0 }
 0x773   :  { %vm9096_vm2 = vcmp.eq.f32.partialorder %v8654_v16, 2139095040  ;;  %v6703_v21 = vtrunc.f32 %v8654_v16  ;;  %vm6700_vm4 = vcmp.ne.f32.partialorder %v8651_v15, %v6699_v20  ;;  %7834 = vpow2.f32 %v6692_v19  ;;  %vm8691_vm9 = vmxor %vm9099_vm3, %vm6714_vm6 }
 0x774   :  { %v8667_v39 = vpop.permute.xlu1 %4616  ;;  %vm8671_vm7 = vmor %vm6700_vm4, %vm9096_vm2  ;;  %v9120_v33 = vsel %vm8691_vm9, 4294967295, %v9119_v33  ;;  %vm6702_vm4 = vcmp.lt.f32.partialorder %v8654_v16, 1266679808  ;;  %vm9142_vm9 = vcmp.lt.f32.partialorder %v8651_v15, 0 }
 0x775   :  { %v6704_v27 = vcvt.f32.s32 %v6703_v21  ;;  %v6536_v28 = vmul.f32 %v7829_v18, %v8667_v39  ;;  %v8677_v29 = vand.u32 2147483647, %v8667_v39  ;;  %v6543_v30 = vtrunc.f32 %v8667_v39  ;;  %vm6707_vm11 = vmneg %vm8671_vm7 }
 0x776   :  { %v6588_v37 = vmul.f32 %v7831_v2, %v8667_v39  ;;  %vm8715_vm6 = vmand %vm9095_vm12, %vm8671_vm7  ;;  %vm6558_vm12 = vcmp.gt.f32.partialorder %v8635_v8, 1065353216  ;;  %v6718_v20 = vsel %vm9142_vm9, 2139095040, %v8236_v61 }
 0x777   :  { %v6705_v31 = vand.u32 1, %v6704_v27  ;;  %7836 = vpow2.f32 %v6536_v28  ;;  %vm9097_vm10 = vcmp.eq.f32.partialorder %v8677_v29, 2139095040  ;;  %vm6544_vm13 = vcmp.ne.f32.partialorder %v8667_v39, %v6543_v30 }
 0x778   :  { %v6547_v34 = vtrunc.f32 %v8677_v29  ;;  %v8701_v35 = vpop.permute.xlu1 %5332  ;;  %vm8705_vm15 = vmor %vm6544_vm13, %vm9097_vm10  ;;  %7838 = vpow2.f32 %v6588_v37  ;;  %vm6546_vm2 = vcmp.lt.f32.partialorder %v8677_v29, 1266679808  ;;  %vm9148_vm9 = vcmp.eq.f32.partialorder %v8677_v29, 2139095040 }
 0x779   :  { %vm6706_vm14 = vcmp.eq.s32.totalorder %v6705_v31, 1  ;;  %v8728_v47 = vand.u32 2147483647, %v8701_v35  ;;  %v6640_v0 = vmul.f32 %v7833_v49, %v8701_v35  ;;  %v6647_v31 = vtrunc.f32 %v8701_v35 }
 0x77a   :  { %vm6708_vm0 = vmand %vm6706_vm14, %vm6707_vm11  ;;  %v6548_v38 = vcvt.f32.s32 %v6547_v34  ;;  %vm6542_vm11 = vcmp.lt.f32.partialorder %v8667_v39, 0 }
 0x77b   :  { %vm8720_vm13 = vmand %vm6702_vm4, %vm6708_vm0  ;;  %v8748_v51 = vsel %vm6542_vm11, 0, %v8237_v50  ;;  %v6562_v55 = vsel %vm6542_vm11, 2139095040, %v8236_v61  ;;  %v6651_v57 = vtrunc.f32 %v8728_v47  ;;  %vm9102_vm0 = vcmp.ne.f32.partialorder %v8667_v39, %v8667_v39 }
 0x77c   :  { %v6549_v43 = vand.u32 1, %v6548_v38  ;;  %v5140_v44 = vpop.permute.xlu1 %5139  ;;  %vm6551_vm14 = vmneg %vm8705_vm15  ;;  %v6575_v63 = vxor.u32 2147483648, %v8748_v51  ;;  %7840 = vpow2.f32 %v6640_v0 }
 0x77d   :  { %5682 = vst [vmem:[%s9086_s20 + $0x38] sm:$0xff] %v5140_v44  ;;  %vm8738_vm4 = vmand %vm9100_vm1, %vm8705_vm15  ;;  %v7835_v52 = vpop.eup %7834  ;;  %v6652_v19 = vcvt.f32.s32 %v6651_v57 }
 0x77e   :  { %vm6550_vm7 = vcmp.eq.s32.totalorder %v6549_v43, 1  ;;  %v6717_v1 = vsel %vm8715_vm6, 2143289344, %v7835_v52  ;;  %vm9139_vm6 = vcmp.ne.f32.partialorder %v8627_v5, %v8627_v5 }
 0x77f   :  { %vm6552_vm10 = vmand %vm6550_vm7, %vm6551_vm14  ;;  %v6653_v43 = vand.u32 1, %v6652_v19 }
 0x780   :  { %vm8750_vm3 = vmand %vm6546_vm2, %vm6552_vm10  ;;  %vm9131_vm2 = vcmp.lt.s32.totalorder %v8627_v5, 0 }
 0x781   :  { %v7837_v54 = vpop.eup %7836  ;;  %vm8766_vm10 = vmand %vm9131_vm2, %vm8750_vm3  ;;  %v6576_v9 = vsel %vm8750_vm3, %v6575_v63, %v8748_v51 }
 0x782   :  { %v6561_v58 = vsel %vm8738_vm4, 2143289344, %v7837_v54  ;;  %vm8783_vm2 = vmand %vm6542_vm11, %vm6555_vm5  ;;  %vm9103_vm4 = vcmp.eq.f32.partialorder %v8667_v39, 0  ;;  %v7839_v11 = vpop.eup %7838 }
 0x783   :  { %v6563_v22 = vsel %vm6555_vm5, %v6562_v55, %v6561_v58  ;;  %vm6568_vm7 = vmxor %vm6542_vm11, %vm6558_vm12  ;;  %vm6606_vm5 = vcmp.lt.f32.partialorder %v8632_v7, 0  ;;  %vm9136_vm12 = vcmp.lt.s32.totalorder %v8625_v3, 0 }
 0x784   :  { %v6565_v4 = vxor.u32 2147483648, %v6563_v22  ;;  %vm6569_vm1 = vmor %vm8783_vm2, %vm6568_vm7  ;;  %vm6609_vm2 = vcmp.lt.s32.totalorder %v8632_v7, 0  ;;  %v6629_v63 = vsel %vm6606_vm5, %v6576_v9, %v8748_v51 }
 0x785   :  { %vm8814_vm14 = vmand %vm9136_vm12, %vm8720_vm13  ;;  %v6570_v14 = vsel %vm6569_vm1, 2139095040, %v8236_v61  ;;  %vm9143_vm1 = vcmp.eq.f32.partialorder %v8627_v5, 3212836864  ;;  %vm9147_vm12 = vcmp.eq.f32.partialorder %v8625_v3, 0 }
 0x786   :  { %vm8825_vm7 = vmor %vm9139_vm6, %vm9102_vm0  ;;  %v6566_v21 = vsel %vm8766_vm10, %v6565_v4, %v6563_v22  ;;  %v6572_v42 = vsel %vm9143_vm1, 1065353216, %v6570_v14  ;;  %vm9144_vm6 = vcmp.eq.f32.partialorder %v8627_v5, 1065353216  ;;  %v6719_v28 = vsel %vm9147_vm12, %v6718_v20, %v6717_v1  ;;  %v7841_v22 = vpop.eup %7840 }
 0x787   :  { %vm8843_vm0 = vmor %vm9144_vm6, %vm9103_vm4  ;;  %v6573_v2 = vsel %vm9148_vm9, %v6572_v42, %v6566_v21  ;;  %vm9149_vm10 = vcmp.lt.f32.partialorder %v8627_v5, 0  ;;  %vm9150_vm6 = vcmp.eq.f32.partialorder %v8635_v8, 2139095040  ;;  %vm6623_vm9 = vcmp.eq.f32.partialorder %v8632_v7, 3212836864 }
 0x788   :  { %v6577_v30 = vsel %vm9149_vm10, %v6576_v9, %v8748_v51  ;;  %vm6612_vm1 = vmand %vm6606_vm5, %vm8705_vm15  ;;  %vm9153_vm15 = vcmp.lt.f32.partialorder %v8651_v15, 0  ;;  %vm9154_vm10 = vcmp.eq.f32.partialorder %v8632_v7, 0  ;;  %v6721_v44 = vxor.u32 2147483648, %v6719_v28 }
 0x789   :  { %v6578_v34 = vsel %vm9150_vm6, %v6577_v30, %v6573_v2  ;;  %v6613_v37 = vsel %vm6612_vm1, 2143289344, %v7839_v11  ;;  %vm8866_vm12 = vmand %vm6609_vm2, %vm8750_vm3  ;;  %v6730_v36 = vsel %vm9153_vm15, 0, %v8237_v50  ;;  %vm9104_vm2 = vcmp.eq.f32.partialorder %v8667_v39, 1065353216 }
 0x78a   :  { %v6582_v8 = vsel %vm8825_vm7, 2143289344, %v6578_v34  ;;  %v6615_v40 = vsel %vm9154_vm10, %v6562_v55, %v6613_v37  ;;  %vm9155_vm1 = vmmov %vm9154_vm10  ;;  %vm9156_vm6 = vcmp.gt.f32.partialorder %v8640_v10, 1065353216  ;;  %vm6736_vm15 = vcmp.ne.f32.partialorder %v8651_v15, %v8651_v15 }
 0x78b   :  { %vm6619_vm3 = vmand %vm6542_vm11, %vm9155_vm1  ;;  %v6584_v48 = vsel %vm8843_vm0, 1065353216, %v6582_v8  ;;  %v6617_v49 = vxor.u32 2147483648, %v6615_v40  ;;  %vm6643_vm1 = vcmp.eq.f32.partialorder %v8728_v47, 2139095040  ;;  %vm8896_vm4 = vcmp.ne.f32.partialorder %v8701_v35, %v6647_v31  ;;  %v5543_v8 = vpop.permute.xlu1 %5542 }
 0x78c   :  { %vm6620_vm7 = vmxor %vm6542_vm11, %vm9156_vm6  ;;  %v6585_v52 = vsel %vm9104_vm2, %v8627_v5, %v6584_v48  ;;  %vm9159_vm11 = vcmp.ne.f32.partialorder %v8667_v39, %v8667_v39  ;;  %vm9160_vm0 = vcmp.ne.f32.partialorder %v8632_v7, %v8632_v7  ;;  %v6731_v58 = vxor.u32 2147483648, %v6730_v36 }
 0x78d   :  { %vm6621_vm10 = vmor %vm6619_vm3, %vm6620_vm7  ;;  %v6618_v54 = vsel %vm8866_vm12, %v6617_v49, %v6615_v40  ;;  %v4621_v56 = vmul.f32 %v6585_v52, %v4602_v25  ;;  %vm6727_vm3 = vcmp.eq.f32.partialorder %v8625_v3, 3212836864  ;;  %vm9163_vm12 = vnez %v9120_v33 }
 0x78e   :  { %v6622_v55 = vsel %vm6621_vm10, 2139095040, %v8236_v61  ;;  %vm8909_vm6 = vmor %vm9160_vm0, %vm9159_vm11  ;;  %vm9165_vm10 = vcmp.eq.f32.partialorder %v8667_v39, 0  ;;  %vm9166_vm11 = vcmp.eq.f32.partialorder %v8632_v7, 1065353216  ;;  %vm8932_vm2 = vcmp.eq.s32.totalorder %v6653_v43, 1 }
 0x78f   :  { %vm9164_vm7 = vmor %vm8685_vm8, %vm9163_vm12  ;;  %v6624_v62 = vsel %vm6623_vm9, 1065353216, %v6622_v55  ;;  %vm9171_vm8 = vcmp.ne.f32.partialorder %v8625_v3, %v8625_v3  ;;  %vm9174_vm9 = vcmp.eq.f32.partialorder %v8677_v29, 2139095040  ;;  %5675 = vst [vmem:[%s9086_s20] sm:$0xff] %v4621_v56  ;;  %v6722_v29 = vsel %vm8814_vm14, %v6721_v44, %v6719_v28 }
 0x790   :  { %v6726_v57 = vsel %vm9164_vm7, 2139095040, %v8236_v61  ;;  %vm8928_vm0 = vmor %vm9166_vm11, %vm9165_vm10  ;;  %v6625_v33 = vsel %vm9174_vm9, %v6624_v62, %v6618_v54  ;;  %vm6646_vm7 = vcmp.lt.f32.partialorder %v8701_v35, 0  ;;  %vm9177_vm10 = vcmp.eq.f32.partialorder %v8640_v10, 2139095040 }
 0x791   :  { %vm8942_vm12 = vmor %vm9171_vm8, %vm6736_vm15  ;;  %v6630_v51 = vsel %vm9177_vm10, %v6629_v63, %v6625_v33  ;;  %vm6658_vm11 = vcmp.lt.f32.partialorder %v8649_v13, 0  ;;  %vm6659_vm8 = vcmp.eq.f32.partialorder %v8649_v13, 0  ;;  %vm6661_vm9 = vcmp.lt.s32.totalorder %v8649_v13, 0 }
 0x792   :  { %vm8959_vm15 = vmor %vm8896_vm4, %vm6643_vm1  ;;  %v6634_v1 = vsel %vm8909_vm6, 2143289344, %v6630_v51  ;;  %vm6650_vm4 = vcmp.lt.f32.partialorder %v8728_v47, 1266679808  ;;  %v6728_v10 = vsel %vm6727_vm3, 1065353216, %v6726_v57  ;;  %v6732_v4 = vsel %vm8720_vm13, %v6731_v58, %v6730_v36 }
 0x793   :  { %vm6655_vm5 = vmneg %vm8959_vm15  ;;  %v6636_v9 = vsel %vm8928_vm0, 1065353216, %v6634_v1  ;;  %v6678_v12 = vsel %vm6646_vm7, 0, %v8237_v50  ;;  %vm6715_vm6 = vcmp.eq.f32.partialorder %v8630_v6, 2139095040  ;;  %vm9181_vm3 = vcmp.eq.f32.partialorder %v8667_v39, 1065353216 }
 0x794   :  { %vm6656_vm14 = vmand %vm8932_vm2, %vm6655_vm5  ;;  %vm9180_vm2 = vcmp.eq.f32.partialorder %v8654_v16, 2139095040  ;;  %v6637_v41 = vsel %vm9181_vm3, %v8632_v7, %v6636_v9  ;;  %vm6662_vm13 = vcmp.gt.f32.partialorder %v8657_v17, 1065353216  ;;  %v6666_v6 = vsel %vm6646_vm7, 2139095040, %v8236_v61 }
 0x795   :  { %vm8983_vm10 = vmand %vm6650_vm4, %vm6656_vm14  ;;  %v6729_v14 = vsel %vm9180_vm2, %v6728_v10, %v6722_v29  ;;  %v4622_v18 = vmul.f32 %v6637_v41, %v4603_v26  ;;  %vm9184_vm4 = vcmp.lt.f32.partialorder %v8625_v3, 0  ;;  %v6679_v26 = vxor.u32 2147483648, %v6678_v12 }
 0x796   :  { %vm6664_vm0 = vmand %vm6658_vm11, %vm8959_vm15  ;;  %v6733_v16 = vsel %vm9184_vm4, %v6732_v4, %v6730_v36  ;;  %vm6675_vm14 = vcmp.eq.f32.partialorder %v8649_v13, 3212836864  ;;  %vm6712_vm2 = vcmp.eq.f32.partialorder %v8625_v3, 1065353216  ;;  %vm6696_vm3 = vcmp.eq.f32.partialorder %v8651_v15, 0 }
 0x797   :  { %v6665_v50 = vsel %vm6664_vm0, 2143289344, %v7841_v22  ;;  %vm9010_vm5 = vmand %vm6661_vm9, %vm8983_vm10  ;;  %v6734_v39 = vsel %vm6715_vm6, %v6733_v16, %v6729_v14  ;;  %5676 = vst [vmem:[%s9086_s20 + $0x8] sm:$0xff] %v4622_v18  ;;  %vm6663_vm0 = vcmp.eq.f32.partialorder %v8657_v17, 2139095040  ;;  %v6680_v20 = vsel %vm8983_vm10, %v6679_v26, %v6678_v12 }
 0x798   :  { %v6667_v24 = vsel %vm6659_vm8, %v6666_v6, %v6665_v50  ;;  %vm6671_vm15 = vmand %vm6646_vm7, %vm6659_vm8  ;;  %vm6683_vm8 = vcmp.ne.f32.partialorder %v8649_v13, %v8649_v13  ;;  %v6738_v27 = vsel %vm8942_vm12, 2143289344, %v6734_v39  ;;  %vm6644_vm6 = vcmp.eq.f32.partialorder %v8701_v35, 0 }
 0x799   :  { %v6669_v19 = vxor.u32 2147483648, %v6667_v24  ;;  %vm6672_vm9 = vmxor %vm6646_vm7, %vm6662_vm13  ;;  %vm6684_vm7 = vcmp.ne.f32.partialorder %v8701_v35, %v8701_v35  ;;  %vm6660_vm13 = vcmp.eq.f32.partialorder %v8649_v13, 1065353216  ;;  %v6681_v2 = vsel %vm6658_vm11, %v6680_v20, %v6678_v12 }
 0x79a   :  { %vm6673_vm4 = vmor %vm6671_vm15, %vm6672_vm9  ;;  %vm6697_vm15 = vcmp.eq.f32.partialorder %v8651_v15, 1065353216  ;;  %vm6645_vm9 = vcmp.eq.f32.partialorder %v8701_v35, 1065353216 }
 0x79b   :  { %v6670_v21 = vsel %vm9010_vm5, %v6669_v19, %v6667_v24  ;;  %v6674_v42 = vsel %vm6673_vm4, 2139095040, %v8236_v61  ;;  %vm6739_vm10 = vmor %vm6712_vm2, %vm6696_vm3 }
 0x79c   :  { %v6676_v17 = vsel %vm6675_vm14, 1065353216, %v6674_v42  ;;  %vm6685_vm5 = vmor %vm6683_vm8, %vm6684_vm7  ;;  %v6740_v30 = vsel %vm6739_vm10, 1065353216, %v6738_v27  ;;  %vm5686_vm14 = vcmask 1048064  }
 0x79d   :  { %v6677_v28 = vsel %vm6643_vm1, %v6676_v17, %v6670_v21  ;;  %vm6687_vm12 = vmor %vm6660_vm13, %vm6644_vm6  ;;  %v6741_v34 = vsel %vm6697_vm15, %v8625_v3, %v6740_v30  ;;  %vm9185_vm1 = vcmask 523264  }
 0x79e   :  { %v6682_v61 = vsel %vm6663_vm0, %v6681_v2, %v6677_v28  ;;  %v5674_v47 = vmul.f32 %v6741_v34, %v5662_v46 }
 0x79f   :  { %v6686_v31 = vsel %vm6685_vm5, 2143289344, %v6682_v61 }
 0x7a0   :  { %v6688_v37 = vsel %vm6687_vm12, 1065353216, %v6686_v31  ;;  %5685 = vst.msk [vmem:[%s9086_s20 + $0x48] sm:$0xff] %vm9185_vm1, %v5674_v47 }
 0x7a1   :  { %v6689_v38 = vsel %vm6645_vm9, %v8649_v13, %v6688_v37  ;;  %5687 = vst.msk [vmem:[%s9086_s20 + $0x48] sm:$0xff] %vm5686_vm14, %v5543_v8 }
 0x7a2   :  { %v5336_v36 = vmul.f32 %v6689_v38, %v5324_v60 }
 0x7a4   :  { %5681 = vst [vmem:[%s9086_s20 + $0x30] sm:$0xff] %v5336_v36 }
 0x7a5   :  { %5693 = vsyncpa [#allocation6], 1 }
 0x7a6   :  { %5694 = vsyncpa [#allocation8], 1 }
 0x7a7   :  { %5695 = vsyncpa [#allocation11], 1 }
 0x7a8   :  { %5696 = vsyncpa [#allocation14], 1 }
 0x7a9   :  { %5697 = vsyncpa [#allocation17], 1 }
 0x7aa   :  { %5698 = vsyncpa [#allocation20], 1 }
 0x7ab   :  { %5699 = vsyncpa [#allocation23], 1 }
 0x7ac   :  { %5700 = vsyncpa [#allocation26], 1 }
 0x7ad   :  { %5701 = vsyncpa [#allocation29], 1 }

</bundles_post_ra>
